<compile_context>
chip_gen: v7x
topology: tpu7x:2x2x1
jax: 0.10.0
libtpu: 0.0.40
codegen_flags: <defaults>
</compile_context>

<pallas_src>
import functools

import jax
import jax.numpy as jnp
from jax.experimental import pallas as pl
from jax.experimental.pallas import tpu as pltpu

LANE = 128


def _round_up(x, m):
    return (x + m - 1) // m * m


# ----------------------------------------------------------------------------
# Fused ASPP kernel: per (batch, row-tile) computes the 1x1 branch, the three
# dilated 3x3 branches, folds each branch through its slice of the final 1x1
# conv, adds the precomputed pool-branch contribution and final BN bias, and
# writes the ReLU'd output directly.  Input row-windows are manually DMA'd
# from HBM with 2-slot double buffering.
# ----------------------------------------------------------------------------
def _aspp_fused_kernel(xp_hbm, w_init_ref, w_atr_ref, w_fin_ref, b_br_ref,
                       contrib_ref, fin_bias_ref, o_ref,
                       win_ref, dma_sem,
                       *, rates, pad, tile_h, out_w, cin_p, cout_p, packed):
    b = pl.program_id(0)
    t = pl.program_id(1)
    num_t = pl.num_programs(1)
    nrows = tile_h + 2 * pad
    slot = t % 2

    def issue(tile_idx, into_slot):
        row0 = pl.multiple_of(tile_idx * tile_h, tile_h)
        pltpu.make_async_copy(
            xp_hbm.at[b, pl.ds(row0, nrows)],
            win_ref.at[into_slot],
            dma_sem.at[into_slot]).start()

    # First tile of this batch on this core: nothing was prefetched, issue now.
    @pl.when(t == 0)
    def _():
        issue(t, slot)

    # Prefetch the next row-window of the same batch into the other slot so
    # the DMA overlaps with this tile's matmuls.
    @pl.when(t + 1 < num_t)
    def _():
        issue(t + 1, (t + 1) % 2)

    # Wait for the current tile's window.
    pltpu.make_async_copy(
        xp_hbm.at[b, pl.ds(0, nrows)],
        win_ref.at[slot],
        dma_sem.at[slot]).wait()

    win = win_ref[slot]                               # (nrows, W, Cin_p)
    m = tile_h * out_w
    center = win[pad:pad + tile_h].reshape(m, cin_p)  # rows [pad, pad+tile_h)

    def tap(kh, kw, d):
        """Input tap for (kh, kw) of a 3x3 conv with dilation d.

        Rows come from the HBM row-padding (zeros); columns outside [0, W)
        are synthesized as static zero blocks (edge masking), so the input
        never needs horizontal zero padding in HBM.
        """
        if kh == 1 and kw == 1:
            return center
        r0 = pad + (kh - 1) * d
        rows = win[r0:r0 + tile_h]                    # (tile_h, W, Cin_p)
        co = (kw - 1) * d                             # horizontal source offset
        if co == 0:
            sl = rows
        else:
            left = min(max(0, -co), out_w)
            right = min(max(0, co), out_w)
            body_w = out_w - left - right
            parts = []
            if left:
                parts.append(jnp.zeros((tile_h, left, cin_p), rows.dtype))
            if body_w > 0:
                start = max(0, co)
                parts.append(rows[:, start:start + body_w, :])
            if right:
                parts.append(jnp.zeros((tile_h, right, cin_p), rows.dtype))
            sl = parts[0] if len(parts) == 1 else jnp.concatenate(parts, axis=1)
        return sl.reshape(m, cin_p)

    # Branch 0: 1x1 conv (BN scale folded into the weights) + bias + ReLU,
    # immediately folded through its block of the final 1x1 conv.
    y = jnp.dot(center, w_init_ref[...], preferred_element_type=jnp.float32)
    y = jnp.maximum(y + b_br_ref[0], 0.0)
    acc = jnp.dot(y.astype(w_fin_ref.dtype), w_fin_ref[0],
                  preferred_element_type=jnp.float32)

    # Dilated 3x3 branches.
    for i, d in enumerate(rates):
        if packed:
            # Small Cin: pack the 9 taps into one K = 9*Cin_p matmul.
            slab = jnp.concatenate(
                [tap(kh, kw, d) for kh in range(3) for kw in range(3)], axis=1)
            y = jnp.dot(slab, w_atr_ref[i], preferred_element_type=jnp.float32)
        else:
            # Large Cin: 9 per-tap matmuls accumulate in f32; no im2col slab.
            y = jnp.dot(tap(0, 0, d), w_atr_ref[i, 0],
                        preferred_element_type=jnp.float32)
            for k in range(1, 9):
                y = y + jnp.dot(tap(k // 3, k % 3, d), w_atr_ref[i, k],
                                preferred_element_type=jnp.float32)
        y = jnp.maximum(y + b_br_ref[i + 1], 0.0)
        acc = acc + jnp.dot(y.astype(w_fin_ref.dtype), w_fin_ref[i + 1],
                            preferred_element_type=jnp.float32)

    # Epilogue: pool-branch contribution (per batch, precomputed in the
    # wrapper) + final BN bias (final BN scale already folded) + ReLU.
    o_ref[...] = jnp.maximum(acc + contrib_ref[0] + fin_bias_ref[...], 0.0)


# ----------------------------------------------------------------------------
# Parameter handling
# ----------------------------------------------------------------------------
def _fold_bn(gamma, beta, mean, var, eps=1e-5):
    scale = gamma / jnp.sqrt(var + eps)
    bias = beta - mean * scale
    return scale, bias


def init_aspp_params(key, in_channels, out_channels, atrous_rates):
    state = {"key": key}

    def next_key():
        state["key"], sub = jax.random.split(state["key"])
        return sub

    def conv_w(shape):
        return 0.1 * jax.random.normal(next_key(), shape, jnp.float32)

    def bn(c):
        gamma = 0.5 + jax.random.uniform(next_key(), (c,), jnp.float32)
        beta = 0.1 * jax.random.normal(next_key(), (c,), jnp.float32)
        mean = 0.1 * jax.random.normal(next_key(), (c,), jnp.float32)
        var = 0.5 + jax.random.uniform(next_key(), (c,), jnp.float32)
        return _fold_bn(gamma, beta, mean, var)

    p = {}
    p["init_w"] = conv_w((in_channels, out_channels))
    p["init_scale"], p["init_bias"] = bn(out_channels)
    for i, _r in enumerate(atrous_rates):
        p[f"atr{i}_w"] = conv_w((3, 3, in_channels, out_channels))
        p[f"atr{i}_scale"], p[f"atr{i}_bias"] = bn(out_channels)
    p["pool_w"] = conv_w((in_channels, out_channels))
    p["pool_scale"], p["pool_bias"] = bn(out_channels)
    p["final_w"] = conv_w((5 * out_channels, out_channels))
    p["final_scale"], p["final_bias"] = bn(out_channels)
    return p


def _prepare_kernel_params(p, cin, cout, rates, cin_p, cout_p, compute_dtype,
                           packed):
    """Pad to lane multiples, fold BN scales into weight columns, split the
    final 1x1 conv by branch so the 5*Cout concat is never materialized."""
    nb = len(rates)

    def pad_oc(v):                                   # (cout,) -> (1, cout_p)
        return jnp.pad(v, (0, cout_p - cout)).reshape(1, cout_p)

    kp = {}
    kp["w_init"] = jnp.pad(
        p["init_w"] * p["init_scale"][None, :],
        ((0, cin_p - cin), (0, cout_p - cout))).astype(compute_dtype)

    atr = []
    for i in range(nb):
        wi = p[f"atr{i}_w"] * p[f"atr{i}_scale"][None, None, None, :]
        wi = jnp.pad(wi, ((0, 0), (0, 0), (0, cin_p - cin), (0, cout_p - cout)))
        atr.append(wi.reshape(9, cin_p, cout_p))
    w_atr = jnp.stack(atr, axis=0)                   # (nb, 9, cin_p, cout_p)
    if packed:
        w_atr = w_atr.reshape(nb, 9 * cin_p, cout_p)
    kp["w_atr"] = w_atr.astype(compute_dtype)

    # Final 1x1 conv rows ordered [init, atr0, atr1, atr2, pool]; final BN
    # scale folded into its columns.
    fw = p["final_w"] * p["final_scale"][None, :]    # (5*cout, cout)
    fin_blocks = [fw[k * cout:(k + 1) * cout, :] for k in range(nb + 2)]
    kp["w_fin_br"] = jnp.stack(
        [jnp.pad(blk, ((0, cout_p - cout), (0, cout_p - cout)))
         for blk in fin_blocks[:nb + 1]], axis=0).astype(compute_dtype)
    kp["w_fin_pool"] = fin_blocks[nb + 1]            # (cout, cout) f32, wrapper

    kp["b_br"] = jnp.stack(
        [pad_oc(p["init_bias"])] + [pad_oc(p[f"atr{i}_bias"]) for i in range(nb)],
        axis=0)                                      # (nb+1, 1, cout_p) f32
    kp["fin_bias"] = pad_oc(p["final_bias"])         # (1, cout_p) f32

    kp["w_pool"] = p["pool_w"] * p["pool_scale"][None, :]   # (cin, cout) f32
    kp["pool_bias"] = p["pool_bias"]
    return kp


# ----------------------------------------------------------------------------
# VMEM budget / tile selection (generation aware)
# ----------------------------------------------------------------------------
def _vmem_budget_bytes():
    try:
        phys = int(pltpu.get_tpu_info().vmem_capacity_bytes)
    except Exception:
        phys = 64 * 1024 * 1024        # conservative (v7x-sized) fallback
    # ~96 MiB on 128 MiB parts (v5e/v6e), ~48 MiB on 64 MiB parts (v7x).
    return min(phys * 3 // 4, 110 * 1024 * 1024)


def _estimate_vmem(tile_h, w, pad, cin_p, cout_p, nb, packed, itemsize):
    nrows = tile_h + 2 * pad
    m = tile_h * w
    weights = 2 * itemsize * (cin_p * cout_p + nb * 9 * cin_p * cout_p
                              + (nb + 1) * cout_p * cout_p)   # double-buffered
    window = 3 * itemsize * nrows * w * cin_p     # 2 DMA slots + loaded value
    out_blk = 2 * 4 * m * cout_p                  # double-buffered output
    temps = itemsize * m * cin_p * (10 if packed else 3) + 3 * 4 * m * cout_p
    return weights + window + out_blk + temps + (2 << 20)


def _choose_tile_h(h, w, pad, cin_p, cout_p, nb, packed, itemsize,
                   vmem_budget, max_tile_h=None):
    # tile_h must divide H and keep the flat output block (tile_h*W, Cout_p)
    # sublane-legal (multiple of 8).
    cands = [d for d in range(1, h + 1) if h % d == 0 and (d * w) % 8 == 0]
    if not cands:
        # TODO(synk): support masked edge tiles when H*W is not 8-aligned.
        raise NotImplementedError("tile_h * W must be a multiple of 8")
    best = cands[0]
    for d in cands:
        if max_tile_h is not None and d > max_tile_h:
            continue
        if _estimate_vmem(d, w, pad, cin_p, cout_p, nb, packed,
                          itemsize) <= int(vmem_budget * 0.85):
            best = max(best, d)
    return best


# ----------------------------------------------------------------------------
# Forward pass (matches _ASPPBlock.forward, inference-mode BatchNorm)
# ----------------------------------------------------------------------------
def aspp_forward(params, x_nchw, atrous_rates, *, max_tile_h=None,
                 compute_dtype=jnp.bfloat16):
    rates = tuple(int(r) for r in atrous_rates)
    nb = len(rates)
    assert nb == 3, "_ASPPBlock has exactly 3 atrous branches"

    n, cin, h, w = x_nchw.shape
    cout = params["init_w"].shape[1]
    cin_p = _round_up(cin, LANE)
    cout_p = _round_up(cout, LANE)
    pad = max(rates)
    packed = cin_p < 256               # pack 9 taps into one K=9*Cin_p matmul
    itemsize = jnp.dtype(compute_dtype).itemsize

    vmem_budget = int(_vmem_budget_bytes())
    tile_h = _choose_tile_h(h, w, pad, cin_p, cout_p, nb, packed, itemsize,
                            vmem_budget, max_tile_h)
    num_t = h // tile_h
    m_tile = tile_h * w

    # NCHW -> NHWC; per-batch channel mean in f32 (AdaptiveAvgPool2d); zero
    # padding along ROWS only + lane-padded channels; cast to bf16 once.
    x_nhwc = jnp.transpose(x_nchw, (0, 2, 3, 1)).astype(jnp.float32)
    pool_mean = jnp.mean(x_nhwc, axis=(1, 2))                    # (N, Cin) f32
    xp = jnp.pad(x_nhwc, ((0, 0), (pad, pad), (0, 0), (0, cin_p - cin)))
    xp = xp.astype(compute_dtype)                 # (N, H+2*pad, W, Cin_p)

    kp = _prepare_kernel_params(params, cin, cout, rates, cin_p, cout_p,
                                compute_dtype, packed)

    # Pool branch (tiny, f32, in the wrapper): mean -> 1x1 conv (scale folded)
    # -> bias -> ReLU -> its block of the final conv.  Bilinear upsample of a
    # 1x1 map is a constant broadcast, so a single (N, Cout) vector suffices.
    pooled = jnp.maximum(pool_mean @ kp["w_pool"] + kp["pool_bias"][None, :], 0.0)
    contrib = pooled @ kp["w_fin_pool"]                           # (N, Cout)
    contrib_p = jnp.pad(contrib, ((0, 0), (0, cout_p - cout))).reshape(
        n, 1, cout_p)

    if packed:
        atr_spec = pl.BlockSpec((nb, 9 * cin_p, cout_p), lambda b, t: (0, 0, 0))
    else:
        atr_spec = pl.BlockSpec((nb, 9, cin_p, cout_p),
                                lambda b, t: (0, 0, 0, 0))

    kernel = functools.partial(
        _aspp_fused_kernel, rates=rates, pad=pad, tile_h=tile_h, out_w=w,
        cin_p=cin_p, cout_p=cout_p, packed=packed)

    # TODO(synk): at production channel counts on v7x (64 MiB VMEM), single-
    # buffer the constant weight blocks (pl.Buffered(1)) or loop over
    # per-branch weight slices so only a (3*Cin_p, Cout_p) slice is resident;
    # optionally store weights in fp8 once the kernel is MXU-bound.
    out_flat = pl.pallas_call(
        kernel,
        out_shape=jax.ShapeDtypeStruct((n * h * w, cout_p), jnp.float32),
        grid=(n, num_t),
        in_specs=[
            pl.BlockSpec(memory_space=pl.ANY),                       # xp (HBM)
            pl.BlockSpec((cin_p, cout_p), lambda b, t: (0, 0)),       # w_init
            atr_spec,                                                 # w_atr
            pl.BlockSpec((nb + 1, cout_p, cout_p),
                         lambda b, t: (0, 0, 0)),                     # w_fin
            pl.BlockSpec((nb + 1, 1, cout_p), lambda b, t: (0, 0, 0)),  # b_br
            pl.BlockSpec((1, 1, cout_p), lambda b, t: (b, 0, 0)),     # contrib
            pl.BlockSpec((1, cout_p), lambda b, t: (0, 0)),           # fin_bias
        ],
        out_specs=pl.BlockSpec((m_tile, cout_p),
                               lambda b, t: (b * num_t + t, 0)),
        scratch_shapes=[
            pltpu.VMEM((2, tile_h + 2 * pad, w, cin_p), compute_dtype),
            pltpu.SemaphoreType.DMA((2,)),
        ],
        compiler_params=pltpu.CompilerParams(
            dimension_semantics=("parallel", "arbitrary"),
            vmem_limit_bytes=vmem_budget),
    )(xp, kp["w_init"], kp["w_atr"], kp["w_fin_br"], kp["b_br"],
      contrib_p, kp["fin_bias"])

    out = out_flat[:, :cout].reshape(n, h, w, cout)
    return jnp.transpose(out, (0, 3, 1, 2))        # NHWC -> NCHW


if __name__ == "__main__":
    key = jax.random.PRNGKey(0)
    k_x, k_p = jax.random.split(key)

    batch, in_channels, out_channels = 2, 4, 8
    H = W = 16
    atrous_rates = (1, 2, 3)

    x = jax.random.normal(k_x, (batch, in_channels, H, W), jnp.float32)
    params = init_aspp_params(k_p, in_channels, out_channels, atrous_rates)

    # max_tile_h=8 forces num_t=2 so the double-buffered prefetch path and the
    # multi-tile output indexing are exercised even at this small shape.
    fwd = jax.jit(functools.partial(aspp_forward, atrous_rates=atrous_rates,
                                    max_tile_h=8))
    out = fwd(params, x)
    out = jax.block_until_ready(out)

    assert out.shape == (batch, out_channels, H, W)
    assert bool(jnp.all(jnp.isfinite(out)))
    print("KERNEL_OK")
</pallas_src>

<mosaic_0001>
module attributes {stable_mosaic.version = 11 : i64} {
  func.func @_aspp_fused_kernel(%arg0: i32, %arg1: i32, %arg2: memref<2x22x16x128xbf16, #tpu.memory_space<any>>, %arg3: memref<128x128xbf16, #tpu.memory_space<vmem>>, %arg4: memref<3x1152x128xbf16, #tpu.memory_space<vmem>>, %arg5: memref<4x128x128xbf16, #tpu.memory_space<vmem>>, %arg6: memref<4x1x128xf32, #tpu.memory_space<vmem>>, %arg7: memref<1x1x128xf32, #tpu.memory_space<vmem>>, %arg8: memref<1x128xf32, #tpu.memory_space<vmem>>, %arg9: memref<128x128xf32, #tpu.memory_space<vmem>>, %arg10: memref<2x14x16x128xbf16, #tpu.memory_space<vmem>>, %arg11: memref<2x!tpu.dma_semaphore, #tpu.memory_space<semaphore_mem>>) attributes {dimension_semantics = [#tpu.dimension_semantics<parallel>, #tpu.dimension_semantics<arbitrary>], iteration_bounds = array<i64: 2, 2>, scalar_prefetch = 0 : i64, scratch_operands = 2 : i64, tpu.core_type = #tpu.core_type<tc>, window_params = [{}, {pipeline_mode = #tpu.pipeline_mode<synchronous>, transform_indices = @transform_1, window_bounds = array<i64: 128, 128>}, {pipeline_mode = #tpu.pipeline_mode<synchronous>, transform_indices = @transform_2, window_bounds = array<i64: 3, 1152, 128>}, {pipeline_mode = #tpu.pipeline_mode<synchronous>, transform_indices = @transform_3, window_bounds = array<i64: 4, 128, 128>}, {pipeline_mode = #tpu.pipeline_mode<synchronous>, transform_indices = @transform_4, window_bounds = array<i64: 4, 1, 128>}, {transform_indices = @transform_5, window_bounds = array<i64: 1, 1, 128>}, {pipeline_mode = #tpu.pipeline_mode<synchronous>, transform_indices = @transform_6, window_bounds = array<i64: 1, 128>}, {transform_indices = @transform_7, window_bounds = array<i64: 128, 128>}]} {
    %c2_i32 = arith.constant 2 : i32
    %c0_i32 = arith.constant 0 : i32
    %0 = arith.cmpi eq, %c2_i32, %c0_i32 : i32
    %c1_i32 = arith.constant 1 : i32
    %1 = arith.select %0, %c1_i32, %c2_i32 : i32
    %2 = arith.remsi %arg1, %1 : i32
    %c0_i32_0 = arith.constant 0 : i32
    %3 = arith.cmpi ne, %2, %c0_i32_0 : i32
    %c0_i32_1 = arith.constant 0 : i32
    %4 = arith.cmpi slt, %2, %c0_i32_1 : i32
    %c0_i32_2 = arith.constant 0 : i32
    %5 = arith.cmpi slt, %1, %c0_i32_2 : i32
    %6 = arith.xori %4, %5 : i1
    %7 = arith.andi %6, %3 : i1
    %8 = arith.addi %2, %1 : i32
    %9 = arith.select %7, %8, %2 : i32
    %c0_i32_3 = arith.constant 0 : i32
    %10 = arith.cmpi eq, %arg1, %c0_i32_3 : i32
    %11 = arith.extui %10 : i1 to i32
    %c0_i32_4 = arith.constant 0 : i32
    %12 = arith.cmpi ne, %11, %c0_i32_4 : i32
    scf.if %12 {
      %c8_i32 = arith.constant 8 : i32
      %197 = arith.muli %arg1, %c8_i32 : i32
      %198 = tpu.assume_multiple %197, 8 : i32
      %c0_i32_85 = arith.constant 0 : i32
      %c0_i32_86 = arith.constant 0 : i32
      %199 = tpu.memref_slice %arg2[%arg0, %198, %c0_i32_85, %c0_i32_86] : memref<2x22x16x128xbf16, #tpu.memory_space<any>> -> memref<1x14x16x128xbf16, #tpu.memory_space<any>>
      %200 = tpu.memref_squeeze %199 : memref<1x14x16x128xbf16, #tpu.memory_space<any>> -> memref<14x16x128xbf16, #tpu.memory_space<any>>
      %c0_i32_87 = arith.constant 0 : i32
      %c0_i32_88 = arith.constant 0 : i32
      %c0_i32_89 = arith.constant 0 : i32
      %201 = tpu.memref_slice %arg10[%9, %c0_i32_87, %c0_i32_88, %c0_i32_89] : memref<2x14x16x128xbf16, #tpu.memory_space<vmem>> -> memref<1x14x16x128xbf16, #tpu.memory_space<vmem>>
      %202 = tpu.memref_squeeze %201 : memref<1x14x16x128xbf16, #tpu.memory_space<vmem>> -> memref<14x16x128xbf16, #tpu.memory_space<vmem>>
      %203 = tpu.memref_slice %arg11[%9] : memref<2x!tpu.dma_semaphore, #tpu.memory_space<semaphore_mem>> -> memref<1x!tpu.dma_semaphore, #tpu.memory_space<semaphore_mem>>
      %204 = tpu.memref_squeeze %203 : memref<1x!tpu.dma_semaphore, #tpu.memory_space<semaphore_mem>> -> memref<!tpu.dma_semaphore, #tpu.memory_space<semaphore_mem>>
      tpu.enqueue_dma source(%200 : memref<14x16x128xbf16, #tpu.memory_space<any>>) target(%202 : memref<14x16x128xbf16, #tpu.memory_space<vmem>>) target_semaphore(%204 : memref<!tpu.dma_semaphore, #tpu.memory_space<semaphore_mem>>)
    } else {
    }
    %c1_i32_5 = arith.constant 1 : i32
    %13 = arith.addi %arg1, %c1_i32_5 : i32
    %c2_i32_6 = arith.constant 2 : i32
    %14 = arith.cmpi slt, %13, %c2_i32_6 : i32
    %15 = arith.extui %14 : i1 to i32
    %c0_i32_7 = arith.constant 0 : i32
    %16 = arith.cmpi ne, %15, %c0_i32_7 : i32
    scf.if %16 {
      %c1_i32_85 = arith.constant 1 : i32
      %197 = arith.addi %arg1, %c1_i32_85 : i32
      %c1_i32_86 = arith.constant 1 : i32
      %198 = arith.addi %arg1, %c1_i32_86 : i32
      %c2_i32_87 = arith.constant 2 : i32
      %c0_i32_88 = arith.constant 0 : i32
      %199 = arith.cmpi eq, %c2_i32_87, %c0_i32_88 : i32
      %c1_i32_89 = arith.constant 1 : i32
      %200 = arith.select %199, %c1_i32_89, %c2_i32_87 : i32
      %201 = arith.remsi %198, %200 : i32
      %c0_i32_90 = arith.constant 0 : i32
      %202 = arith.cmpi ne, %201, %c0_i32_90 : i32
      %c0_i32_91 = arith.constant 0 : i32
      %203 = arith.cmpi slt, %201, %c0_i32_91 : i32
      %c0_i32_92 = arith.constant 0 : i32
      %204 = arith.cmpi slt, %200, %c0_i32_92 : i32
      %205 = arith.xori %203, %204 : i1
      %206 = arith.andi %205, %202 : i1
      %207 = arith.addi %201, %200 : i32
      %208 = arith.select %206, %207, %201 : i32
      %c8_i32 = arith.constant 8 : i32
      %209 = arith.muli %197, %c8_i32 : i32
      %210 = tpu.assume_multiple %209, 8 : i32
      %c0_i32_93 = arith.constant 0 : i32
      %c0_i32_94 = arith.constant 0 : i32
      %211 = tpu.memref_slice %arg2[%arg0, %210, %c0_i32_93, %c0_i32_94] : memref<2x22x16x128xbf16, #tpu.memory_space<any>> -> memref<1x14x16x128xbf16, #tpu.memory_space<any>>
      %212 = tpu.memref_squeeze %211 : memref<1x14x16x128xbf16, #tpu.memory_space<any>> -> memref<14x16x128xbf16, #tpu.memory_space<any>>
      %c0_i32_95 = arith.constant 0 : i32
      %c0_i32_96 = arith.constant 0 : i32
      %c0_i32_97 = arith.constant 0 : i32
      %213 = tpu.memref_slice %arg10[%208, %c0_i32_95, %c0_i32_96, %c0_i32_97] : memref<2x14x16x128xbf16, #tpu.memory_space<vmem>> -> memref<1x14x16x128xbf16, #tpu.memory_space<vmem>>
      %214 = tpu.memref_squeeze %213 : memref<1x14x16x128xbf16, #tpu.memory_space<vmem>> -> memref<14x16x128xbf16, #tpu.memory_space<vmem>>
      %215 = tpu.memref_slice %arg11[%208] : memref<2x!tpu.dma_semaphore, #tpu.memory_space<semaphore_mem>> -> memref<1x!tpu.dma_semaphore, #tpu.memory_space<semaphore_mem>>
      %216 = tpu.memref_squeeze %215 : memref<1x!tpu.dma_semaphore, #tpu.memory_space<semaphore_mem>> -> memref<!tpu.dma_semaphore, #tpu.memory_space<semaphore_mem>>
      tpu.enqueue_dma source(%212 : memref<14x16x128xbf16, #tpu.memory_space<any>>) target(%214 : memref<14x16x128xbf16, #tpu.memory_space<vmem>>) target_semaphore(%216 : memref<!tpu.dma_semaphore, #tpu.memory_space<semaphore_mem>>)
    } else {
    }
    %c0_i32_8 = arith.constant 0 : i32
    %c0_i32_9 = arith.constant 0 : i32
    %c0_i32_10 = arith.constant 0 : i32
    %17 = tpu.memref_slice %arg2[%arg0, %c0_i32_8, %c0_i32_9, %c0_i32_10] : memref<2x22x16x128xbf16, #tpu.memory_space<any>> -> memref<1x14x16x128xbf16, #tpu.memory_space<any>>
    %18 = tpu.memref_squeeze %17 : memref<1x14x16x128xbf16, #tpu.memory_space<any>> -> memref<14x16x128xbf16, #tpu.memory_space<any>>
    %c0_i32_11 = arith.constant 0 : i32
    %c0_i32_12 = arith.constant 0 : i32
    %c0_i32_13 = arith.constant 0 : i32
    %19 = tpu.memref_slice %arg10[%9, %c0_i32_11, %c0_i32_12, %c0_i32_13] : memref<2x14x16x128xbf16, #tpu.memory_space<vmem>> -> memref<1x14x16x128xbf16, #tpu.memory_space<vmem>>
    %20 = tpu.memref_squeeze %19 : memref<1x14x16x128xbf16, #tpu.memory_space<vmem>> -> memref<14x16x128xbf16, #tpu.memory_space<vmem>>
    %21 = tpu.memref_slice %arg11[%9] : memref<2x!tpu.dma_semaphore, #tpu.memory_space<semaphore_mem>> -> memref<1x!tpu.dma_semaphore, #tpu.memory_space<semaphore_mem>>
    %22 = tpu.memref_squeeze %21 : memref<1x!tpu.dma_semaphore, #tpu.memory_space<semaphore_mem>> -> memref<!tpu.dma_semaphore, #tpu.memory_space<semaphore_mem>>
    tpu.wait_dma2 semaphore(%22 : memref<!tpu.dma_semaphore, #tpu.memory_space<semaphore_mem>>) src(%18 : memref<14x16x128xbf16, #tpu.memory_space<any>>) dst(%20 : memref<14x16x128xbf16, #tpu.memory_space<vmem>>)
    %23 = arith.index_cast %9 : i32 to index
    %c0 = arith.constant 0 : index
    %c0_14 = arith.constant 0 : index
    %c0_15 = arith.constant 0 : index
    %24 = vector.load %arg10[%23, %c0, %c0_14, %c0_15] : memref<2x14x16x128xbf16, #tpu.memory_space<vmem>>, vector<1x14x16x128xbf16>
    %25 = vector.shape_cast %24 : vector<1x14x16x128xbf16> to vector<14x16x128xbf16>
    %26 = vector.extract_strided_slice %25 {offsets = [3, 0, 0], sizes = [8, 16, 128], strides = [1, 1, 1]} : vector<14x16x128xbf16> to vector<8x16x128xbf16>
    %27 = vector.shape_cast %26 : vector<8x16x128xbf16> to vector<128x128xbf16>
    %c0_16 = arith.constant 0 : index
    %c0_17 = arith.constant 0 : index
    %28 = vector.load %arg3[%c0_16, %c0_17] : memref<128x128xbf16, #tpu.memory_space<vmem>>, vector<128x128xbf16>
    %cst = arith.constant dense<0.000000e+00> : vector<128x128xf32>
    %29 = tpu.matmul %27, %28, %cst {dimension_numbers = #tpu.dot_dimension_numbers<[1], [0], [0], [1], [0, 0, 1, 1], [], []>} : vector<128x128xbf16>, vector<128x128xbf16>, vector<128x128xf32> -> vector<128x128xf32>
    %c0_18 = arith.constant 0 : index
    %c0_19 = arith.constant 0 : index
    %c0_20 = arith.constant 0 : index
    %30 = vector.load %arg6[%c0_18, %c0_19, %c0_20] : memref<4x1x128xf32, #tpu.memory_space<vmem>>, vector<1x1x128xf32>
    %31 = vector.shape_cast %30 : vector<1x1x128xf32> to vector<1x128xf32>
    %32 = vector.broadcast %31 : vector<1x128xf32> to vector<128x128xf32>
    %33 = arith.addf %29, %32 : vector<128x128xf32>
    %cst_21 = arith.constant 0.000000e+00 : f32
    %34 = vector.broadcast %cst_21 : f32 to vector<128x128xf32>
    %35 = arith.maximumf %33, %34 : vector<128x128xf32>
    %36 = arith.truncf %35 : vector<128x128xf32> to vector<128x128xbf16>
    %c0_22 = arith.constant 0 : index
    %c0_23 = arith.constant 0 : index
    %c0_24 = arith.constant 0 : index
    %37 = vector.load %arg5[%c0_22, %c0_23, %c0_24] : memref<4x128x128xbf16, #tpu.memory_space<vmem>>, vector<1x128x128xbf16>
    %38 = vector.shape_cast %37 : vector<1x128x128xbf16> to vector<128x128xbf16>
    %cst_25 = arith.constant dense<0.000000e+00> : vector<128x128xf32>
    %39 = tpu.matmul %36, %38, %cst_25 {dimension_numbers = #tpu.dot_dimension_numbers<[1], [0], [0], [1], [0, 0, 1, 1], [], []>} : vector<128x128xbf16>, vector<128x128xbf16>, vector<128x128xf32> -> vector<128x128xf32>
    %40 = vector.extract_strided_slice %25 {offsets = [2, 0, 0], sizes = [8, 16, 128], strides = [1, 1, 1]} : vector<14x16x128xbf16> to vector<8x16x128xbf16>
    %cst_26 = arith.constant 0.000000e+00 : bf16
    %41 = vector.broadcast %cst_26 : bf16 to vector<8x1x128xbf16>
    %42 = vector.extract_strided_slice %40 {offsets = [0, 0, 0], sizes = [8, 15, 128], strides = [1, 1, 1]} : vector<8x16x128xbf16> to vector<8x15x128xbf16>
    %43 = tpu.concatenate %41, %42 in 1 : vector<8x1x128xbf16>, vector<8x15x128xbf16> -> vector<8x16x128xbf16>
    %44 = vector.shape_cast %43 : vector<8x16x128xbf16> to vector<128x128xbf16>
    %45 = vector.extract_strided_slice %25 {offsets = [2, 0, 0], sizes = [8, 16, 128], strides = [1, 1, 1]} : vector<14x16x128xbf16> to vector<8x16x128xbf16>
    %46 = vector.shape_cast %45 : vector<8x16x128xbf16> to vector<128x128xbf16>
    %47 = vector.extract_strided_slice %25 {offsets = [2, 0, 0], sizes = [8, 16, 128], strides = [1, 1, 1]} : vector<14x16x128xbf16> to vector<8x16x128xbf16>
    %48 = vector.extract_strided_slice %47 {offsets = [0, 1, 0], sizes = [8, 15, 128], strides = [1, 1, 1]} : vector<8x16x128xbf16> to vector<8x15x128xbf16>
    %cst_27 = arith.constant 0.000000e+00 : bf16
    %49 = vector.broadcast %cst_27 : bf16 to vector<8x1x128xbf16>
    %50 = tpu.concatenate %48, %49 in 1 : vector<8x15x128xbf16>, vector<8x1x128xbf16> -> vector<8x16x128xbf16>
    %51 = vector.shape_cast %50 : vector<8x16x128xbf16> to vector<128x128xbf16>
    %52 = vector.extract_strided_slice %25 {offsets = [3, 0, 0], sizes = [8, 16, 128], strides = [1, 1, 1]} : vector<14x16x128xbf16> to vector<8x16x128xbf16>
    %cst_28 = arith.constant 0.000000e+00 : bf16
    %53 = vector.broadcast %cst_28 : bf16 to vector<8x1x128xbf16>
    %54 = vector.extract_strided_slice %52 {offsets = [0, 0, 0], sizes = [8, 15, 128], strides = [1, 1, 1]} : vector<8x16x128xbf16> to vector<8x15x128xbf16>
    %55 = tpu.concatenate %53, %54 in 1 : vector<8x1x128xbf16>, vector<8x15x128xbf16> -> vector<8x16x128xbf16>
    %56 = vector.shape_cast %55 : vector<8x16x128xbf16> to vector<128x128xbf16>
    %57 = vector.extract_strided_slice %25 {offsets = [3, 0, 0], sizes = [8, 16, 128], strides = [1, 1, 1]} : vector<14x16x128xbf16> to vector<8x16x128xbf16>
    %58 = vector.extract_strided_slice %57 {offsets = [0, 1, 0], sizes = [8, 15, 128], strides = [1, 1, 1]} : vector<8x16x128xbf16> to vector<8x15x128xbf16>
    %cst_29 = arith.constant 0.000000e+00 : bf16
    %59 = vector.broadcast %cst_29 : bf16 to vector<8x1x128xbf16>
    %60 = tpu.concatenate %58, %59 in 1 : vector<8x15x128xbf16>, vector<8x1x128xbf16> -> vector<8x16x128xbf16>
    %61 = vector.shape_cast %60 : vector<8x16x128xbf16> to vector<128x128xbf16>
    %62 = vector.extract_strided_slice %25 {offsets = [4, 0, 0], sizes = [8, 16, 128], strides = [1, 1, 1]} : vector<14x16x128xbf16> to vector<8x16x128xbf16>
    %cst_30 = arith.constant 0.000000e+00 : bf16
    %63 = vector.broadcast %cst_30 : bf16 to vector<8x1x128xbf16>
    %64 = vector.extract_strided_slice %62 {offsets = [0, 0, 0], sizes = [8, 15, 128], strides = [1, 1, 1]} : vector<8x16x128xbf16> to vector<8x15x128xbf16>
    %65 = tpu.concatenate %63, %64 in 1 : vector<8x1x128xbf16>, vector<8x15x128xbf16> -> vector<8x16x128xbf16>
    %66 = vector.shape_cast %65 : vector<8x16x128xbf16> to vector<128x128xbf16>
    %67 = vector.extract_strided_slice %25 {offsets = [4, 0, 0], sizes = [8, 16, 128], strides = [1, 1, 1]} : vector<14x16x128xbf16> to vector<8x16x128xbf16>
    %68 = vector.shape_cast %67 : vector<8x16x128xbf16> to vector<128x128xbf16>
    %69 = vector.extract_strided_slice %25 {offsets = [4, 0, 0], sizes = [8, 16, 128], strides = [1, 1, 1]} : vector<14x16x128xbf16> to vector<8x16x128xbf16>
    %70 = vector.extract_strided_slice %69 {offsets = [0, 1, 0], sizes = [8, 15, 128], strides = [1, 1, 1]} : vector<8x16x128xbf16> to vector<8x15x128xbf16>
    %cst_31 = arith.constant 0.000000e+00 : bf16
    %71 = vector.broadcast %cst_31 : bf16 to vector<8x1x128xbf16>
    %72 = tpu.concatenate %70, %71 in 1 : vector<8x15x128xbf16>, vector<8x1x128xbf16> -> vector<8x16x128xbf16>
    %73 = vector.shape_cast %72 : vector<8x16x128xbf16> to vector<128x128xbf16>
    %74 = tpu.concatenate %44, %46, %51, %56, %27, %61, %66, %68, %73 in 1 : vector<128x128xbf16>, vector<128x128xbf16>, vector<128x128xbf16>, vector<128x128xbf16>, vector<128x128xbf16>, vector<128x128xbf16>, vector<128x128xbf16>, vector<128x128xbf16>, vector<128x128xbf16> -> vector<128x1152xbf16>
    %c0_32 = arith.constant 0 : index
    %c0_33 = arith.constant 0 : index
    %c0_34 = arith.constant 0 : index
    %75 = vector.load %arg4[%c0_32, %c0_33, %c0_34] : memref<3x1152x128xbf16, #tpu.memory_space<vmem>>, vector<1x1152x128xbf16>
    %76 = vector.shape_cast %75 : vector<1x1152x128xbf16> to vector<1152x128xbf16>
    %cst_35 = arith.constant dense<0.000000e+00> : vector<128x128xf32>
    %77 = tpu.matmul %74, %76, %cst_35 {dimension_numbers = #tpu.dot_dimension_numbers<[1], [0], [0], [1], [0, 0, 1, 1], [], []>} : vector<128x1152xbf16>, vector<1152x128xbf16>, vector<128x128xf32> -> vector<128x128xf32>
    %c1 = arith.constant 1 : index
    %c0_36 = arith.constant 0 : index
    %c0_37 = arith.constant 0 : index
    %78 = vector.load %arg6[%c1, %c0_36, %c0_37] : memref<4x1x128xf32, #tpu.memory_space<vmem>>, vector<1x1x128xf32>
    %79 = vector.shape_cast %78 : vector<1x1x128xf32> to vector<1x128xf32>
    %80 = vector.broadcast %79 : vector<1x128xf32> to vector<128x128xf32>
    %81 = arith.addf %77, %80 : vector<128x128xf32>
    %cst_38 = arith.constant 0.000000e+00 : f32
    %82 = vector.broadcast %cst_38 : f32 to vector<128x128xf32>
    %83 = arith.maximumf %81, %82 : vector<128x128xf32>
    %84 = arith.truncf %83 : vector<128x128xf32> to vector<128x128xbf16>
    %c1_39 = arith.constant 1 : index
    %c0_40 = arith.constant 0 : index
    %c0_41 = arith.constant 0 : index
    %85 = vector.load %arg5[%c1_39, %c0_40, %c0_41] : memref<4x128x128xbf16, #tpu.memory_space<vmem>>, vector<1x128x128xbf16>
    %86 = vector.shape_cast %85 : vector<1x128x128xbf16> to vector<128x128xbf16>
    %cst_42 = arith.constant dense<0.000000e+00> : vector<128x128xf32>
    %87 = tpu.matmul %84, %86, %cst_42 {dimension_numbers = #tpu.dot_dimension_numbers<[1], [0], [0], [1], [0, 0, 1, 1], [], []>} : vector<128x128xbf16>, vector<128x128xbf16>, vector<128x128xf32> -> vector<128x128xf32>
    %88 = arith.addf %39, %87 : vector<128x128xf32>
    %89 = vector.extract_strided_slice %25 {offsets = [1, 0, 0], sizes = [8, 16, 128], strides = [1, 1, 1]} : vector<14x16x128xbf16> to vector<8x16x128xbf16>
    %cst_43 = arith.constant 0.000000e+00 : bf16
    %90 = vector.broadcast %cst_43 : bf16 to vector<8x2x128xbf16>
    %91 = vector.extract_strided_slice %89 {offsets = [0, 0, 0], sizes = [8, 14, 128], strides = [1, 1, 1]} : vector<8x16x128xbf16> to vector<8x14x128xbf16>
    %92 = tpu.concatenate %90, %91 in 1 : vector<8x2x128xbf16>, vector<8x14x128xbf16> -> vector<8x16x128xbf16>
    %93 = vector.shape_cast %92 : vector<8x16x128xbf16> to vector<128x128xbf16>
    %94 = vector.extract_strided_slice %25 {offsets = [1, 0, 0], sizes = [8, 16, 128], strides = [1, 1, 1]} : vector<14x16x128xbf16> to vector<8x16x128xbf16>
    %95 = vector.shape_cast %94 : vector<8x16x128xbf16> to vector<128x128xbf16>
    %96 = vector.extract_strided_slice %25 {offsets = [1, 0, 0], sizes = [8, 16, 128], strides = [1, 1, 1]} : vector<14x16x128xbf16> to vector<8x16x128xbf16>
    %97 = vector.extract_strided_slice %96 {offsets = [0, 2, 0], sizes = [8, 14, 128], strides = [1, 1, 1]} : vector<8x16x128xbf16> to vector<8x14x128xbf16>
    %cst_44 = arith.constant 0.000000e+00 : bf16
    %98 = vector.broadcast %cst_44 : bf16 to vector<8x2x128xbf16>
    %99 = tpu.concatenate %97, %98 in 1 : vector<8x14x128xbf16>, vector<8x2x128xbf16> -> vector<8x16x128xbf16>
    %100 = vector.shape_cast %99 : vector<8x16x128xbf16> to vector<128x128xbf16>
    %101 = vector.extract_strided_slice %25 {offsets = [3, 0, 0], sizes = [8, 16, 128], strides = [1, 1, 1]} : vector<14x16x128xbf16> to vector<8x16x128xbf16>
    %cst_45 = arith.constant 0.000000e+00 : bf16
    %102 = vector.broadcast %cst_45 : bf16 to vector<8x2x128xbf16>
    %103 = vector.extract_strided_slice %101 {offsets = [0, 0, 0], sizes = [8, 14, 128], strides = [1, 1, 1]} : vector<8x16x128xbf16> to vector<8x14x128xbf16>
    %104 = tpu.concatenate %102, %103 in 1 : vector<8x2x128xbf16>, vector<8x14x128xbf16> -> vector<8x16x128xbf16>
    %105 = vector.shape_cast %104 : vector<8x16x128xbf16> to vector<128x128xbf16>
    %106 = vector.extract_strided_slice %25 {offsets = [3, 0, 0], sizes = [8, 16, 128], strides = [1, 1, 1]} : vector<14x16x128xbf16> to vector<8x16x128xbf16>
    %107 = vector.extract_strided_slice %106 {offsets = [0, 2, 0], sizes = [8, 14, 128], strides = [1, 1, 1]} : vector<8x16x128xbf16> to vector<8x14x128xbf16>
    %cst_46 = arith.constant 0.000000e+00 : bf16
    %108 = vector.broadcast %cst_46 : bf16 to vector<8x2x128xbf16>
    %109 = tpu.concatenate %107, %108 in 1 : vector<8x14x128xbf16>, vector<8x2x128xbf16> -> vector<8x16x128xbf16>
    %110 = vector.shape_cast %109 : vector<8x16x128xbf16> to vector<128x128xbf16>
    %111 = vector.extract_strided_slice %25 {offsets = [5, 0, 0], sizes = [8, 16, 128], strides = [1, 1, 1]} : vector<14x16x128xbf16> to vector<8x16x128xbf16>
    %cst_47 = arith.constant 0.000000e+00 : bf16
    %112 = vector.broadcast %cst_47 : bf16 to vector<8x2x128xbf16>
    %113 = vector.extract_strided_slice %111 {offsets = [0, 0, 0], sizes = [8, 14, 128], strides = [1, 1, 1]} : vector<8x16x128xbf16> to vector<8x14x128xbf16>
    %114 = tpu.concatenate %112, %113 in 1 : vector<8x2x128xbf16>, vector<8x14x128xbf16> -> vector<8x16x128xbf16>
    %115 = vector.shape_cast %114 : vector<8x16x128xbf16> to vector<128x128xbf16>
    %116 = vector.extract_strided_slice %25 {offsets = [5, 0, 0], sizes = [8, 16, 128], strides = [1, 1, 1]} : vector<14x16x128xbf16> to vector<8x16x128xbf16>
    %117 = vector.shape_cast %116 : vector<8x16x128xbf16> to vector<128x128xbf16>
    %118 = vector.extract_strided_slice %25 {offsets = [5, 0, 0], sizes = [8, 16, 128], strides = [1, 1, 1]} : vector<14x16x128xbf16> to vector<8x16x128xbf16>
    %119 = vector.extract_strided_slice %118 {offsets = [0, 2, 0], sizes = [8, 14, 128], strides = [1, 1, 1]} : vector<8x16x128xbf16> to vector<8x14x128xbf16>
    %cst_48 = arith.constant 0.000000e+00 : bf16
    %120 = vector.broadcast %cst_48 : bf16 to vector<8x2x128xbf16>
    %121 = tpu.concatenate %119, %120 in 1 : vector<8x14x128xbf16>, vector<8x2x128xbf16> -> vector<8x16x128xbf16>
    %122 = vector.shape_cast %121 : vector<8x16x128xbf16> to vector<128x128xbf16>
    %123 = tpu.concatenate %93, %95, %100, %105, %27, %110, %115, %117, %122 in 1 : vector<128x128xbf16>, vector<128x128xbf16>, vector<128x128xbf16>, vector<128x128xbf16>, vector<128x128xbf16>, vector<128x128xbf16>, vector<128x128xbf16>, vector<128x128xbf16>, vector<128x128xbf16> -> vector<128x1152xbf16>
    %c1_49 = arith.constant 1 : index
    %c0_50 = arith.constant 0 : index
    %c0_51 = arith.constant 0 : index
    %124 = vector.load %arg4[%c1_49, %c0_50, %c0_51] : memref<3x1152x128xbf16, #tpu.memory_space<vmem>>, vector<1x1152x128xbf16>
    %125 = vector.shape_cast %124 : vector<1x1152x128xbf16> to vector<1152x128xbf16>
    %cst_52 = arith.constant dense<0.000000e+00> : vector<128x128xf32>
    %126 = tpu.matmul %123, %125, %cst_52 {dimension_numbers = #tpu.dot_dimension_numbers<[1], [0], [0], [1], [0, 0, 1, 1], [], []>} : vector<128x1152xbf16>, vector<1152x128xbf16>, vector<128x128xf32> -> vector<128x128xf32>
    %c2 = arith.constant 2 : index
    %c0_53 = arith.constant 0 : index
    %c0_54 = arith.constant 0 : index
    %127 = vector.load %arg6[%c2, %c0_53, %c0_54] : memref<4x1x128xf32, #tpu.memory_space<vmem>>, vector<1x1x128xf32>
    %128 = vector.shape_cast %127 : vector<1x1x128xf32> to vector<1x128xf32>
    %129 = vector.broadcast %128 : vector<1x128xf32> to vector<128x128xf32>
    %130 = arith.addf %126, %129 : vector<128x128xf32>
    %cst_55 = arith.constant 0.000000e+00 : f32
    %131 = vector.broadcast %cst_55 : f32 to vector<128x128xf32>
    %132 = arith.maximumf %130, %131 : vector<128x128xf32>
    %133 = arith.truncf %132 : vector<128x128xf32> to vector<128x128xbf16>
    %c2_56 = arith.constant 2 : index
    %c0_57 = arith.constant 0 : index
    %c0_58 = arith.constant 0 : index
    %134 = vector.load %arg5[%c2_56, %c0_57, %c0_58] : memref<4x128x128xbf16, #tpu.memory_space<vmem>>, vector<1x128x128xbf16>
    %135 = vector.shape_cast %134 : vector<1x128x128xbf16> to vector<128x128xbf16>
    %cst_59 = arith.constant dense<0.000000e+00> : vector<128x128xf32>
    %136 = tpu.matmul %133, %135, %cst_59 {dimension_numbers = #tpu.dot_dimension_numbers<[1], [0], [0], [1], [0, 0, 1, 1], [], []>} : vector<128x128xbf16>, vector<128x128xbf16>, vector<128x128xf32> -> vector<128x128xf32>
    %137 = arith.addf %88, %136 : vector<128x128xf32>
    %138 = vector.extract_strided_slice %25 {offsets = [0, 0, 0], sizes = [8, 16, 128], strides = [1, 1, 1]} : vector<14x16x128xbf16> to vector<8x16x128xbf16>
    %cst_60 = arith.constant 0.000000e+00 : bf16
    %139 = vector.broadcast %cst_60 : bf16 to vector<8x3x128xbf16>
    %140 = vector.extract_strided_slice %138 {offsets = [0, 0, 0], sizes = [8, 13, 128], strides = [1, 1, 1]} : vector<8x16x128xbf16> to vector<8x13x128xbf16>
    %141 = tpu.concatenate %139, %140 in 1 : vector<8x3x128xbf16>, vector<8x13x128xbf16> -> vector<8x16x128xbf16>
    %142 = vector.shape_cast %141 : vector<8x16x128xbf16> to vector<128x128xbf16>
    %143 = vector.extract_strided_slice %25 {offsets = [0, 0, 0], sizes = [8, 16, 128], strides = [1, 1, 1]} : vector<14x16x128xbf16> to vector<8x16x128xbf16>
    %144 = vector.shape_cast %143 : vector<8x16x128xbf16> to vector<128x128xbf16>
    %145 = vector.extract_strided_slice %25 {offsets = [0, 0, 0], sizes = [8, 16, 128], strides = [1, 1, 1]} : vector<14x16x128xbf16> to vector<8x16x128xbf16>
    %146 = vector.extract_strided_slice %145 {offsets = [0, 3, 0], sizes = [8, 13, 128], strides = [1, 1, 1]} : vector<8x16x128xbf16> to vector<8x13x128xbf16>
    %cst_61 = arith.constant 0.000000e+00 : bf16
    %147 = vector.broadcast %cst_61 : bf16 to vector<8x3x128xbf16>
    %148 = tpu.concatenate %146, %147 in 1 : vector<8x13x128xbf16>, vector<8x3x128xbf16> -> vector<8x16x128xbf16>
    %149 = vector.shape_cast %148 : vector<8x16x128xbf16> to vector<128x128xbf16>
    %150 = vector.extract_strided_slice %25 {offsets = [3, 0, 0], sizes = [8, 16, 128], strides = [1, 1, 1]} : vector<14x16x128xbf16> to vector<8x16x128xbf16>
    %cst_62 = arith.constant 0.000000e+00 : bf16
    %151 = vector.broadcast %cst_62 : bf16 to vector<8x3x128xbf16>
    %152 = vector.extract_strided_slice %150 {offsets = [0, 0, 0], sizes = [8, 13, 128], strides = [1, 1, 1]} : vector<8x16x128xbf16> to vector<8x13x128xbf16>
    %153 = tpu.concatenate %151, %152 in 1 : vector<8x3x128xbf16>, vector<8x13x128xbf16> -> vector<8x16x128xbf16>
    %154 = vector.shape_cast %153 : vector<8x16x128xbf16> to vector<128x128xbf16>
    %155 = vector.extract_strided_slice %25 {offsets = [3, 0, 0], sizes = [8, 16, 128], strides = [1, 1, 1]} : vector<14x16x128xbf16> to vector<8x16x128xbf16>
    %156 = vector.extract_strided_slice %155 {offsets = [0, 3, 0], sizes = [8, 13, 128], strides = [1, 1, 1]} : vector<8x16x128xbf16> to vector<8x13x128xbf16>
    %cst_63 = arith.constant 0.000000e+00 : bf16
    %157 = vector.broadcast %cst_63 : bf16 to vector<8x3x128xbf16>
    %158 = tpu.concatenate %156, %157 in 1 : vector<8x13x128xbf16>, vector<8x3x128xbf16> -> vector<8x16x128xbf16>
    %159 = vector.shape_cast %158 : vector<8x16x128xbf16> to vector<128x128xbf16>
    %160 = vector.extract_strided_slice %25 {offsets = [6, 0, 0], sizes = [8, 16, 128], strides = [1, 1, 1]} : vector<14x16x128xbf16> to vector<8x16x128xbf16>
    %cst_64 = arith.constant 0.000000e+00 : bf16
    %161 = vector.broadcast %cst_64 : bf16 to vector<8x3x128xbf16>
    %162 = vector.extract_strided_slice %160 {offsets = [0, 0, 0], sizes = [8, 13, 128], strides = [1, 1, 1]} : vector<8x16x128xbf16> to vector<8x13x128xbf16>
    %163 = tpu.concatenate %161, %162 in 1 : vector<8x3x128xbf16>, vector<8x13x128xbf16> -> vector<8x16x128xbf16>
    %164 = vector.shape_cast %163 : vector<8x16x128xbf16> to vector<128x128xbf16>
    %165 = vector.extract_strided_slice %25 {offsets = [6, 0, 0], sizes = [8, 16, 128], strides = [1, 1, 1]} : vector<14x16x128xbf16> to vector<8x16x128xbf16>
    %166 = vector.shape_cast %165 : vector<8x16x128xbf16> to vector<128x128xbf16>
    %167 = vector.extract_strided_slice %25 {offsets = [6, 0, 0], sizes = [8, 16, 128], strides = [1, 1, 1]} : vector<14x16x128xbf16> to vector<8x16x128xbf16>
    %168 = vector.extract_strided_slice %167 {offsets = [0, 3, 0], sizes = [8, 13, 128], strides = [1, 1, 1]} : vector<8x16x128xbf16> to vector<8x13x128xbf16>
    %cst_65 = arith.constant 0.000000e+00 : bf16
    %169 = vector.broadcast %cst_65 : bf16 to vector<8x3x128xbf16>
    %170 = tpu.concatenate %168, %169 in 1 : vector<8x13x128xbf16>, vector<8x3x128xbf16> -> vector<8x16x128xbf16>
    %171 = vector.shape_cast %170 : vector<8x16x128xbf16> to vector<128x128xbf16>
    %172 = tpu.concatenate %142, %144, %149, %154, %27, %159, %164, %166, %171 in 1 : vector<128x128xbf16>, vector<128x128xbf16>, vector<128x128xbf16>, vector<128x128xbf16>, vector<128x128xbf16>, vector<128x128xbf16>, vector<128x128xbf16>, vector<128x128xbf16>, vector<128x128xbf16> -> vector<128x1152xbf16>
    %c2_66 = arith.constant 2 : index
    %c0_67 = arith.constant 0 : index
    %c0_68 = arith.constant 0 : index
    %173 = vector.load %arg4[%c2_66, %c0_67, %c0_68] : memref<3x1152x128xbf16, #tpu.memory_space<vmem>>, vector<1x1152x128xbf16>
    %174 = vector.shape_cast %173 : vector<1x1152x128xbf16> to vector<1152x128xbf16>
    %cst_69 = arith.constant dense<0.000000e+00> : vector<128x128xf32>
    %175 = tpu.matmul %172, %174, %cst_69 {dimension_numbers = #tpu.dot_dimension_numbers<[1], [0], [0], [1], [0, 0, 1, 1], [], []>} : vector<128x1152xbf16>, vector<1152x128xbf16>, vector<128x128xf32> -> vector<128x128xf32>
    %c3 = arith.constant 3 : index
    %c0_70 = arith.constant 0 : index
    %c0_71 = arith.constant 0 : index
    %176 = vector.load %arg6[%c3, %c0_70, %c0_71] : memref<4x1x128xf32, #tpu.memory_space<vmem>>, vector<1x1x128xf32>
    %177 = vector.shape_cast %176 : vector<1x1x128xf32> to vector<1x128xf32>
    %178 = vector.broadcast %177 : vector<1x128xf32> to vector<128x128xf32>
    %179 = arith.addf %175, %178 : vector<128x128xf32>
    %cst_72 = arith.constant 0.000000e+00 : f32
    %180 = vector.broadcast %cst_72 : f32 to vector<128x128xf32>
    %181 = arith.maximumf %179, %180 : vector<128x128xf32>
    %182 = arith.truncf %181 : vector<128x128xf32> to vector<128x128xbf16>
    %c3_73 = arith.constant 3 : index
    %c0_74 = arith.constant 0 : index
    %c0_75 = arith.constant 0 : index
    %183 = vector.load %arg5[%c3_73, %c0_74, %c0_75] : memref<4x128x128xbf16, #tpu.memory_space<vmem>>, vector<1x128x128xbf16>
    %184 = vector.shape_cast %183 : vector<1x128x128xbf16> to vector<128x128xbf16>
    %cst_76 = arith.constant dense<0.000000e+00> : vector<128x128xf32>
    %185 = tpu.matmul %182, %184, %cst_76 {dimension_numbers = #tpu.dot_dimension_numbers<[1], [0], [0], [1], [0, 0, 1, 1], [], []>} : vector<128x128xbf16>, vector<128x128xbf16>, vector<128x128xf32> -> vector<128x128xf32>
    %186 = arith.addf %137, %185 : vector<128x128xf32>
    %c0_77 = arith.constant 0 : index
    %c0_78 = arith.constant 0 : index
    %c0_79 = arith.constant 0 : index
    %187 = vector.load %arg7[%c0_77, %c0_78, %c0_79] : memref<1x1x128xf32, #tpu.memory_space<vmem>>, vector<1x1x128xf32>
    %188 = vector.shape_cast %187 : vector<1x1x128xf32> to vector<1x128xf32>
    %189 = vector.broadcast %188 : vector<1x128xf32> to vector<128x128xf32>
    %190 = arith.addf %186, %189 : vector<128x128xf32>
    %c0_80 = arith.constant 0 : index
    %c0_81 = arith.constant 0 : index
    %191 = vector.load %arg8[%c0_80, %c0_81] : memref<1x128xf32, #tpu.memory_space<vmem>>, vector<1x128xf32>
    %192 = vector.broadcast %191 : vector<1x128xf32> to vector<128x128xf32>
    %193 = arith.addf %190, %192 : vector<128x128xf32>
    %cst_82 = arith.constant 0.000000e+00 : f32
    %194 = vector.broadcast %cst_82 : f32 to vector<128x128xf32>
    %195 = arith.maximumf %193, %194 : vector<128x128xf32>
    %c0_83 = arith.constant 0 : index
    %c0_84 = arith.constant 0 : index
    %196 = vector.load %arg9[%c0_83, %c0_84] : memref<128x128xf32, #tpu.memory_space<vmem>>, vector<128x128xf32>
    tpu.vector_store %arg9[%c0_83, %c0_84], %195 {strides = array<i32>} : memref<128x128xf32, #tpu.memory_space<vmem>>, vector<128x128xf32>,
    return
  }
  func.func @transform_1(%arg0: i32, %arg1: i32) -> (i32, i32) {
    %c0_i32 = arith.constant 0 : i32
    %c0_i32_0 = arith.constant 0 : i32
    %c0_i32_1 = arith.constant 0 : i32
    return %c0_i32, %c0_i32_0 : i32, i32
  }
  func.func @transform_2(%arg0: i32, %arg1: i32) -> (i32, i32, i32) {
    %c0_i32 = arith.constant 0 : i32
    %c0_i32_0 = arith.constant 0 : i32
    %c0_i32_1 = arith.constant 0 : i32
    %c0_i32_2 = arith.constant 0 : i32
    return %c0_i32, %c0_i32_0, %c0_i32_1 : i32, i32, i32
  }
  func.func @transform_3(%arg0: i32, %arg1: i32) -> (i32, i32, i32) {
    %c0_i32 = arith.constant 0 : i32
    %c0_i32_0 = arith.constant 0 : i32
    %c0_i32_1 = arith.constant 0 : i32
    %c0_i32_2 = arith.constant 0 : i32
    return %c0_i32, %c0_i32_0, %c0_i32_1 : i32, i32, i32
  }
  func.func @transform_4(%arg0: i32, %arg1: i32) -> (i32, i32, i32) {
    %c0_i32 = arith.constant 0 : i32
    %c0_i32_0 = arith.constant 0 : i32
    %c0_i32_1 = arith.constant 0 : i32
    %c0_i32_2 = arith.constant 0 : i32
    return %c0_i32, %c0_i32_0, %c0_i32_1 : i32, i32, i32
  }
  func.func @transform_5(%arg0: i32, %arg1: i32) -> (i32, i32, i32) {
    %c0_i32 = arith.constant 0 : i32
    %c0_i32_0 = arith.constant 0 : i32
    %c0_i32_1 = arith.constant 0 : i32
    return %arg0, %c0_i32, %c0_i32_0 : i32, i32, i32
  }
  func.func @transform_6(%arg0: i32, %arg1: i32) -> (i32, i32) {
    %c0_i32 = arith.constant 0 : i32
    %c0_i32_0 = arith.constant 0 : i32
    %c0_i32_1 = arith.constant 0 : i32
    return %c0_i32, %c0_i32_0 : i32, i32
  }
  func.func @transform_7(%arg0: i32, %arg1: i32) -> (i32, i32) {
    %c2_i32 = arith.constant 2 : i32
    %0 = arith.muli %arg0, %c2_i32 : i32
    %1 = arith.addi %0, %arg1 : i32
    %c0_i32 = arith.constant 0 : i32
    %c0_i32_0 = arith.constant 0 : i32
    return %1, %c0_i32 : i32, i32
  }
}

</mosaic_0001>

<bundles_post_ra>
// kernel: aspp_forward.1
= control target key start
LH: loop header
LB: loop body
LE: loop exit
PB: predicated region body
PF: predicated region fallthrough
CT: control target
= control target key end

     0   :  { %s7576_s24 = smov 0   ;;  %s7578_s25 = smov 0   ;;  %s9919_s0 = inlined_call_operand.vmem [shape: bf16[2,22,16,128], index: 0, kind: input, shape index: {}]   ;;  %s9920_s1 = inlined_call_operand.vmem [shape: bf16[128,128], index: 1, kind: input, shape index: {}]   ;;  %s9921_s2 = inlined_call_operand.vmem [shape: bf16[3,1152,128], index: 2, kind: input, shape index: {}]   ;;  %s9922_s3 = inlined_call_operand.vmem [shape: bf16[4,128,128], index: 3, kind: input, shape index: {}]   ;;  %s9923_s4 = inlined_call_operand.vmem [shape: f32[4,1,128], index: 4, kind: input, shape index: {}]   ;;  %s9924_s5 = inlined_call_operand.vmem [shape: f32[2,1,128], index: 5, kind: input, shape index: {}]   ;;  %s9925_s6 = inlined_call_operand.vmem [shape: f32[1,128], index: 6, kind: input, shape index: {}]   ;;  %s9926_s7 = inlined_call_operand.vmem [shape: f32[512,128], index: 7, kind: output, shape index: {}]  }
   0x1   :  { %9978 = sst [smem:[#allocation43_spill]] %s9926_s7  ;;  %s7580_s26 = smov 0  }
   0x2   :  { %s7582_s27 = smov 0   ;;  %s7584_s28 = smov 0  }
   0x3 LB: > { %s26_s29 = sadd.s32 1, %s7526_s26  ;;  %s29_s30 = sadd.s32 1, %s7530_s27  ;;  %s7534_s28 = sphi %s7584_s28, %s17_s28   ;;  %s7530_s27 = sphi %s7582_s27, %s10088_s27   ;;  %s7526_s26 = sphi %s7580_s26, %s10087_s26   ;;  %s7522_s25 = sphi %s7578_s25, %s10086_s25   ;;  %s7518_s24 = sphi %s7576_s24, %s10085_s24  }
   0x4   : > { %p27_p0 = scmp.ge.s32.totalorder %s26_s29, 2  ;;  %p5252_p1 = scmp.ge.s32.totalorder %s7534_s28, 1 }
   0x5   : > { %p227_p2 = scmp.lt.s32.totalorder %s7534_s28, 5 }
   0x6   : > { %s10090_s29 = smov (%p27_p0, %s26_s29), 0  ;;  %s10092_s30 = smov (!%p27_p0, %s29_s30), %s7530_s27 }
   0x7   : > { %p228_p3 = pnand %p5252_p1, %p227_p2  ;;  %p31_p4 = scmp.ge.s32.totalorder %s10092_s30, 2 }
   0x9   : > { %s10094_s30 = smov (%p31_p4, %s10092_s30), 0  ;;  %231 = sbr.rel (%p228_p3) target bundleno = 1470 (0x5be), region = 44 }
  0x10   : > { %p257_p5 = scmp.lt.s32.totalorder %s7522_s25, 1  ;;  %s5253_s8 = sshll.u32 %s7522_s25, 1 }
  0x11   : > { %s261_s9 = sadd.s32 %s7518_s24, %s5253_s8  ;;  %s272_s12 = ssub.s32 0, %s7518_s24 }
  0x12   : > { %s7614_s10 = scalar_select %p257_p5, %s7522_s25, 1 }
  0x13   : > { %s5254_s11 = sshll.u32 %s261_s9, 4  ;;  %p271_p7 = scmp.lt.s32.totalorder %s7518_s24, 0 }
  0x14   : > { %p263_p6 = scmp.lt.s32.totalorder %s5254_s11, 63  ;;  %s5256_s16 = smin.u32 %s7518_s24, %s272_s12 }
  0x15   : > { %s274_s17 = sand.u32 1, %s5256_s16   ;;  %s9979_s7 = sld [smem:[#allocation43_spill]] }
  0x16   : > { %s10096_s11 = smov (!%p263_p6, %s5254_s11), 63  ;;  %s275_s19 = ssub.s32 0, %s274_s17 }
  0x17   : > { %s5255_s18 = sshll.u32 %s10096_s11, 3  ;;  %s10098_s19 = smov (!%p271_p7, %s275_s19), %s274_s17 }
  0x18   : > { %p5258_p8 = scmp.lt.s32.totalorder %s10098_s19, 0  ;;  %s281_s23 = sadd.s32 2, %s10098_s19 }
  0x19   : > { %p5259_p9 = scmp.ne.s32.totalorder %s7518_s24, 0 }
  0x1a   : > { %s10100_s23 = smov (!%p5258_p8, %s281_s23), %s10098_s19  ;;  %s5964_s8 = sshll.u32 (!%p5259_p9), %s7518_s24, 4 }
  0x1b   : > { %s7626_s22 = scalar_lea.vmem %s9979_s7, %s5255_s18  ;;  %286 = sbr.rel (%p5259_p9) target bundleno = 42 (0x2a), region = 48 }
  0x1c   : > { %s289_s9 = smul.u32 (!%p5259_p9), 44, %s7522_s25  ;;  %s296_s19 = scalar_lea.sflag (!%p5259_p9), [#allocation3], %s10100_s23 }
  0x1d   : > { %s5965_s11 = smul.u32 (!%p5259_p9), 112, %s10100_s23 }
  0x1e   : > { %s290_s12 = sadd.s32 (!%p5259_p9), %s5964_s8, %s289_s9 }
  0x1f   : > { %s5262_s13 = sshll.u32 (!%p5259_p9), %s290_s12, 2  ;;  %s295_s17 = scalar_lea.vmem (!%p5259_p9), [#allocation2], %s5965_s11 }
  0x20   : > { %s292_s18 = scalar_lea.vmem (!%p5259_p9), %s9919_s0, %s5262_s13 }
  0x21   : > { %v329_v0 = vld [vmem:[%s292_s18] sm:$0xff] (!%p5259_p9)  ;;  %v331_v1 = vld [vmem:[%s292_s18 + $0x8] sm:$0xff] (!%p5259_p9)  ;;  %v333_v2 = vld [vmem:[%s292_s18 + $0x10] sm:$0xff] (!%p5259_p9) }
  0x22   : > { %330 = vst [vmem:[%s295_s17] sm:$0xff] %v329_v0  ;;  %332 = vst [vmem:[%s295_s17 + $0x8] sm:$0xff] %v331_v1  ;;  %v335_v3 = vld [vmem:[%s292_s18 + $0x18] sm:$0xff]  ;;  %v337_v4 = vld [vmem:[%s292_s18 + $0x20] sm:$0xff] }
  0x23   : > { %334 = vst [vmem:[%s295_s17 + $0x10] sm:$0xff] %v333_v2  ;;  %v339_v5 = vld [vmem:[%s292_s18 + $0x28] sm:$0xff]  ;;  %336 = vst [vmem:[%s295_s17 + $0x18] sm:$0xff] %v335_v3  ;;  %v341_v6 = vld [vmem:[%s292_s18 + $0x30] sm:$0xff] }
  0x24   : > { %338 = vst [vmem:[%s295_s17 + $0x20] sm:$0xff] %v337_v4  ;;  %340 = vst [vmem:[%s295_s17 + $0x28] sm:$0xff] %v339_v5  ;;  %v343_v7 = vld [vmem:[%s292_s18 + $0x38] sm:$0xff]  ;;  %v345_v8 = vld [vmem:[%s292_s18 + $0x40] sm:$0xff] }
  0x25   : > { %342 = vst [vmem:[%s295_s17 + $0x30] sm:$0xff] %v341_v6  ;;  %344 = vst [vmem:[%s295_s17 + $0x38] sm:$0xff] %v343_v7  ;;  %v347_v9 = vld [vmem:[%s292_s18 + $0x48] sm:$0xff]  ;;  %v349_v10 = vld [vmem:[%s292_s18 + $0x50] sm:$0xff] }
  0x26   : > { %346 = vst [vmem:[%s295_s17 + $0x40] sm:$0xff] %v345_v8  ;;  %v351_v11 = vld [vmem:[%s292_s18 + $0x58] sm:$0xff]  ;;  %348 = vst [vmem:[%s295_s17 + $0x48] sm:$0xff] %v347_v9  ;;  %v353_v12 = vld [vmem:[%s292_s18 + $0x60] sm:$0xff] }
  0x27   : > { %350 = vst [vmem:[%s295_s17 + $0x50] sm:$0xff] %v349_v10  ;;  %352 = vst [vmem:[%s295_s17 + $0x58] sm:$0xff] %v351_v11  ;;  %v355_v13 = vld [vmem:[%s292_s18 + $0x68] sm:$0xff] }
  0x28   : > { %354 = vst [vmem:[%s295_s17 + $0x60] sm:$0xff] %v353_v12  ;;  %356 = vst [vmem:[%s295_s17 + $0x68] sm:$0xff] %v355_v13 }
  0x29   : > { %364 = vsyncadd %s296_s19, 1792 }
  0x2a PF: > { %s365_s20 = sadd.s32 1, %s7518_s24 }
  0x2b   : > { %p5264_p10 = scmp.ge.s32.totalorder %s365_s20, 2 }
  0x2c   : > { %p370_p11 = scmp.lt.s32.totalorder (!%p5264_p10), %s365_s20, 0  ;;  %s371_s21 = ssub.s32 (!%p5264_p10), 0, %s365_s20 }
  0x2d   : > { %369 = sbr.rel (%p5264_p10) target bundleno = 67 (0x43), region = 86  ;;  %s5265_s8 = smin.u32 (!%p5264_p10), %s371_s21, %s365_s20 }
  0x2e   : > { %s5268_s9 = sshll.u32 (!%p5264_p10), %s7518_s24, 4  ;;  %s373_s11 = sand.u32 (!%p5264_p10), 1, %s5265_s8  }
  0x2f   : > { %s5183_s12 = smul.u32 (!%p5264_p10), 44, %s7522_s25  ;;  %s374_s13 = ssub.s32 (!%p5264_p10), 0, %s373_s11 }
  0x31   : > { %s5184_s14 = sadd.s32 (!%p5264_p10), %s5268_s9, %s5183_s12 }
  0x32   : > { %s5269_s18 = sshll.u32 (!%p5264_p10), %s5184_s14, 2 }
  0x33   : > { %s5186_s15 = scalar_lea.vmem (!%p5264_p10), %s9919_s0, %s5269_s18 }
  0x34   : > { %s10102_s13 = smov (!%p370_p11, %s374_s13), %s373_s11  ;;  %v5271_v14 = vld [vmem:[%s5186_s15 + $0x40] sm:$0xff]  ;;  %v5272_v15 = vld [vmem:[%s5186_s15 + $0x48] sm:$0xff]  ;;  %v5273_v16 = vld [vmem:[%s5186_s15 + $0x50] sm:$0xff] }
  0x35   : > { %p5267_p12 = scmp.lt.s32.totalorder %s10102_s13, 0  ;;  %s380_s16 = sadd.s32 2, %s10102_s13  ;;  %v5274_v17 = vld [vmem:[%s5186_s15 + $0x58] sm:$0xff]  ;;  %v5275_v18 = vld [vmem:[%s5186_s15 + $0x60] sm:$0xff]  ;;  %v5276_v19 = vld [vmem:[%s5186_s15 + $0x68] sm:$0xff] }
  0x36   : > { %v5277_v20 = vld [vmem:[%s5186_s15 + $0x70] sm:$0xff]  ;;  %v5278_v21 = vld [vmem:[%s5186_s15 + $0x78] sm:$0xff]  ;;  %v5279_v22 = vld [vmem:[%s5186_s15 + $0x80] sm:$0xff] }
  0x37   : > { %s10104_s16 = smov (!%p5267_p12, %s380_s16), %s10102_s13  ;;  %v5280_v23 = vld [vmem:[%s5186_s15 + $0x88] sm:$0xff]  ;;  %v5281_v24 = vld [vmem:[%s5186_s15 + $0x90] sm:$0xff]  ;;  %v5282_v25 = vld [vmem:[%s5186_s15 + $0x98] sm:$0xff] }
  0x38   : > { %s5966_s7 = smul.u32 112, %s10104_s16  ;;  %v5283_v26 = vld [vmem:[%s5186_s15 + $0xa0] sm:$0xff]  ;;  %v5284_v27 = vld [vmem:[%s5186_s15 + $0xa8] sm:$0xff] }
  0x3a   : > { %s390_s24 = scalar_lea.vmem [#allocation2], %s5966_s7  ;;  %s391_s7 = scalar_lea.sflag [#allocation3], %s10104_s16 }
  0x3b   : > { %425 = vst [vmem:[%s390_s24] sm:$0xff] %v5271_v14  ;;  %427 = vst [vmem:[%s390_s24 + $0x8] sm:$0xff] %v5272_v15 }
  0x3c   : > { %429 = vst [vmem:[%s390_s24 + $0x10] sm:$0xff] %v5273_v16  ;;  %431 = vst [vmem:[%s390_s24 + $0x18] sm:$0xff] %v5274_v17 }
  0x3d   : > { %433 = vst [vmem:[%s390_s24 + $0x20] sm:$0xff] %v5275_v18  ;;  %435 = vst [vmem:[%s390_s24 + $0x28] sm:$0xff] %v5276_v19 }
  0x3e   : > { %437 = vst [vmem:[%s390_s24 + $0x30] sm:$0xff] %v5277_v20  ;;  %439 = vst [vmem:[%s390_s24 + $0x38] sm:$0xff] %v5278_v21 }
  0x3f   : > { %441 = vst [vmem:[%s390_s24 + $0x40] sm:$0xff] %v5279_v22  ;;  %443 = vst [vmem:[%s390_s24 + $0x48] sm:$0xff] %v5280_v23 }
  0x40   : > { %445 = vst [vmem:[%s390_s24 + $0x50] sm:$0xff] %v5281_v24  ;;  %447 = vst [vmem:[%s390_s24 + $0x58] sm:$0xff] %v5282_v25 }
  0x41   : > { %449 = vst [vmem:[%s390_s24 + $0x60] sm:$0xff] %v5283_v26  ;;  %451 = vst [vmem:[%s390_s24 + $0x68] sm:$0xff] %v5284_v27 }
  0x42   : > { %459 = vsyncadd %s391_s7, 1792 }
  0x43 PF: > { %s5967_s25 = smul.u32 112, %s10100_s23  ;;  %s463_s21 = scalar_lea.sflag [#allocation3], %s10100_s23 }
  0x45   : > { %s7649_s20 = scalar_lea.vmem [#allocation2], %s5967_s25 }
  0x46   : > { %7514 = dma.done.wait %s463_s21, 1792 }
  0x47   : > { %7515 = vsyncadd %s463_s21, 4294965504  ;;  %v7208_v28 = vld [vmem:[%s9920_s1] sm:$0xff]   ;;  %v7209_v29 = vld [vmem:[%s9920_s1 + $0x8] sm:$0xff]   ;;  %vm755_vm0 = vcmask 1040384   ;;  %vm756_vm1 = vsmask.f32 256  ;;  %s10084_s16 = scalar_lea.vmem %s9924_s5, %s7614_s10 }
  0x48   : > { %6864 = vmatprep.subr.bf16.mxu1 %v7208_v28  ;;  %v7210_v30 = vld [vmem:[%s9920_s1 + $0x10] sm:$0xff]   ;;  %v7211_v31 = vld [vmem:[%s9920_s1 + $0x18] sm:$0xff]   ;;  %vm7669_vm2 = vmand %vm755_vm0, %vm756_vm1  ;;  %vm790_vm3 = vcmask 1047552   ;;  %vm791_vm4 = vsmask.f32 7424  ;;  %vm2277_vm7 = vcmask 1046528  }
  0x49   : > { %6865 = vmatpush3.bf16.msra.mxu1 %v7208_v28  ;;  %v7665_v32 = vld [vmem:[%s7649_s20 + $0x18] sm:$0xff]  ;;  %v7212_v35 = vld [vmem:[%s9920_s1 + $0x20] sm:$0xff]   ;;  %v7214_v45 = vld [vmem:[%s9920_s1 + $0x30] sm:$0xff]   ;;  %vm3652_vm8 = vcmask 1041408   ;;  %vm3653_vm9 = vsmask.f32 1280 }
  0x4a   : > { %6866 = vmatprep.subr.bf16.mxu1 %v7209_v29  ;;  %6880 = vmatprep.mubr.bf16.mxu1 %v7665_v32  ;;  %v7674_v34 = vshrl.u32 %v7665_v32, 16  ;;  %v7680_v36 = vshll.u32 %v7665_v32, 16  ;;  %v7218_v37 = vld [vmem:[%s9921_s2 + $0xc0] sm:$0xff]   ;;  %v7213_v41 = vld [vmem:[%s9920_s1 + $0x28] sm:$0xff]   ;;  %v7226_v46 = vld [vmem:[%s9921_s2 + $0xd0] sm:$0xff]  }
  0x4b   : > { %v7219_v39 = vld [vmem:[%s9921_s2 + $0x80] sm:$0xff]   ;;  %6048 = vmatprep.subr.bf16.mxu0 %v7218_v37  ;;  %v7222_v42 = vld [vmem:[%s9921_s2 + $0xc8] sm:$0xff]   ;;  %v7227_v47 = vld [vmem:[%s9921_s2 + $0x90] sm:$0xff]   ;;  %vm3696_vm11 = vsmask.f32 6400 }
  0x4c   : > { %9982 = vst [vmem:[#allocation7_spill] sm:$0xff] %v7674_v34  ;;  %9983 = vst [vmem:[#allocation8_spill] sm:$0xff] %v7680_v36  ;;  %v701_v38 = vrot.slane %v7674_v34, 7  ;;  %6049 = vmatpush3.bf16.msra.mxu0 %v7219_v39  ;;  %v7223_v44 = vld [vmem:[%s9921_s2 + $0x88] sm:$0xff]   ;;  %v7215_v48 = vld [vmem:[%s9920_s1 + $0x38] sm:$0xff]   ;;  %v768_v6 = vrot.slane %v7680_v36, 1 }
  0x4d   : > { %6867 = vmatpush3.bf16.msra.mxu1 %v7209_v29  ;;  %6050 = vmatprep.subr.bf16.mxu0 %v7222_v42  ;;  %v7230_v49 = vld [vmem:[%s9921_s2 + $0xd8] sm:$0xff]   ;;  %v7216_v51 = vld [vmem:[%s9921_s2 + $0x40] sm:$0xff]   ;;  %v7220_v56 = vld [vmem:[%s9921_s2 + $0x48] sm:$0xff]  }
  0x4e   : > { %6868 = vmatprep.subr.bf16.mxu1 %v7210_v30  ;;  %v704_v40 = vor.u32 %v7680_v36, %v701_v38  ;;  %v7231_v50 = vld [vmem:[%s9921_s2 + $0x98] sm:$0xff]   ;;  %v7234_v52 = vld [vmem:[%s9921_s2 + $0xe0] sm:$0xff]   ;;  %v7238_v58 = vld [vmem:[%s9921_s2 + $0xe8] sm:$0xff]   ;;  %v769_v17 = vor.u32 %v768_v6, %v7674_v34 }
  0x4f   : > { %v7729_v53 = vld [vmem:[%s7649_s20 + $0x20] sm:$0xff]  ;;  %v7741_v57 = vld [vmem:[%s7649_s20 + $0x28] sm:$0xff]  ;;  %v7761_v63 = vld [vmem:[%s7649_s20 + $0x30] sm:$0xff] }
  0x50   : > { %v7698_v43 = vsel %vm7669_vm2, 0, %v704_v40  ;;  %6051 = vmatpush3.bf16.msra.mxu0 %v7223_v44  ;;  %v7217_v54 = vld [vmem:[%s9921_s2] sm:$0xff]   ;;  %v7239_v59 = vld [vmem:[%s9921_s2 + $0xa8] sm:$0xff]   ;;  %v7751_v60 = vshrl.u32 %v7729_v53, 16  ;;  %v7224_v62 = vld [vmem:[%s9921_s2 + $0x50] sm:$0xff]   ;;  %v7770_v2 = vshll.u32 %v7729_v53, 16 }
  0x51   : > { %6869 = vmatpush3.bf16.msra.mxu1 %v7210_v30  ;;  %1540 = vmatprep.mubr.bf16.mxu0 %v7698_v43  ;;  %v7235_v55 = vld [vmem:[%s9921_s2 + $0xa0] sm:$0xff]   ;;  %v7221_v61 = vld [vmem:[%s9921_s2 + $0x8] sm:$0xff]   ;;  %v7225_v0 = vld [vmem:[%s9921_s2 + $0x10] sm:$0xff]   ;;  %v7784_v8 = vshrl.u32 %v7741_v57, 16  ;;  %v7795_v12 = vshll.u32 %v7741_v57, 16  ;;  %v7850_v37 = vshrl.u32 %v7761_v63, 16 }
  0x52   : > { %6870 = vmatprep.subr.bf16.mxu1 %v7211_v31  ;;  %6052 = vmatprep.subr.bf16.mxu0 %v7226_v46  ;;  %9984 = vst [vmem:[#allocation9_spill] sm:$0xff] %v7751_v60  ;;  %v7242_v1 = vld [vmem:[%s9921_s2 + $0xf0] sm:$0xff]   ;;  %9985 = vst [vmem:[#allocation10_spill] sm:$0xff] %v7770_v2  ;;  %v708_v4 = vrot.slane %v7751_v60, 7  ;;  %v7228_v5 = vld [vmem:[%s9921_s2 + $0x58] sm:$0xff]   ;;  %v770_v38 = vrot.slane %v7770_v2, 1 }
  0x53   : > { %v7243_v3 = vld [vmem:[%s9921_s2 + $0xb0] sm:$0xff]   ;;  %v7781_v7 = vld [vmem:[%s7649_s20 + $0x38] sm:$0xff]  ;;  %9986 = vst [vmem:[#allocation11_spill] sm:$0xff] %v7784_v8  ;;  %9987 = vst [vmem:[#allocation12_spill] sm:$0xff] %v7795_v12  ;;  %v715_v18 = vrot.slane %v7784_v8, 7  ;;  %v7859_v40 = vshll.u32 %v7761_v63, 16 }
  0x54   : > { %6053 = vmatpush3.bf16.msra.mxu0 %v7227_v47  ;;  %v7246_v9 = vld [vmem:[%s9921_s2 + $0xf8] sm:$0xff]   ;;  %v471_v10 = vld [vmem:[%s7649_s20 + $0x10] sm:$0xff]  ;;  %v711_v15 = vor.u32 %v7770_v2, %v708_v4  ;;  %v7810_v19 = vld [vmem:[%s7649_s20 + $0x40] sm:$0xff]  ;;  %9992 = vst [vmem:[#allocation15_spill] sm:$0xff] %v7850_v37  ;;  %v722_v46 = vrot.slane %v7850_v37, 7 }
  0x55   : > { %6871 = vmatpush3.bf16.msra.mxu1 %v7211_v31  ;;  %6054 = vmatprep.subr.bf16.mxu0 %v7230_v49  ;;  %v7247_v11 = vld [vmem:[%s9921_s2 + $0xb8] sm:$0xff]   ;;  %v7801_v14 = vshll.u32 %v471_v10, 16  ;;  %v7232_v16 = vld [vmem:[%s9921_s2 + $0x60] sm:$0xff]   ;;  %v7812_v20 = vshrl.u32 %v471_v10, 16  ;;  %vm7817_vm5 = vmand %vm790_vm3, %vm791_vm4  ;;  %v718_v31 = vor.u32 %v7795_v12, %v715_v18  ;;  %9993 = vst [vmem:[#allocation16_spill] sm:$0xff] %v7859_v40 }
  0x56   : > { %6872 = vmatprep.subr.bf16.mxu1 %v7212_v35  ;;  %v7229_v13 = vld [vmem:[%s9921_s2 + $0x18] sm:$0xff]   ;;  %v7233_v23 = vld [vmem:[%s9921_s2 + $0x20] sm:$0xff]   ;;  %v7236_v24 = vld [vmem:[%s9921_s2 + $0x68] sm:$0xff]   ;;  %v7830_v26 = vsel %vm7669_vm2, 0, %v711_v15  ;;  %v7837_v28 = vsel %vm7817_vm5, %v769_v17, 0  ;;  %v7941_v17 = vshrl.u32 %v7810_v19, 16 }
  0x57   : > { %9988 = vst [vmem:[#allocation13_spill] sm:$0xff] %v7801_v14  ;;  %9989 = vst [vmem:[#allocation14_spill] sm:$0xff] %v7812_v20  ;;  %v766_v21 = vrot.slane %v7801_v14, 1  ;;  %v7833_v27 = vld [vmem:[%s7649_s20 + $0x48] sm:$0xff]  ;;  %v7256_v39 = vld [vmem:[%s9921_s2 + $0x1c0] sm:$0xff]   ;;  %v7869_v44 = vsel %vm7669_vm2, 0, %v718_v31 }
  0x58   : > { %6055 = vmatpush3.bf16.msra.mxu0 %v7231_v50  ;;  %v7237_v29 = vld [vmem:[%s9921_s2 + $0x28] sm:$0xff]   ;;  %v7865_v42 = vld [vmem:[%s7649_s20 + $0x50] sm:$0xff]  ;;  %v694_v47 = vrot.slane %v7812_v20, 7  ;;  %v7244_v49 = vld [vmem:[%s9921_s2 + $0x78] sm:$0xff]   ;;  %v772_v50 = vrot.slane %v7795_v12, 1  ;;  %9996 = vst [vmem:[#allocation19_spill] sm:$0xff] %v7941_v17 }
  0x59   : > { %6873 = vmatpush3.bf16.msra.mxu1 %v7212_v35  ;;  %6056 = vmatprep.subr.bf16.mxu0 %v7234_v52  ;;  %v767_v25 = vor.u32 %v766_v21, %v7812_v20  ;;  %v7240_v35 = vld [vmem:[%s9921_s2 + $0x70] sm:$0xff]   ;;  %v7261_v52 = vld [vmem:[%s9921_s2 + $0x188] sm:$0xff]   ;;  %v7249_v6 = vld [vmem:[%s9921_s2 + $0x100] sm:$0xff]   ;;  %v7948_v21 = vshrl.u32 %v7833_v27, 16 }
  0x5a   : > { %6874 = vmatprep.subr.bf16.mxu1 %v7213_v41  ;;  %v7267_v18 = vld [vmem:[%s9921_s2 + $0x198] sm:$0xff]   ;;  %v7290_v22 = vld [vmem:[%s9922_s3 + $0x50] sm:$0xff]   ;;  %vm8330_vm6 = vmneg %vm755_vm0 }
  0x5b   : > { %v793_v30 = vsel %vm7817_vm5, %v767_v25, 0  ;;  %9997 = vst [vmem:[#allocation20_spill] sm:$0xff] %v7948_v21  ;;  %v774_v25 = vrot.slane %v7859_v40, 1  ;;  %v8169_v33 = vld [vmem:[%s7649_s20 + $0x38] sm:$0xff]  ;;  %vm9028_vm10 = vmand %vm3652_vm8, %vm3653_vm9 }
  0x5c   : > { %6057 = vmatpush3.bf16.msra.mxu0 %v7235_v55  ;;  %v771_v55 = vor.u32 %v770_v38, %v7751_v60  ;;  %v743_v38 = vrot.slane %v7948_v21, 7  ;;  %vm9214_vm12 = vmand %vm2277_vm7, %vm3696_vm11 }
  0x5d   : > { %6875 = vmatpush3.bf16.msra.mxu1 %v7213_v41  ;;  %6058 = vmatprep.subr.bf16.mxu0 %v7238_v58  ;;  %v7257_v41 = vld [vmem:[%s9921_s2 + $0x180] sm:$0xff]   ;;  %v7264_v58 = vld [vmem:[%s9921_s2 + $0x1d0] sm:$0xff]  }
  0x5e   : > { %6876 = vmatprep.subr.bf16.mxu1 %v7214_v45  ;;  %v7914_v4 = vsel %vm7817_vm5, %v771_v55, 0 }
  0x60   : > { %6059 = vmatpush3.bf16.msra.mxu0 %v7239_v59  ;;  %v7248_v59 = vld [vmem:[%s9921_s2 + $0x140] sm:$0xff]  }
  0x61   : > { %6877 = vmatpush3.bf16.msra.mxu1 %v7214_v45  ;;  %6060 = vmatprep.subr.bf16.mxu0 %v7242_v1  ;;  %v7241_v45 = vld [vmem:[%s9921_s2 + $0x30] sm:$0xff]  }
  0x62   : > { %6878 = vmatprep.subr.bf16.mxu1 %v7215_v48 }
  0x64   : > { %6061 = vmatpush3.bf16.msra.mxu0 %v7243_v3  ;;  %v7265_v3 = vld [vmem:[%s9921_s2 + $0x190] sm:$0xff]  }
  0x65   : > { %6879 = vmatpush3.bf16.msra.mxu1 %v7215_v48  ;;  %6062 = vmatprep.subr.bf16.mxu0 %v7246_v9  ;;  %v7260_v48 = vld [vmem:[%s9921_s2 + $0x1c8] sm:$0xff]  }
  0x66   : > { %5984 = vmatprep.subr.bf16.mxu1 %v7216_v51  ;;  %v7884_v51 = vshrl.u32 %v7781_v7, 16  ;;  %v7250_v9 = vld [vmem:[%s9921_s2 + $0x148] sm:$0xff]  }
  0x68   : > { %6881 = vmatmul.mubr.bf16.vlgmr.msra.gmra.mrb[0].mxu1 %v7729_v53  ;;  %6063 = vmatpush3.bf16.msra.mxu0 %v7247_v11  ;;  %9994 = vst [vmem:[#allocation17_spill] sm:$0xff] %v7884_v51  ;;  %v729_v1 = vrot.slane %v7884_v51, 7  ;;  %v7251_v11 = vld [vmem:[%s9921_s2 + $0x108] sm:$0xff]  }
  0x69   : > { %5985 = vmatpush3.bf16.msra.mxu1 %v7217_v54  ;;  %6884 = vmatprep.mubr.bf16.mxu1 %v7741_v57  ;;  %v7245_v54 = vld [vmem:[%s9921_s2 + $0x38] sm:$0xff]  }
  0x6a   : > { %5986 = vmatprep.subr.bf16.mxu1 %v7220_v56  ;;  %6176 = vmatprep.subr.bf16.mxu0 %v7256_v39  ;;  %v697_v56 = vor.u32 %v7801_v14, %v694_v47  ;;  %v7254_v39 = vld [vmem:[%s9921_s2 + $0x158] sm:$0xff]   ;;  %v775_v47 = vor.u32 %v774_v25, %v7850_v37  ;;  %v7277_v25 = vld [vmem:[%s9921_s2 + $0x1b0] sm:$0xff]  }
  0x6b   : > { %1541 = vmatmul.mubr.bf16.vlgmr.msra.gmra.mrb[0].mxu0 %v793_v30  ;;  %v736_v30 = vrot.slane %v7941_v17, 7 }
  0x6c   : > { %1548 = vmatprep.mubr.bf16.mxu0 %v7830_v26  ;;  %6177 = vmatpush3.bf16.msra.mxu0 %v7257_v41  ;;  %v7975_v41 = vshrl.u32 %v7865_v42, 16 }
  0x6d   : > { %5987 = vmatpush3.bf16.msra.mxu1 %v7221_v61  ;;  %6178 = vmatprep.subr.bf16.mxu0 %v7260_v48  ;;  %v725_v61 = vor.u32 %v7859_v40, %v722_v46  ;;  %v7271_v46 = vld [vmem:[%s9921_s2 + $0x1a0] sm:$0xff]  }
  0x6e   : > { %5988 = vmatprep.subr.bf16.mxu1 %v7224_v62  ;;  %v7905_v62 = vshll.u32 %v7781_v7, 16  ;;  %9999 = vst [vmem:[#allocation22_spill] sm:$0xff] %v7975_v41 }
  0x70   : > { %6885 = vmatmul.mubr.bf16.gmra.mrb[4].mxu1 %v7761_v63  ;;  %9995 = vst [vmem:[#allocation18_spill] sm:$0xff] %v7905_v62  ;;  %6179 = vmatpush3.bf16.msra.mxu0 %v7261_v52  ;;  %v732_v15 = vor.u32 %v7905_v62, %v729_v1  ;;  %v776_v31 = vrot.slane %v7905_v62, 1 }
  0x71   : > { %5989 = vmatpush3.bf16.msra.mxu1 %v7225_v0  ;;  %6888 = vmatprep.mubr.bf16.mxu1 %v7781_v7  ;;  %v773_v0 = vor.u32 %v772_v50, %v7784_v8  ;;  %v7255_v50 = vld [vmem:[%s9921_s2 + $0x118] sm:$0xff]  }
  0x72   : > { %5990 = vmatprep.subr.bf16.mxu1 %v7228_v5  ;;  %6180 = vmatprep.subr.bf16.mxu0 %v7264_v58  ;;  %v758_v5 = vsel %vm7669_vm2, 0, %v697_v56  ;;  %v777_v55 = vor.u32 %v776_v31, %v7884_v51  ;;  %v804_v56 = vrot.slane %v7975_v41, 7 }
  0x73   : > { %1549 = vmatmul.mubr.bf16.gmra.mrb[4].mxu0 %v7837_v28 }
  0x74   : > { %1556 = vmatprep.mubr.bf16.mxu0 %v7869_v44  ;;  %6181 = vmatpush3.bf16.msra.mxu0 %v7265_v3  ;;  %v7259_v3 = vld [vmem:[%s9921_s2 + $0x120] sm:$0xff]  }
  0x75   : > { %5991 = vmatpush3.bf16.msra.mxu1 %v7229_v13  ;;  %v7933_v13 = vsel %vm7817_vm5, %v773_v0, 0 }
  0x76   : > { %5992 = vmatprep.subr.bf16.mxu1 %v7232_v16  ;;  %v7266_v16 = vld [vmem:[%s9921_s2 + $0x1d8] sm:$0xff]  }
  0x77   : > { %6182 = vmatprep.subr.bf16.mxu0 %v7266_v16 }
  0x78   : > { %6889 = vmatmul.mubr.bf16.gmra.mrb[8].mxu1 %v7810_v19  ;;  %6183 = vmatpush3.bf16.msra.mxu0 %v7267_v18  ;;  %v7276_v18 = vld [vmem:[%s9921_s2 + $0x1f0] sm:$0xff]  }
  0x79   : > { %5993 = vmatpush3.bf16.msra.mxu1 %v7233_v23  ;;  %6892 = vmatprep.mubr.bf16.mxu1 %v7833_v27  ;;  %v7270_v23 = vld [vmem:[%s9921_s2 + $0x1e0] sm:$0xff]  }
  0x7a   : > { %5994 = vmatprep.subr.bf16.mxu1 %v7236_v24  ;;  %v7252_v24 = vld [vmem:[%s9921_s2 + $0x150] sm:$0xff]   ;;  %6184 = vmatprep.subr.bf16.mxu0 %v7270_v23 }
  0x7b   : > { %1557 = vmatmul.mubr.bf16.gmra.mrb[8].mxu0 %v7914_v4 }
  0x7c   : > { %6185 = vmatpush3.bf16.msra.mxu0 %v7271_v46 }
  0x7d   : > { %5995 = vmatpush3.bf16.msra.mxu1 %v7237_v29  ;;  %v7960_v29 = vsel %vm7669_vm2, 0, %v732_v15  ;;  %v7263_v15 = vld [vmem:[%s9921_s2 + $0x128] sm:$0xff]  }
  0x7e   : > { %5996 = vmatprep.subr.bf16.mxu1 %v7240_v35  ;;  %v7253_v35 = vld [vmem:[%s9921_s2 + $0x110] sm:$0xff]  }
  0x80   : > { %6893 = vmatmul.mubr.bf16.gmra.mrb[12].mxu1 %v7865_v42 }
  0x81   : > { %5997 = vmatpush3.bf16.msra.mxu1 %v7241_v45  ;;  %1443 = vmatprep.mubr.bf16.mxu1 %v471_v10  ;;  %v7926_v10 = vsel %vm7669_vm2, 0, %v725_v61  ;;  %v7978_v45 = vshll.u32 %v7833_v27, 16  ;;  %v8010_v61 = vsel %vm7817_vm5, %v775_v47, 0  ;;  %v7279_v47 = vld [vmem:[%s9921_s2 + $0x1b8] sm:$0xff]  }
  0x82   : > { %5998 = vmatprep.subr.bf16.mxu1 %v7244_v49  ;;  %1564 = vmatprep.mubr.bf16.mxu0 %v7926_v10  ;;  %v7272_v49 = vld [vmem:[%s9921_s2 + $0x1e8] sm:$0xff]  }
  0x83   : > { %10000 = vst [vmem:[#allocation23_spill] sm:$0xff] %v7978_v45  ;;  %1565 = vmatmul.mubr.bf16.gmra.mrb[12].mxu0 %v7933_v13  ;;  %v746_v58 = vor.u32 %v7978_v45, %v743_v38  ;;  %6186 = vmatprep.subr.bf16.mxu0 %v7272_v49  ;;  %v780_v1 = vrot.slane %v7978_v45, 1  ;;  %v7274_v49 = vld [vmem:[%s9921_s2 + $0x178] sm:$0xff]  }
  0x84   : > { %1572 = vmatprep.mubr.bf16.mxu0 %v7960_v29 }
  0x85   : > { %5999 = vmatpush3.bf16.msra.mxu1 %v7245_v54  ;;  %v7258_v54 = vld [vmem:[%s9921_s2 + $0x160] sm:$0xff]   ;;  %v8034_v16 = vsel %vm7669_vm2, 0, %v746_v58  ;;  %v8145_v58 = vld [vmem:[%s7649_s20 + $0x28] sm:$0xff] }
  0x86   : > { %6112 = vmatprep.subr.bf16.mxu1 %v7248_v59  ;;  %v7273_v59 = vld [vmem:[%s9921_s2 + $0x1a8] sm:$0xff]  }
  0x87   : > { %6187 = vmatpush3.bf16.msra.mxu0 %v7273_v59 }
  0x88   : > { %1444 = vmatmul.mubr.bf16.vlgmr.msra.gmra.mrb[16].mxu1 %v758_v5  ;;  %6188 = vmatprep.subr.bf16.mxu0 %v7276_v18 }
  0x89   : > { %6113 = vmatpush3.bf16.msra.mxu1 %v7249_v6  ;;  %1451 = vmatprep.mubr.bf16.mxu1 %v7665_v32  ;;  %v7963_v32 = vshll.u32 %v7810_v19, 16  ;;  %v7262_v6 = vld [vmem:[%s9921_s2 + $0x168] sm:$0xff]  }
  0x8a   : > { %6114 = vmatprep.subr.bf16.mxu1 %v7250_v9  ;;  %v8026_v9 = vsel %vm7817_vm5, %v777_v55, 0 }
  0x8b   : > { %9998 = vst [vmem:[#allocation21_spill] sm:$0xff] %v7963_v32  ;;  %v778_v48 = vrot.slane %v7963_v32, 1  ;;  %v739_v52 = vor.u32 %v7963_v32, %v736_v30  ;;  %1573 = vmatmul.mubr.bf16.gmra.mrb[16].mxu0 %v8010_v61  ;;  %v7278_v30 = vld [vmem:[%s9921_s2 + $0x1f8] sm:$0xff]  }
  0x8c   : > { %6189 = vmatpush3.bf16.msra.mxu0 %v7277_v25 }
  0x8d   : > { %6115 = vmatpush3.bf16.msra.mxu1 %v7251_v11  ;;  %v779_v0 = vor.u32 %v778_v48, %v7941_v17  ;;  %v8019_v5 = vsel %vm7669_vm2, 0, %v739_v52  ;;  %v8073_v48 = vld [vmem:[%s7649_s20 + $0x58] sm:$0xff]  ;;  %6190 = vmatprep.subr.bf16.mxu0 %v7278_v30 }
  0x8e   : > { %6116 = vmatprep.subr.bf16.mxu1 %v7252_v24  ;;  %v781_v24 = vor.u32 %v780_v1, %v7948_v21  ;;  %1580 = vmatprep.mubr.bf16.mxu0 %v8019_v5  ;;  %v8084_v52 = vshrl.u32 %v8073_v48, 16  ;;  %v7287_v1 = vld [vmem:[%s9921_s2 + $0x238] sm:$0xff]  }
  0x8f   : > { %v8043_v23 = vsel %vm7817_vm5, %v779_v0, 0 }
  0x90   : > { %1452 = vmatmul.mubr.bf16.gmra.mrb[20].mxu1 %v7698_v43  ;;  %v7996_v43 = vshll.u32 %v7865_v42, 16  ;;  %v8067_v46 = vsel %vm7817_vm5, %v781_v24, 0  ;;  %10002 = vst [vmem:[#allocation25_spill] sm:$0xff] %v8084_v52  ;;  %6191 = vmatpush3.bf16.msra.mxu0 %v7279_v47  ;;  %v817_v55 = vrot.slane %v8084_v52, 7  ;;  %v7291_v47 = vld [vmem:[%s9922_s3 + $0x58] sm:$0xff]  }
  0x91   : > { %1459 = vmatprep.mubr.bf16.mxu1 %v7729_v53  ;;  %6117 = vmatpush3.bf16.msra.mxu1 %v7253_v35  ;;  %v7268_v35 = vld [vmem:[%s9921_s2 + $0x170] sm:$0xff]  }
  0x92   : > { %10001 = vst [vmem:[#allocation24_spill] sm:$0xff] %v7996_v43  ;;  %6118 = vmatprep.subr.bf16.mxu1 %v7254_v39  ;;  %v807_v11 = vor.u32 %v7996_v43, %v804_v56  ;;  %v810_v31 = vrot.slane %v7996_v43, 1  ;;  %v7269_v39 = vld [vmem:[%s9921_s2 + $0x130] sm:$0xff]   ;;  %v8105_v56 = vshll.u32 %v8073_v48, 16 }
  0x93   : > { %1581 = vmatmul.mubr.bf16.gmra.mrb[20].mxu0 %v8026_v9 }
  0x94   : > { %v8060_v38 = vsel %vm7669_vm2, 0, %v807_v11  ;;  %1588 = vmatprep.mubr.bf16.mxu0 %v8034_v16  ;;  %10003 = vst [vmem:[#allocation26_spill] sm:$0xff] %v8105_v56 }
  0x95   : > { %6119 = vmatpush3.bf16.msra.mxu1 %v7255_v50  ;;  %v7275_v50 = vld [vmem:[%s9921_s2 + $0x138] sm:$0xff]  }
  0x96   : > { %6120 = vmatprep.subr.bf16.mxu1 %v7258_v54  ;;  %v7280_v54 = vld [vmem:[%s9921_s2 + $0x200] sm:$0xff]  }
  0x98   : > { %1460 = vmatmul.mubr.bf16.gmra.mrb[24].mxu1 %v7830_v26 }
  0x99   : > { %1467 = vmatprep.mubr.bf16.mxu1 %v7741_v57  ;;  %6121 = vmatpush3.bf16.msra.mxu1 %v7259_v3  ;;  %v8162_v3 = vld [vmem:[%s7649_s20 + $0x30] sm:$0xff] }
  0x9a   : > { %6122 = vmatprep.subr.bf16.mxu1 %v7262_v6  ;;  %v823_v6 = vrot.slane %v8105_v56, 1 }
  0x9b   : > { %1589 = vmatmul.mubr.bf16.gmra.mrb[24].mxu0 %v8043_v23 }
  0x9c   : > { %1596 = vmatprep.mubr.bf16.mxu0 %v8060_v38  ;;  %v824_v11 = vor.u32 %v823_v6, %v8084_v52  ;;  %v7295_v6 = vld [vmem:[%s9921_s2 + $0x288] sm:$0xff]  }
  0x9d   : > { %6123 = vmatpush3.bf16.msra.mxu1 %v7263_v15 }
  0x9e   : > { %6124 = vmatprep.subr.bf16.mxu1 %v7268_v35  ;;  %v826_v15 = vsel %vm7817_vm5, %v824_v11, 0 }
  0xa0   : > { %1468 = vmatmul.mubr.bf16.gmra.mrb[28].mxu1 %v7869_v44 }
  0xa1   : > { %1475 = vmatprep.mubr.bf16.mxu1 %v7761_v63  ;;  %6125 = vmatpush3.bf16.msra.mxu1 %v7269_v39 }
  0xa2   : > { %6126 = vmatprep.subr.bf16.mxu1 %v7274_v49 }
  0xa3   : > { %1597 = vmatmul.mubr.bf16.gmra.mrb[28].mxu0 %v8067_v46 }
  0xa4   : > { %1734 = vmatprep.mubr.bf16.mxu0 %v7729_v53  ;;  %v7281_v53 = vld [vmem:[%s9921_s2 + $0x208] sm:$0xff]  }
  0xa5   : > { %6127 = vmatpush3.bf16.msra.mxu1 %v7275_v50 }
  0xa6   : > { %6896 = vmatprep.subr.bf16.mxu1 %v7280_v54 }
  0xa8   : > { %1476 = vmatmul.mubr.bf16.gmra.mrb[32].mxu1 %v7926_v10 }
  0xa9   : > { %1483 = vmatprep.mubr.bf16.mxu1 %v7781_v7 }
  0xab   : > { %1735 = vmatmul.mubr.bf16.vlgmr.msra.gmra.mrb[32].mxu0 %v7830_v26  ;;  %v8115_v26 = vld [vmem:[%s7649_s20 + $0x18] sm:$0xff] }
  0xac   : > { %1742 = vmatprep.mubr.bf16.mxu0 %v7741_v57  ;;  %v7282_v57 = vld [vmem:[%s9921_s2 + $0x210] sm:$0xff]  }
  0xb0   : > { %1484 = vmatmul.mubr.bf16.gmra.mrb[36].mxu1 %v7960_v29 }
  0xb1   : > { %1491 = vmatprep.mubr.bf16.mxu1 %v7810_v19 }
  0xb3   : > { %1743 = vmatmul.mubr.bf16.gmra.mrb[36].mxu0 %v7869_v44  ;;  %v7284_v44 = vld [vmem:[%s9921_s2 + $0x220] sm:$0xff]  }
  0xb4   : > { %1750 = vmatprep.mubr.bf16.mxu0 %v7761_v63  ;;  %v7283_v63 = vld [vmem:[%s9921_s2 + $0x218] sm:$0xff]  }
  0xb8   : > { %1492 = vmatmul.mubr.bf16.gmra.mrb[40].mxu1 %v8019_v5 }
  0xb9   : > { %1499 = vmatprep.mubr.bf16.mxu1 %v7833_v27 }
  0xbb   : > { %1751 = vmatmul.mubr.bf16.gmra.mrb[40].mxu0 %v7926_v10  ;;  %v811_v10 = vor.u32 %v810_v31, %v7975_v41 }
  0xbc   : > { %1758 = vmatprep.mubr.bf16.mxu0 %v7781_v7  ;;  %v7285_v7 = vld [vmem:[%s9921_s2 + $0x228] sm:$0xff]  }
  0xbd   : > { %v813_v59 = vsel %vm7817_vm5, %v811_v10, 0 }
  0xc0   : > { %1500 = vmatmul.mubr.bf16.gmra.mrb[44].mxu1 %v8034_v16 }
  0xc1   : > { %1637 = vmatprep.mubr.bf16.mxu1 %v7837_v28  ;;  %v8128_v28 = vld [vmem:[%s7649_s20 + $0x20] sm:$0xff] }
  0xc3   : > { %1759 = vmatmul.mubr.bf16.gmra.mrb[44].mxu0 %v7960_v29  ;;  %v820_v29 = vor.u32 %v8105_v56, %v817_v55 }
  0xc4   : > { %1766 = vmatprep.mubr.bf16.mxu0 %v7810_v19  ;;  %v7286_v19 = vld [vmem:[%s9921_s2 + $0x230] sm:$0xff]  }
  0xc5   : > { %v822_v0 = vsel %vm7669_vm2, 0, %v820_v29  ;;  %v7294_v29 = vld [vmem:[%s9921_s2 + $0x240] sm:$0xff]  }
  0xc8   : > { %1638 = vmatmul.mubr.bf16.vlgmr.msra.gmra.mrb[48].mxu1 %v8115_v26 }
  0xc9   : > { %6897 = vmatpush3.bf16.msra.mxu1 %v7280_v54  ;;  %1645 = vmatprep.mubr.bf16.mxu1 %v7914_v4 }
  0xca   : > { %6898 = vmatprep.subr.bf16.mxu1 %v7281_v53 }
  0xcb   : > { %1767 = vmatmul.mubr.bf16.gmra.mrb[48].mxu0 %v8019_v5  ;;  %v7471_v5 = vld [vmem:[%s7649_s20 + $0x50] sm:$0xff] }
  0xcc   : > { %1774 = vmatprep.mubr.bf16.mxu0 %v7833_v27  ;;  %v8176_v27 = vld [vmem:[%s7649_s20 + $0x40] sm:$0xff] }
  0xcd   : > { %6899 = vmatpush3.bf16.msra.mxu1 %v7281_v53 }
  0xce   : > { %6900 = vmatprep.subr.bf16.mxu1 %v7282_v57 }
  0xd0   : > { %1646 = vmatmul.mubr.bf16.gmra.mrb[52].mxu1 %v8128_v28 }
  0xd1   : > { %1653 = vmatprep.mubr.bf16.mxu1 %v7933_v13  ;;  %6901 = vmatpush3.bf16.msra.mxu1 %v7282_v57 }
  0xd2   : > { %6902 = vmatprep.subr.bf16.mxu1 %v7283_v63 }
  0xd3   : > { %1775 = vmatmul.mubr.bf16.gmra.mrb[52].mxu0 %v8034_v16 }
  0xd4   : > { %1782 = vmatprep.mubr.bf16.mxu0 %v7865_v42  ;;  %v7470_v42 = vld [vmem:[%s7649_s20 + $0x48] sm:$0xff] }
  0xd5   : > { %6903 = vmatpush3.bf16.msra.mxu1 %v7283_v63 }
  0xd6   : > { %6904 = vmatprep.subr.bf16.mxu1 %v7284_v44 }
  0xd8   : > { %1654 = vmatmul.mubr.bf16.gmra.mrb[56].mxu1 %v8145_v58 }
  0xd9   : > { %1661 = vmatprep.mubr.bf16.mxu1 %v8010_v61  ;;  %6905 = vmatpush3.bf16.msra.mxu1 %v7284_v44 }
  0xda   : > { %6906 = vmatprep.subr.bf16.mxu1 %v7285_v7 }
  0xdb   : > { %1783 = vmatmul.mubr.bf16.gmra.mrb[56].mxu0 %v8060_v38 }
  0xdc   : > { %1790 = vmatprep.mubr.bf16.mxu0 %v8073_v48 }
  0xdd   : > { %6907 = vmatpush3.bf16.msra.mxu1 %v7285_v7  ;;  %v7293_v7 = vld [vmem:[%s9921_s2 + $0x280] sm:$0xff]  }
  0xde   : > { %6908 = vmatprep.subr.bf16.mxu1 %v7286_v19 }
  0xe0   : > { %1662 = vmatmul.mubr.bf16.gmra.mrb[60].mxu1 %v8162_v3 }
  0xe1   : > { %1669 = vmatprep.mubr.bf16.mxu1 %v8026_v9  ;;  %6909 = vmatpush3.bf16.msra.mxu1 %v7286_v19 }
  0xe2   : > { %6910 = vmatprep.subr.bf16.mxu1 %v7287_v1 }
  0xe3   : > { %1791 = vmatmul.mubr.bf16.gmra.mrb[60].mxu0 %v822_v0 }
  0xe5   : > { %6911 = vmatpush3.bf16.msra.mxu1 %v7287_v1 }
  0xe6   : > { %6288 = vmatprep.subr.bf16.mxu1 %v7293_v7 }
  0xe8   : > { %1670 = vmatmul.mubr.bf16.gmra.mrb[64].mxu1 %v8169_v33 }
  0xe9   : > { %1677 = vmatprep.mubr.bf16.mxu1 %v8043_v23 }
  0xf0   : > { %1678 = vmatmul.mubr.bf16.gmra.mrb[68].mxu1 %v8176_v27 }
  0xf1   : > { %1685 = vmatprep.mubr.bf16.mxu1 %v8067_v46 }
  0xf8   : > { %1686 = vmatmul.mubr.bf16.gmra.mrb[72].mxu1 %v7470_v42  ;;  %v7292_v42 = vld [vmem:[%s9922_s3 + $0x60] sm:$0xff]  }
  0xf9   : > { %1693 = vmatprep.mubr.bf16.mxu1 %v813_v59 }
 0x100   : > { %1694 = vmatmul.mubr.bf16.gmra.mrb[76].mxu1 %v7471_v5 }
 0x101   : > { %6912 = vmatprep.mubr.bf16.mxu1 %v7914_v4  ;;  %v7288_v4 = vld [vmem:[%s9922_s3 + $0x40] sm:$0xff]  }
 0x102   : > { %6928 = vmatprep.subr.bf16.mxu0 %v7288_v4 }
 0x103   : > { %6929 = vmatpush3.bf16.msra.mxu0 %v7288_v4 }
 0x108   : > { %6913 = vmatmul.mubr.bf16.vlgmr.msra.gmra.mrb[80].mxu1 %v7933_v13  ;;  %v7289_v13 = vld [vmem:[%s9922_s3 + $0x48] sm:$0xff]  }
 0x109   : > { %6916 = vmatprep.mubr.bf16.mxu1 %v8010_v61  ;;  %6930 = vmatprep.subr.bf16.mxu0 %v7289_v13  ;;  %v8201_v61 = vld [vmem:[%s9923_s4] ss:$0 sm:$0xff] }
 0x10a   : > { %6931 = vmatpush3.bf16.msra.mxu0 %v7289_v13  ;;  %6289 = vmatpush3.bf16.msra.mxu1 %v7294_v29  ;;  %v7296_v13 = vld [vmem:[%s9921_s2 + $0x248] sm:$0xff]  }
 0x10b   : > { %6932 = vmatprep.subr.bf16.mxu0 %v7290_v22  ;;  %6290 = vmatprep.subr.bf16.mxu1 %v7295_v6 }
 0x10e   : > { %6933 = vmatpush3.bf16.msra.mxu0 %v7290_v22  ;;  %6291 = vmatpush3.bf16.msra.mxu1 %v7296_v13 }
 0x10f   : > { %6934 = vmatprep.subr.bf16.mxu0 %v7291_v47 }
 0x110   : > { %6917 = vmatmul.mubr.bf16.gmra.mrb[84].mxu1 %v8026_v9 }
 0x111   : > { %6920 = vmatprep.mubr.bf16.mxu1 %v8043_v23 }
 0x112   : > { %6935 = vmatpush3.bf16.msra.mxu0 %v7291_v47  ;;  %v7299_v47 = vld [vmem:[%s9921_s2 + $0x250] sm:$0xff]  }
 0x113   : > { %6936 = vmatprep.subr.bf16.mxu0 %v7292_v42 }
 0x116   : > { %6937 = vmatpush3.bf16.msra.mxu0 %v7292_v42 }
 0x118   : > { %6921 = vmatmul.mubr.bf16.gmra.mrb[88].mxu1 %v8067_v46 }
 0x119   : > { %6924 = vmatprep.mubr.bf16.mxu1 %v813_v59 }
 0x120   : > { %6925 = vmatmul.mubr.bf16.gmra.mrb[92].mxu1 %v826_v15 }
 0x13b   : > { %v6882_v9 = vpop.f32.mrb[0].mxu1 }
 0x13c   : > { %v597_v16 = vadd.f32 %v6882_v9, %v8201_v61  ;;  %v588_v18 = vpop.f32.mrb[1].mxu1 }
 0x13d   : > { %v589_v23 = vadd.f32 %v8201_v61, %v588_v18  ;;  %v6883_v24 = vpop.f32.mrb[2].mxu1 }
 0x13e   : > { %v600_v25 = vadd.f32 %v6883_v24, %v8201_v61  ;;  %v591_v30 = vpop.f32.mrb[3].mxu1  ;;  %v653_v35 = vmax.f32 %v597_v16, 0.0  ;;  %v6064_v4 = vpop.f32.mrb[0].mxu0 }
 0x13f   : > { %v592_v31 = vadd.f32 %v8201_v61, %v591_v30  ;;  %v651_v39 = vmax.f32 %v589_v23, 0.0  ;;  %v6065_v16 = vpop.f32.mrb[1].mxu0 }
 0x140   : > { %v654_v38 = vmax.f32 %v600_v25, 0.0  ;;  %v8242_v24 = vadd.f32 %v6065_v16, %v6064_v4  ;;  %v6067_v25 = vpop.f32.mrb[2].mxu0  ;;  %v7303_v16 = vld [vmem:[%s9921_s2 + $0x2a0] sm:$0xff]  }
 0x141   : > { %v652_v46 = vmax.f32 %v592_v31, 0.0 }
 0x142   : > { %v8213_v48 = vpack.c.bf16 %v654_v38, %v653_v35  ;;  %v6068_v35 = vpop.f32.mrb[3].mxu0  ;;  %v7298_v38 = vld [vmem:[%s9921_s2 + $0x290] sm:$0xff]  }
 0x143   : > { %v8215_v49 = vpack.c.bf16 %v652_v46, %v651_v39  ;;  %v6886_v50 = vpop.f32.mrb[4].mxu1  ;;  %v8249_v46 = vadd.f32 %v6068_v35, %v6067_v25  ;;  %6292 = vmatprep.subr.bf16.mxu1 %v7298_v38  ;;  %v7304_v25 = vld [vmem:[%s9921_s2 + $0x260] sm:$0xff]  }
 0x144   : > { %v613_v54 = vadd.f32 %v6886_v50, %v8201_v61  ;;  %v604_v55 = vpop.f32.mrb[5].mxu1  ;;  %6293 = vmatpush3.bf16.msra.mxu1 %v7299_v47 }
 0x145   : > { %v605_v53 = vadd.f32 %v8201_v61, %v604_v55  ;;  %v6887_v57 = vpop.f32.mrb[6].mxu1 }
 0x146   : > { %v616_v63 = vadd.f32 %v6887_v57, %v8201_v61  ;;  %v607_v44 = vpop.f32.mrb[7].mxu1  ;;  %v657_v19 = vmax.f32 %v613_v54, 0.0  ;;  %v7297_v57 = vld [vmem:[%s9922_s3 + $0x68] sm:$0xff]   ;;  %v6070_v29 = vpop.f32.mrb[4].mxu0 }
 0x147   : > { %v608_v10 = vadd.f32 %v8201_v61, %v607_v44  ;;  %v655_v0 = vmax.f32 %v605_v53, 0.0  ;;  %v7300_v44 = vld [vmem:[%s9921_s2 + $0x298] sm:$0xff]   ;;  %6938 = vmatprep.subr.bf16.mxu0 %v7297_v57 }
 0x148   : > { %v658_v59 = vmax.f32 %v616_v63, 0.0  ;;  %6939 = vmatpush3.bf16.msra.mxu0 %v7297_v57  ;;  %6294 = vmatprep.subr.bf16.mxu1 %v7300_v44  ;;  %v8297_v57 = vld [vmem:[%s9923_s4 + $0x1] ss:$0 sm:$0xff] }
 0x149   : > { %v656_v1 = vmax.f32 %v608_v10, 0.0 }
 0x14a   : > { %v8230_v5 = vpack.c.bf16 %v658_v59, %v657_v19  ;;  %v7301_v19 = vld [vmem:[%s9921_s2 + $0x258] sm:$0xff]  }
 0x14b   : > { %v8235_v11 = vpack.c.bf16 %v656_v1, %v655_v0  ;;  %v6890_v15 = vpop.f32.mrb[8].mxu1  ;;  %v6071_v1 = vpop.f32.mrb[5].mxu0  ;;  %6295 = vmatpush3.bf16.msra.mxu1 %v7301_v19 }
 0x14c   : > { %v629_v22 = vadd.f32 %v6890_v15, %v8201_v61  ;;  %v620_v9 = vpop.f32.mrb[9].mxu1  ;;  %v8269_v15 = vadd.f32 %v6071_v1, %v6070_v29  ;;  %v6073_v4 = vpop.f32.mrb[6].mxu0  ;;  %6296 = vmatprep.subr.bf16.mxu1 %v7303_v16  ;;  %v7307_v16 = vld [vmem:[%s9922_s3 + $0x78] sm:$0xff]  }
 0x14d   : > { %v621_v18 = vadd.f32 %v8201_v61, %v620_v9  ;;  %v6891_v23 = vpop.f32.mrb[10].mxu1  ;;  %v6074_v9 = vpop.f32.mrb[7].mxu0 }
 0x14e   : > { %v632_v30 = vadd.f32 %v6891_v23, %v8201_v61  ;;  %v623_v31 = vpop.f32.mrb[11].mxu1  ;;  %v661_v50 = vmax.f32 %v629_v22, 0.0  ;;  %v8276_v23 = vadd.f32 %v6074_v9, %v6073_v4  ;;  %v7309_v9 = vld [vmem:[%s9921_s2 + $0x270] sm:$0xff]  }
 0x14f   : > { %v624_v39 = vadd.f32 %v8201_v61, %v623_v31  ;;  %v659_v55 = vmax.f32 %v621_v18, 0.0  ;;  %6297 = vmatpush3.bf16.msra.mxu1 %v7304_v25 }
 0x150   : > { %v662_v54 = vmax.f32 %v632_v30, 0.0 }
 0x151   : > { %v660_v53 = vmax.f32 %v624_v39, 0.0  ;;  %v7302_v39 = vld [vmem:[%s9922_s3 + $0x70] sm:$0xff]  }
 0x152   : > { %v8257_v63 = vpack.c.bf16 %v662_v54, %v661_v50  ;;  %6940 = vmatprep.subr.bf16.mxu0 %v7302_v39 }
 0x153   : > { %v8262_v7 = vpack.c.bf16 %v660_v53, %v659_v55  ;;  %v6894_v10 = vpop.f32.mrb[12].mxu1  ;;  %v6076_v55 = vpop.f32.mrb[8].mxu0  ;;  %v7306_v53 = vld [vmem:[%s9921_s2 + $0x268] sm:$0xff]   ;;  %6941 = vmatpush3.bf16.msra.mxu0 %v7302_v39  ;;  %v7311_v39 = vld [vmem:[%s9921_s2 + $0x278] sm:$0xff]  }
 0x154   : > { %v645_v59 = vadd.f32 %v6894_v10, %v8201_v61  ;;  %v636_v0 = vpop.f32.mrb[13].mxu1  ;;  %v6077_v10 = vpop.f32.mrb[9].mxu0  ;;  %6942 = vmatprep.subr.bf16.mxu0 %v7307_v16 }
 0x155   : > { %v637_v42 = vadd.f32 %v8201_v61, %v636_v0  ;;  %v6895_v6 = vpop.f32.mrb[14].mxu1  ;;  %v6079_v0 = vpop.f32.mrb[10].mxu0 }
 0x156   : > { %v648_v13 = vadd.f32 %v6895_v6, %v8201_v61  ;;  %v639_v22 = vpop.f32.mrb[15].mxu1  ;;  %v665_v30 = vmax.f32 %v645_v59, 0.0  ;;  %v8299_v59 = vadd.f32 %v6077_v10, %v6076_v55  ;;  %v7308_v6 = vld [vmem:[%s9921_s2 + $0x2b0] sm:$0xff]   ;;  %v7378_v55 = vld [vmem:[%s9921_s2 + $0x480] sm:$0xff]  }
 0x157   : > { %v640_v18 = vadd.f32 %v8201_v61, %v639_v22  ;;  %v663_v35 = vmax.f32 %v637_v42, 0.0  ;;  %v7305_v61 = vld [vmem:[%s9921_s2 + $0x2a8] sm:$0xff]   ;;  %v6080_v42 = vpop.f32.mrb[11].mxu0  ;;  %6943 = vmatpush3.bf16.msra.mxu0 %v7307_v16  ;;  %v8348_v16 = vld [vmem:[%s7649_s20 + $0x10] sm:$0xff] }
 0x158   : > { %v666_v31 = vmax.f32 %v648_v13, 0.0  ;;  %6298 = vmatprep.subr.bf16.mxu1 %v7305_v61  ;;  %v6081_v22 = vadd.f32 %v6080_v42, %v6079_v0 }
 0x159   : > { %v664_v38 = vmax.f32 %v640_v18, 0.0  ;;  %6299 = vmatpush3.bf16.msra.mxu1 %v7306_v53 }
 0x15a   : > { %v8284_v47 = vpack.c.bf16 %v666_v31, %v665_v30  ;;  %6300 = vmatprep.subr.bf16.mxu1 %v7308_v6  ;;  %v7310_v30 = vld [vmem:[%s9921_s2 + $0x2b8] sm:$0xff]  }
 0x15b   : > { %v8289_v50 = vpack.c.bf16 %v664_v38, %v663_v35  ;;  %v6000_v54 = vpop.f32.mrb[16].mxu1  ;;  %v6082_v38 = vpop.f32.mrb[12].mxu0 }
 0x15c   : > { %v6001_v44 = vpop.f32.mrb[17].mxu1 }
 0x15d   : > { %v6002_v29 = vadd.f32 %v6001_v44, %v6000_v54  ;;  %v6003_v19 = vpop.f32.mrb[18].mxu1  ;;  %6301 = vmatpush3.bf16.msra.mxu1 %v7309_v9  ;;  %v8327_v54 = vld [vmem:[%s9922_s3] sm:$0xff]  }
 0x15e   : > { %v6004_v1 = vpop.f32.mrb[19].mxu1  ;;  %6302 = vmatprep.subr.bf16.mxu1 %v7310_v30  ;;  %6960 = vmatprep.subr.bf16.mxu0 %v8327_v54 }
 0x15f   : > { %v1446_v4 = vadd.f32 %v6002_v29, %v8297_v57  ;;  %v6005_v13 = vadd.f32 %v6004_v1, %v6003_v19  ;;  %v8335_v29 = vld [vmem:[%s7649_s20 + $0x8] sm:$0xff] }
 0x160   : > { %2955 = vmatprep.mubr.bf16.mxu1 %v8335_v29  ;;  %v2235_v1 = vrot.slane %v8335_v29, 7 }
 0x161   : > { %v1449_v18 = vadd.f32 %v6005_v13, %v8297_v57  ;;  %v8313_v25 = vadd.f32 %v8242_v24, %v1446_v4  ;;  %v6083_v24 = vpop.f32.mrb[13].mxu0  ;;  %6303 = vmatpush3.bf16.msra.mxu1 %v7311_v39 }
 0x162   : > { %v6084_v44 = vadd.f32 %v6083_v24, %v6082_v38  ;;  %v6085_v10 = vpop.f32.mrb[14].mxu0 }
 0x163   : > { %v8319_v31 = vadd.f32 %v8249_v46, %v1449_v18  ;;  %v6006_v35 = vpop.f32.mrb[20].mxu1  ;;  %v6086_v0 = vpop.f32.mrb[15].mxu0 }
 0x164   : > { %v6007_v61 = vpop.f32.mrb[21].mxu1  ;;  %v6087_v4 = vadd.f32 %v6086_v0, %v6085_v10  ;;  %5621 = vmatmul.mubr.msk.bf16.vlgmr.msra.gmra.mrb[96].mxu1 %vm8330_vm6, %v2235_v1 }
 0x165   : > { %v6008_v46 = vadd.f32 %v6007_v61, %v6006_v35  ;;  %v6009_v53 = vpop.f32.mrb[22].mxu1  ;;  %2963 = vmatprep.mubr.bf16.mxu1 %v8348_v16  ;;  %v6088_v35 = vpop.f32.mrb[16].mxu0 }
 0x166   : > { %v6010_v19 = vpop.f32.mrb[23].mxu1  ;;  %v6089_v39 = vpop.f32.mrb[17].mxu0 }
 0x167   : > { %v1454_v42 = vadd.f32 %v6008_v46, %v8297_v57  ;;  %v6011_v6 = vadd.f32 %v6010_v19, %v6009_v53  ;;  %v6090_v46 = vadd.f32 %v6089_v39, %v6088_v35  ;;  %v6091_v53 = vpop.f32.mrb[18].mxu0 }
 0x168   : > { %v6092_v19 = vpop.f32.mrb[19].mxu0 }
 0x169   : > { %v1457_v13 = vadd.f32 %v6011_v6, %v8297_v57  ;;  %v8345_v9 = vadd.f32 %v8269_v15, %v1454_v42  ;;  %v2236_v15 = vrot.slane %v8348_v16, 7  ;;  %v6093_v42 = vadd.f32 %v6092_v19, %v6091_v53  ;;  %v6094_v35 = vpop.f32.mrb[20].mxu0 }
 0x16a   : > { %v6095_v39 = vpop.f32.mrb[21].mxu0 }
 0x16b   : > { %v8352_v18 = vadd.f32 %v8276_v23, %v1457_v13  ;;  %v6012_v30 = vpop.f32.mrb[24].mxu1  ;;  %v6097_v53 = vpop.f32.mrb[22].mxu0 }
 0x16c   : > { %v6013_v38 = vpop.f32.mrb[25].mxu1  ;;  %5623 = vmatmul.mubr.msk.bf16.gmra.mrb[100].mxu1 %vm8330_vm6, %v2236_v15  ;;  %v6098_v19 = vpop.f32.mrb[23].mxu0  ;;  %v9933_v15 = vrot.slane %v8115_v26, 7 }
 0x16d   : > { %v6014_v61 = vadd.f32 %v6013_v38, %v6012_v30  ;;  %v6015_v24 = vpop.f32.mrb[26].mxu1  ;;  %2971 = vmatprep.mubr.bf16.mxu1 %v8115_v26 }
 0x16e   : > { %v6016_v10 = vpop.f32.mrb[27].mxu1 }
 0x16f   : > { %v1462_v0 = vadd.f32 %v6014_v61, %v8297_v57  ;;  %v6017_v1 = vadd.f32 %v6016_v10, %v6015_v24  ;;  %v6096_v24 = vadd.f32 %v6095_v39, %v6094_v35 }
 0x171   : > { %v1465_v23 = vadd.f32 %v6017_v1, %v8297_v57  ;;  %v8360_v6 = vadd.f32 %v8299_v59, %v1462_v0  ;;  %v6099_v0 = vadd.f32 %v6098_v19, %v6097_v53 }
 0x173   : > { %v8363_v13 = vadd.f32 %v6081_v22, %v1465_v23  ;;  %v6018_v30 = vpop.f32.mrb[28].mxu1 }
 0x174   : > { %v6019_v38 = vpop.f32.mrb[29].mxu1  ;;  %5625 = vmatmul.mubr.msk.bf16.gmra.mrb[104].mxu1 %vm8330_vm6, %v9933_v15  ;;  %v9938_v15 = vrot.slane %v8128_v28, 7 }
 0x175   : > { %v6020_v56 = vadd.f32 %v6019_v38, %v6018_v30  ;;  %v6021_v61 = vpop.f32.mrb[30].mxu1  ;;  %2979 = vmatprep.mubr.bf16.mxu1 %v8128_v28  ;;  %v6100_v38 = vpop.f32.mrb[24].mxu0 }
 0x176   : > { %v6022_v10 = vpop.f32.mrb[31].mxu1  ;;  %v6101_v52 = vpop.f32.mrb[25].mxu0 }
 0x177   : > { %v1470_v1 = vadd.f32 %v6020_v56, %v8297_v57  ;;  %v6023_v59 = vadd.f32 %v6022_v10, %v6021_v61  ;;  %v6102_v53 = vadd.f32 %v6101_v52, %v6100_v38  ;;  %v6103_v10 = vpop.f32.mrb[26].mxu0 }
 0x178   : > { %v6104_v43 = vpop.f32.mrb[27].mxu0 }
 0x179   : > { %v1473_v22 = vadd.f32 %v6023_v59, %v8297_v57  ;;  %v8372_v23 = vadd.f32 %v6084_v44, %v1470_v1  ;;  %v6105_v1 = vadd.f32 %v6104_v43, %v6103_v10  ;;  %v6106_v38 = vpop.f32.mrb[28].mxu0 }
 0x17a   : > { %v6107_v41 = vpop.f32.mrb[29].mxu0 }
 0x17b   : > { %v8375_v30 = vadd.f32 %v6087_v4, %v1473_v22  ;;  %v6024_v35 = vpop.f32.mrb[32].mxu1  ;;  %v8389_v43 = vadd.f32 %v6107_v41, %v6106_v38  ;;  %v6109_v10 = vpop.f32.mrb[30].mxu0  ;;  %v7323_v41 = vld [vmem:[%s9921_s2 + $0x340] sm:$0xff]  }
 0x17c   : > { %v6025_v39 = vpop.f32.mrb[33].mxu1  ;;  %5627 = vmatmul.mubr.msk.bf16.gmra.mrb[108].mxu1 %vm8330_vm6, %v9938_v15  ;;  %v6110_v45 = vpop.f32.mrb[31].mxu0  ;;  %v8392_v15 = vrot.slane %v8145_v58, 7 }
 0x17d   : > { %v6026_v56 = vadd.f32 %v6025_v39, %v6024_v35  ;;  %v6027_v61 = vpop.f32.mrb[34].mxu1  ;;  %2987 = vmatprep.mubr.bf16.mxu1 %v8145_v58 }
 0x17e   : > { %v6028_v19 = vpop.f32.mrb[35].mxu1 }
 0x17f   : > { %v1478_v59 = vadd.f32 %v6026_v56, %v8297_v57  ;;  %v6029_v44 = vadd.f32 %v6028_v19, %v6027_v61 }
 0x181   : > { %v1481_v4 = vadd.f32 %v6029_v44, %v8297_v57  ;;  %v8384_v22 = vadd.f32 %v6090_v46, %v1478_v59  ;;  %v7322_v46 = vld [vmem:[%s9921_s2 + $0x380] sm:$0xff]   ;;  %v8398_v44 = vadd.f32 %v6110_v45, %v6109_v10  ;;  %v7326_v45 = vld [vmem:[%s9921_s2 + $0x388] sm:$0xff]  }
 0x182   : > { %6416 = vmatprep.subr.bf16.mxu1 %v7322_v46 }
 0x183   : > { %v8387_v52 = vadd.f32 %v6093_v42, %v1481_v4  ;;  %v6030_v35 = vpop.f32.mrb[36].mxu1  ;;  %6417 = vmatpush3.bf16.msra.mxu1 %v7323_v41 }
 0x184   : > { %v6031_v39 = vpop.f32.mrb[37].mxu1  ;;  %5629 = vmatmul.mubr.msk.bf16.gmra.mrb[112].mxu1 %vm8330_vm6, %v8392_v15  ;;  %6418 = vmatprep.subr.bf16.mxu1 %v7326_v45  ;;  %v7331_v45 = vld [vmem:[%s9921_s2 + $0x350] sm:$0xff]  }
 0x185   : > { %v6032_v56 = vadd.f32 %v6031_v39, %v6030_v35  ;;  %v6033_v61 = vpop.f32.mrb[38].mxu1  ;;  %2995 = vmatprep.mubr.bf16.mxu1 %v8162_v3  ;;  %v6192_v39 = vpop.f32.mrb[32].mxu0 }
 0x186   : > { %v6034_v19 = vpop.f32.mrb[39].mxu1  ;;  %v6193_v10 = vpop.f32.mrb[33].mxu0 }
 0x187   : > { %v1486_v42 = vadd.f32 %v6032_v56, %v8297_v57  ;;  %v6035_v59 = vadd.f32 %v6034_v19, %v6033_v61  ;;  %v7327_v56 = vld [vmem:[%s9921_s2 + $0x348] sm:$0xff]   ;;  %v8418_v46 = vadd.f32 %v6193_v10, %v6192_v39  ;;  %v7334_v39 = vld [vmem:[%s9921_s2 + $0x398] sm:$0xff]  }
 0x188   : > { %6419 = vmatpush3.bf16.msra.mxu1 %v7327_v56 }
 0x189   : > { %v1489_v58 = vadd.f32 %v6035_v59, %v8297_v57  ;;  %v8407_v4 = vadd.f32 %v6096_v24, %v1486_v42  ;;  %v6195_v42 = vpop.f32.mrb[34].mxu0 }
 0x18a   : > { %v6196_v41 = vpop.f32.mrb[35].mxu0 }
 0x18b   : > { %v8413_v35 = vadd.f32 %v6099_v0, %v1489_v58  ;;  %v6036_v38 = vpop.f32.mrb[40].mxu1  ;;  %v8421_v0 = vrot.slane %v8162_v3, 7  ;;  %v7330_v58 = vld [vmem:[%s9921_s2 + $0x390] sm:$0xff]   ;;  %v8427_v17 = vadd.f32 %v6196_v41, %v6195_v42  ;;  %v6198_v10 = vpop.f32.mrb[36].mxu0 }
 0x18c   : > { %v6037_v61 = vpop.f32.mrb[41].mxu1  ;;  %6420 = vmatprep.subr.bf16.mxu1 %v7330_v58  ;;  %v6199_v42 = vpop.f32.mrb[37].mxu0 }
 0x18d   : > { %v6038_v24 = vadd.f32 %v6037_v61, %v6036_v38  ;;  %v6039_v19 = vpop.f32.mrb[42].mxu1  ;;  %5631 = vmatmul.mubr.msk.bf16.gmra.mrb[116].mxu1 %vm8330_vm6, %v8421_v0 }
 0x18e   : > { %v6040_v59 = vpop.f32.mrb[43].mxu1  ;;  %6421 = vmatpush3.bf16.msra.mxu1 %v7331_v45  ;;  %3003 = vmatprep.mubr.bf16.mxu1 %v8169_v33  ;;  %v7338_v45 = vld [vmem:[%s9921_s2 + $0x3a0] sm:$0xff]  }
 0x18f   : > { %v1494_v21 = vadd.f32 %v6038_v24, %v8297_v57  ;;  %v6041_v32 = vadd.f32 %v6040_v59, %v6039_v19  ;;  %v7335_v24 = vld [vmem:[%s9921_s2 + $0x358] sm:$0xff]   ;;  %6422 = vmatprep.subr.bf16.mxu1 %v7334_v39  ;;  %v6201_v59 = vpop.f32.mrb[38].mxu0  ;;  %v7339_v39 = vld [vmem:[%s9921_s2 + $0x360] sm:$0xff]  }
 0x190   : > { %v6202_v58 = vpop.f32.mrb[39].mxu0 }
 0x191   : > { %v1497_v3 = vadd.f32 %v6041_v32, %v8297_v57  ;;  %v8436_v38 = vadd.f32 %v6102_v53, %v1494_v21  ;;  %v8447_v53 = vadd.f32 %v6199_v42, %v6198_v10  ;;  %v6203_v51 = vadd.f32 %v6202_v58, %v6201_v59  ;;  %v7342_v10 = vld [vmem:[%s9921_s2 + $0x3a8] sm:$0xff]   ;;  %v6204_v42 = vpop.f32.mrb[40].mxu0 }
 0x192   : > { %6423 = vmatpush3.bf16.msra.mxu1 %v7335_v24 }
 0x193   : > { %v8442_v56 = vadd.f32 %v6105_v1, %v1497_v3  ;;  %v6042_v61 = vpop.f32.mrb[44].mxu1  ;;  %v8450_v1 = vrot.slane %v8169_v33, 7  ;;  %6424 = vmatprep.subr.bf16.mxu1 %v7338_v45 }
 0x194   : > { %v6043_v19 = vpop.f32.mrb[45].mxu1 }
 0x195   : > { %v6044_v21 = vadd.f32 %v6043_v19, %v6042_v61  ;;  %v6045_v32 = vpop.f32.mrb[46].mxu1  ;;  %5633 = vmatmul.mubr.msk.bf16.gmra.mrb[120].mxu1 %vm8330_vm6, %v8450_v1 }
 0x196   : > { %v6046_v41 = vpop.f32.mrb[47].mxu1  ;;  %6425 = vmatpush3.bf16.msra.mxu1 %v7339_v39  ;;  %3011 = vmatprep.mubr.bf16.mxu1 %v8176_v27 }
 0x197   : > { %v1502_v3 = vadd.f32 %v6044_v21, %v8297_v57  ;;  %v6047_v62 = vadd.f32 %v6046_v41, %v6045_v32  ;;  %v7343_v21 = vld [vmem:[%s9921_s2 + $0x368] sm:$0xff]   ;;  %6426 = vmatprep.subr.bf16.mxu1 %v7342_v10  ;;  %v7347_v10 = vld [vmem:[%s9921_s2 + $0x370] sm:$0xff]  }
 0x199   : > { %v1505_v33 = vadd.f32 %v6047_v62, %v8297_v57  ;;  %v8464_v61 = vadd.f32 %v8389_v43, %v1502_v3  ;;  %v6205_v57 = vpop.f32.mrb[41].mxu0  ;;  %v8477_v3 = vrot.slane %v8176_v27, 7 }
 0x19a   : > { %v6206_v59 = vadd.f32 %v6205_v57, %v6204_v42  ;;  %v6207_v41 = vpop.f32.mrb[42].mxu0  ;;  %6427 = vmatpush3.bf16.msra.mxu1 %v7343_v21  ;;  %v7351_v57 = vld [vmem:[%s9921_s2 + $0x378] sm:$0xff]  }
 0x19b   : > { %v8471_v24 = vadd.f32 %v8398_v44, %v1505_v33  ;;  %v6128_v19 = vpop.f32.mrb[48].mxu1  ;;  %v6208_v45 = vpop.f32.mrb[43].mxu0  ;;  %v7346_v44 = vld [vmem:[%s9921_s2 + $0x3b0] sm:$0xff]  }
 0x19c   : > { %v6129_v62 = vpop.f32.mrb[49].mxu1  ;;  %v6209_v40 = vadd.f32 %v6208_v45, %v6207_v41  ;;  %6428 = vmatprep.subr.bf16.mxu1 %v7346_v44  ;;  %v6210_v21 = vpop.f32.mrb[44].mxu0  ;;  %v8503_v45 = vld [vmem:[%s7649_s20 + $0x18] sm:$0xff] }
 0x19d   : > { %v6130_v43 = vadd.f32 %v6129_v62, %v6128_v19  ;;  %v6131_v32 = vpop.f32.mrb[50].mxu1  ;;  %5635 = vmatmul.mubr.msk.bf16.gmra.mrb[124].mxu1 %vm8330_vm6, %v8477_v3  ;;  %v9951_v44 = vrot.slane %v8503_v45, 1 }
 0x19e   : > { %v6132_v58 = vpop.f32.mrb[51].mxu1  ;;  %6429 = vmatpush3.bf16.msra.mxu1 %v7347_v10 }
 0x19f   : > { %v1640_v39 = vadd.f32 %v6130_v43, %v8313_v25  ;;  %v6133_v33 = vadd.f32 %v6132_v58, %v6131_v32  ;;  %v7350_v25 = vld [vmem:[%s9921_s2 + $0x3b8] sm:$0xff]   ;;  %5660 = vmatprep.mubr.msk.bf16.mxu1 %vm2277_vm7, %v9951_v44 }
 0x1a0   : > { %6430 = vmatprep.subr.bf16.mxu1 %v7350_v25 }
 0x1a1   : > { %v1643_v27 = vadd.f32 %v6133_v33, %v8319_v31  ;;  %v8491_v19 = vadd.f32 %v8418_v46, %v1640_v39  ;;  %v6211_v31 = vpop.f32.mrb[45].mxu0 }
 0x1a2   : > { %v6212_v41 = vadd.f32 %v6211_v31, %v6210_v21  ;;  %v6213_v58 = vpop.f32.mrb[46].mxu0  ;;  %6431 = vmatpush3.bf16.msra.mxu1 %v7351_v57 }
 0x1a3   : > { %v6134_v42 = vpop.f32.mrb[52].mxu1  ;;  %v8497_v62 = vadd.f32 %v8427_v17, %v1643_v27  ;;  %v6214_v17 = vpop.f32.mrb[47].mxu0 }
 0x1a4   : > { %v6135_v43 = vpop.f32.mrb[53].mxu1  ;;  %v6215_v27 = vadd.f32 %v6214_v17, %v6213_v58  ;;  %v6216_v57 = vpop.f32.mrb[48].mxu0  ;;  %v8518_v17 = vld [vmem:[%s7649_s20 + $0x20] sm:$0xff] }
 0x1a5   : > { %v6136_v46 = vadd.f32 %v6135_v43, %v6134_v42  ;;  %v6137_v32 = vpop.f32.mrb[54].mxu1  ;;  %3150 = vmatmul.mubr.bf16.vlgmr.msra.gmra.mrb[128].mxu1 %v8503_v45  ;;  %v9956_v44 = vrot.slane %v8518_v17, 1 }
 0x1a6   : > { %v6138_v39 = vpop.f32.mrb[55].mxu1 }
 0x1a7   : > { %v1648_v33 = vadd.f32 %v6136_v46, %v8345_v9  ;;  %v6139_v10 = vadd.f32 %v6138_v39, %v6137_v32  ;;  %v6217_v9 = vpop.f32.mrb[49].mxu0  ;;  %5661 = vmatprep.mubr.msk.bf16.mxu1 %vm2277_vm7, %v9956_v44 }
 0x1a8   : > { %v6218_v58 = vadd.f32 %v6217_v9, %v6216_v57  ;;  %v6219_v39 = vpop.f32.mrb[50].mxu0 }
 0x1a9   : > { %v1651_v25 = vadd.f32 %v6139_v10, %v8352_v18  ;;  %v8513_v42 = vadd.f32 %v8447_v53, %v1648_v33  ;;  %v6220_v12 = vpop.f32.mrb[51].mxu0 }
 0x1aa   : > { %v6221_v33 = vadd.f32 %v6220_v12, %v6219_v39 }
 0x1ab   : > { %v6140_v21 = vpop.f32.mrb[56].mxu1  ;;  %v8515_v43 = vadd.f32 %v6203_v51, %v1651_v25 }
 0x1ac   : > { %v6141_v31 = vpop.f32.mrb[57].mxu1 }
 0x1ad   : > { %v6142_v46 = vadd.f32 %v6141_v31, %v6140_v21  ;;  %v6143_v32 = vpop.f32.mrb[58].mxu1  ;;  %3158 = vmatmul.mubr.bf16.gmra.mrb[132].mxu1 %v8518_v17  ;;  %v6222_v21 = vpop.f32.mrb[52].mxu0 }
 0x1ae   : > { %v6144_v37 = vpop.f32.mrb[59].mxu1  ;;  %v6223_v9 = vpop.f32.mrb[53].mxu0 }
 0x1af   : > { %v1656_v18 = vadd.f32 %v6142_v46, %v8360_v6  ;;  %v6145_v53 = vadd.f32 %v6144_v37, %v6143_v32  ;;  %v6224_v37 = vadd.f32 %v6223_v9, %v6222_v21  ;;  %v6225_v12 = vpop.f32.mrb[54].mxu0  ;;  %v8532_v32 = vld [vmem:[%s7649_s20 + $0x28] sm:$0xff] }
 0x1b0   : > { %v8535_v39 = vrot.slane %v8532_v32, 1  ;;  %v6226_v8 = vpop.f32.mrb[55].mxu0 }
 0x1b1   : > { %v1659_v51 = vadd.f32 %v6145_v53, %v8363_v13  ;;  %v8527_v10 = vadd.f32 %v6206_v59, %v1656_v18  ;;  %v6227_v18 = vadd.f32 %v6226_v8, %v6225_v12  ;;  %v8547_v8 = vld [vmem:[%s7649_s20 + $0x30] sm:$0xff] }
 0x1b2   : > { %5662 = vmatprep.mubr.msk.bf16.mxu1 %vm2277_vm7, %v8535_v39 }
 0x1b3   : > { %v6146_v25 = vpop.f32.mrb[60].mxu1  ;;  %v8529_v57 = vadd.f32 %v6209_v40, %v1659_v51 }
 0x1b4   : > { %v6147_v31 = vpop.f32.mrb[61].mxu1 }
 0x1b5   : > { %v6148_v6 = vadd.f32 %v6147_v31, %v6146_v25  ;;  %v6149_v46 = vpop.f32.mrb[62].mxu1  ;;  %3166 = vmatmul.mubr.bf16.gmra.mrb[136].mxu1 %v8532_v32  ;;  %v6228_v25 = vpop.f32.mrb[56].mxu0 }
 0x1b6   : > { %v6150_v44 = vpop.f32.mrb[63].mxu1  ;;  %v6229_v9 = vpop.f32.mrb[57].mxu0 }
 0x1b7   : > { %v1664_v13 = vadd.f32 %v6148_v6, %v8372_v23  ;;  %v6151_v59 = vadd.f32 %v6150_v44, %v6149_v46  ;;  %v6230_v6 = vadd.f32 %v6229_v9, %v6228_v25  ;;  %v6231_v44 = vpop.f32.mrb[58].mxu0  ;;  %v8550_v46 = vrot.slane %v8547_v8, 1 }
 0x1b8   : > { %v6232_v60 = vpop.f32.mrb[59].mxu0 }
 0x1b9   : > { %v1667_v40 = vadd.f32 %v6151_v59, %v8375_v30  ;;  %v8542_v53 = vadd.f32 %v6212_v41, %v1664_v13  ;;  %v6233_v13 = vadd.f32 %v6232_v60, %v6231_v44  ;;  %5663 = vmatprep.mubr.msk.bf16.mxu1 %vm2277_vm7, %v8550_v46  ;;  %v8562_v60 = vld [vmem:[%s7649_s20 + $0x38] sm:$0xff] }
 0x1ba   : > { %v8565_v44 = vrot.slane %v8562_v60, 1 }
 0x1bb   : > { %v6152_v51 = vpop.f32.mrb[64].mxu1  ;;  %v8544_v21 = vadd.f32 %v6215_v27, %v1667_v40 }
 0x1bc   : > { %v6153_v31 = vpop.f32.mrb[65].mxu1 }
 0x1bd   : > { %v6154_v2 = vadd.f32 %v6153_v31, %v6152_v51  ;;  %v6155_v23 = vpop.f32.mrb[66].mxu1  ;;  %3174 = vmatmul.mubr.bf16.gmra.mrb[140].mxu1 %v8547_v8  ;;  %v6234_v51 = vpop.f32.mrb[60].mxu0 }
 0x1be   : > { %v6156_v12 = vpop.f32.mrb[67].mxu1  ;;  %v6235_v9 = vpop.f32.mrb[61].mxu0  ;;  %5664 = vmatprep.mubr.msk.bf16.mxu1 %vm2277_vm7, %v8565_v44 }
 0x1bf   : > { %v1672_v30 = vadd.f32 %v6154_v2, %v8384_v22  ;;  %v6157_v41 = vadd.f32 %v6156_v12, %v6155_v23  ;;  %v6236_v22 = vadd.f32 %v6235_v9, %v6234_v51  ;;  %v6237_v23 = vpop.f32.mrb[62].mxu0  ;;  %v8583_v9 = vld [vmem:[%s7649_s20 + $0x40] sm:$0xff] }
 0x1c0   : > { %v6238_v34 = vpop.f32.mrb[63].mxu0 }
 0x1c1   : > { %v1675_v27 = vadd.f32 %v6157_v41, %v8387_v52  ;;  %v8557_v59 = vadd.f32 %v6218_v58, %v1672_v30  ;;  %v7362_v52 = vld [vmem:[%s9921_s2 + $0x440] sm:$0xff]   ;;  %v6239_v30 = vadd.f32 %v6238_v34, %v6237_v23 }
 0x1c2   : > { %6992 = vmatprep.subr.bf16.mxu1 %v7362_v52 }
 0x1c3   : > { %v6158_v40 = vpop.f32.mrb[68].mxu1  ;;  %v8559_v25 = vadd.f32 %v6221_v33, %v1675_v27  ;;  %6993 = vmatpush3.bf16.msra.mxu1 %v7362_v52 }
 0x1c4   : > { %v6159_v31 = vpop.f32.mrb[69].mxu1 }
 0x1c5   : > { %v6160_v36 = vadd.f32 %v6159_v31, %v6158_v40  ;;  %v6161_v2 = vpop.f32.mrb[70].mxu1  ;;  %3182 = vmatmul.mubr.bf16.gmra.mrb[144].mxu1 %v8562_v60 }
 0x1c6   : > { %v6162_v12 = vpop.f32.mrb[71].mxu1 }
 0x1c7   : > { %v1680_v58 = vadd.f32 %v6160_v36, %v8407_v4  ;;  %v6163_v33 = vadd.f32 %v6162_v12, %v6161_v2  ;;  %v7364_v36 = vld [vmem:[%s9921_s2 + $0x448] sm:$0xff]   ;;  %v8586_v2 = vrot.slane %v8583_v9, 1 }
 0x1c8   : > { %6994 = vmatprep.subr.bf16.mxu1 %v7364_v36 }
 0x1c9   : > { %v1683_v41 = vadd.f32 %v6163_v33, %v8413_v35  ;;  %v8575_v27 = vadd.f32 %v6224_v37, %v1680_v58  ;;  %v7366_v35 = vld [vmem:[%s9921_s2 + $0x450] sm:$0xff]   ;;  %5665 = vmatprep.mubr.msk.bf16.mxu1 %vm2277_vm7, %v8586_v2  ;;  %6995 = vmatpush3.bf16.msra.mxu1 %v7364_v36 }
 0x1ca   : > { %6996 = vmatprep.subr.bf16.mxu1 %v7366_v35 }
 0x1cb   : > { %v6164_v40 = vpop.f32.mrb[72].mxu1  ;;  %v8577_v51 = vadd.f32 %v6227_v18, %v1683_v41 }
 0x1cc   : > { %v6165_v31 = vpop.f32.mrb[73].mxu1 }
 0x1cd   : > { %v6166_v34 = vadd.f32 %v6165_v31, %v6164_v40  ;;  %v6167_v4 = vpop.f32.mrb[74].mxu1  ;;  %3190 = vmatmul.mubr.bf16.gmra.mrb[148].mxu1 %v8583_v9 }
 0x1ce   : > { %v6168_v23 = vpop.f32.mrb[75].mxu1  ;;  %6997 = vmatpush3.bf16.msra.mxu1 %v7366_v35 }
 0x1cf   : > { %v1688_v37 = vadd.f32 %v6166_v34, %v8436_v38  ;;  %v6169_v18 = vadd.f32 %v6168_v23, %v6167_v4  ;;  %v7368_v38 = vld [vmem:[%s9921_s2 + $0x458] sm:$0xff]  }
 0x1d0   : > { %v8604_v34 = vld [vmem:[%s7649_s20 + $0x48] sm:$0xff]  ;;  %6998 = vmatprep.subr.bf16.mxu1 %v7368_v38 }
 0x1d1   : > { %v1691_v12 = vadd.f32 %v6169_v18, %v8442_v56  ;;  %v8596_v52 = vadd.f32 %v6230_v6, %v1688_v37  ;;  %v2312_v36 = vrot.slane %v8604_v34, 1  ;;  %v7370_v56 = vld [vmem:[%s9921_s2 + $0x460] sm:$0xff]  }
 0x1d2   : > { %6999 = vmatpush3.bf16.msra.mxu1 %v7368_v38 }
 0x1d3   : > { %v6170_v58 = vpop.f32.mrb[76].mxu1  ;;  %v8598_v33 = vadd.f32 %v6233_v13, %v1691_v12  ;;  %5666 = vmatprep.mubr.msk.bf16.mxu1 %vm2277_vm7, %v2312_v36  ;;  %7000 = vmatprep.subr.bf16.mxu1 %v7370_v56 }
 0x1d4   : > { %v6171_v41 = vpop.f32.mrb[77].mxu1 }
 0x1d5   : > { %v6172_v40 = vadd.f32 %v6171_v41, %v6170_v58  ;;  %v6173_v31 = vpop.f32.mrb[78].mxu1  ;;  %3198 = vmatmul.mubr.bf16.gmra.mrb[152].mxu1 %v8604_v34  ;;  %v7372_v58 = vld [vmem:[%s9921_s2 + $0x468] sm:$0xff]  }
 0x1d6   : > { %v6174_v4 = vpop.f32.mrb[79].mxu1  ;;  %7001 = vmatpush3.bf16.msra.mxu1 %v7370_v56 }
 0x1d7   : > { %v1696_v6 = vadd.f32 %v6172_v40, %v8464_v61  ;;  %v6175_v13 = vadd.f32 %v6174_v4, %v6173_v31  ;;  %v8626_v40 = vld [vmem:[%s7649_s20 + $0x50] sm:$0xff]  ;;  %7002 = vmatprep.subr.bf16.mxu1 %v7372_v58 }
 0x1d9   : > { %v1699_v23 = vadd.f32 %v6175_v13, %v8471_v24  ;;  %v8616_v35 = vadd.f32 %v6236_v22, %v1696_v6  ;;  %v2313_v24 = vrot.slane %v8626_v40, 1 }
 0x1da   : > { %7003 = vmatpush3.bf16.msra.mxu1 %v7372_v58 }
 0x1db   : > { %v6914_v37 = vpop.f32.mrb[80].mxu1  ;;  %v8618_v18 = vadd.f32 %v6239_v30, %v1699_v23  ;;  %5667 = vmatprep.mubr.msk.bf16.mxu1 %vm2277_vm7, %v2313_v24 }
 0x1dc   : > { %v1842_v61 = vadd.f32 %v6914_v37, %v8513_v42  ;;  %v1833_v12 = vpop.f32.mrb[81].mxu1  ;;  %v7374_v42 = vld [vmem:[%s9921_s2 + $0x470] sm:$0xff]  }
 0x1dd   : > { %v1834_v41 = vadd.f32 %v1833_v12, %v8491_v19  ;;  %v6915_v38 = vpop.f32.mrb[82].mxu1  ;;  %3206 = vmatmul.mubr.bf16.gmra.mrb[156].mxu1 %v8626_v40  ;;  %7004 = vmatprep.subr.bf16.mxu1 %v7374_v42  ;;  %v7375_v12 = vld [vmem:[%s9921_s2 + $0x478] sm:$0xff]  }
 0x1de   : > { %v1845_v22 = vadd.f32 %v6915_v38, %v8515_v43  ;;  %v1836_v31 = vpop.f32.mrb[83].mxu1  ;;  %v1898_v19 = vmax.f32 %v1842_v61, 0.0  ;;  %7008 = vmatprep.mubr.msk.bf16.mxu1 %vm2277_vm7, %v8535_v39  ;;  %7005 = vmatpush3.bf16.msra.mxu1 %v7374_v42  ;;  %v7313_v61 = vld [vmem:[%s9922_s3 + $0x8] sm:$0xff]  }
 0x1df   : > { %v1837_v30 = vadd.f32 %v1836_v31, %v8497_v62  ;;  %v1896_v56 = vmax.f32 %v1834_v41, 0.0  ;;  %7006 = vmatprep.subr.bf16.mxu1 %v7375_v12 }
 0x1e0   : > { %v1899_v4 = vmax.f32 %v1845_v22, 0.0 }
 0x1e1   : > { %v1897_v43 = vmax.f32 %v1837_v30, 0.0  ;;  %v7314_v30 = vld [vmem:[%s9922_s3 + $0x10] sm:$0xff]  }
 0x1e2   : > { %v1913_v6 = vpack.c.bf16 %v1899_v4, %v1898_v19  ;;  %7007 = vmatpush3.bf16.msra.mxu1 %v7375_v12 }
 0x1e3   : > { %v1912_v13 = vpack.c.bf16 %v1897_v43, %v1896_v56  ;;  %v6918_v23 = vpop.f32.mrb[84].mxu1  ;;  %v7315_v43 = vld [vmem:[%s9922_s3 + $0x18] sm:$0xff]  }
 0x1e4   : > { %v1858_v62 = vadd.f32 %v6918_v23, %v8542_v53  ;;  %v1849_v37 = vpop.f32.mrb[85].mxu1 }
 0x1e5   : > { %v1850_v58 = vadd.f32 %v1849_v37, %v8527_v10  ;;  %v6919_v41 = vpop.f32.mrb[86].mxu1  ;;  %6944 = vmatprep.mubr.bf16.mxu0 %v1912_v13  ;;  %7009 = vmatmul.mubr.msk.bf16.vlgmr.msra.gmra.mrb[160].mxu1 %vm2277_vm7, %v8550_v46 }
 0x1e6   : > { %v1861_v38 = vadd.f32 %v6919_v41, %v8544_v21  ;;  %v1852_v22 = vpop.f32.mrb[87].mxu1  ;;  %6945 = vmatmul.mubr.bf16.vlgmr.msra.gmra.mrb[64].mxu0 %v1913_v6  ;;  %v1902_v31 = vmax.f32 %v1858_v62, 0.0  ;;  %7012 = vmatprep.mubr.msk.bf16.mxu1 %vm2277_vm7, %v8565_v44 }
 0x1e7   : > { %v1853_v53 = vadd.f32 %v1852_v22, %v8529_v57  ;;  %6961 = vmatpush3.bf16.msra.mxu0 %v8327_v54  ;;  %v1900_v10 = vmax.f32 %v1850_v58, 0.0 }
 0x1e8   : > { %v1903_v42 = vmax.f32 %v1861_v38, 0.0  ;;  %6962 = vmatprep.subr.bf16.mxu0 %v7313_v61 }
 0x1e9   : > { %v1901_v19 = vmax.f32 %v1853_v53, 0.0  ;;  %v7317_v53 = vld [vmem:[%s9922_s3 + $0x28] sm:$0xff]  }
 0x1ea   : > { %v1915_v4 = vpack.c.bf16 %v1903_v42, %v1902_v31 }
 0x1eb   : > { %v1914_v21 = vpack.c.bf16 %v1901_v19, %v1900_v10  ;;  %v6922_v56 = vpop.f32.mrb[88].mxu1  ;;  %6963 = vmatpush3.bf16.msra.mxu0 %v7313_v61 }
 0x1ec   : > { %v1874_v54 = vadd.f32 %v6922_v56, %v8575_v27  ;;  %v1865_v57 = vpop.f32.mrb[89].mxu1  ;;  %6964 = vmatprep.subr.bf16.mxu0 %v7314_v30  ;;  %v7316_v27 = vld [vmem:[%s9922_s3 + $0x20] sm:$0xff]  }
 0x1ed   : > { %v1866_v6 = vadd.f32 %v1865_v57, %v8557_v59  ;;  %v6923_v13 = vpop.f32.mrb[90].mxu1  ;;  %6948 = vmatprep.mubr.bf16.mxu0 %v1914_v21  ;;  %7013 = vmatmul.mubr.msk.bf16.gmra.mrb[164].mxu1 %vm2277_vm7, %v8586_v2  ;;  %v7324_v57 = vld [vmem:[%s9921_s2 + $0x308] sm:$0xff]  }
 0x1ee   : > { %v1877_v23 = vadd.f32 %v6923_v13, %v8577_v51  ;;  %v1868_v62 = vpop.f32.mrb[91].mxu1  ;;  %6949 = vmatmul.mubr.bf16.gmra.mrb[68].mxu0 %v1915_v4  ;;  %v1906_v61 = vmax.f32 %v1874_v54, 0.0  ;;  %7016 = vmatprep.mubr.msk.bf16.mxu1 %vm2277_vm7, %v2312_v36  ;;  %v7336_v13 = vld [vmem:[%s9921_s2 + $0x320] sm:$0xff]  }
 0x1ef   : > { %v1869_v37 = vadd.f32 %v1868_v62, %v8559_v25  ;;  %6965 = vmatpush3.bf16.msra.mxu0 %v7314_v30  ;;  %v1904_v58 = vmax.f32 %v1866_v6, 0.0  ;;  %v7329_v6 = vld [vmem:[%s9921_s2 + $0x2d0] sm:$0xff]  }
 0x1f0   : > { %v1907_v12 = vmax.f32 %v1877_v23, 0.0  ;;  %6966 = vmatprep.subr.bf16.mxu0 %v7315_v43  ;;  %v7337_v23 = vld [vmem:[%s9921_s2 + $0x2e0] sm:$0xff]  }
 0x1f1   : > { %v1905_v41 = vmax.f32 %v1869_v37, 0.0  ;;  %v8733_v37 = vld [vmem:[%s7649_s20 + $0x60] sm:$0xff] }
 0x1f2   : > { %v1917_v38 = vpack.c.bf16 %v1907_v12, %v1906_v61  ;;  %v7341_v61 = vld [vmem:[%s9921_s2 + $0x2e8] sm:$0xff]   ;;  %v2331_v12 = vrot.slane %v8733_v37, 1 }
 0x1f3   : > { %v1916_v59 = vpack.c.bf16 %v1905_v41, %v1904_v58  ;;  %v6926_v51 = vpop.f32.mrb[92].mxu1  ;;  %6967 = vmatpush3.bf16.msra.mxu0 %v7315_v43  ;;  %v7328_v43 = vld [vmem:[%s9921_s2 + $0x310] sm:$0xff]   ;;  %v7349_v58 = vld [vmem:[%s9921_s2 + $0x2f8] sm:$0xff]   ;;  %v10006_v41 = vrot.slane %v8115_v26, 7  ;;  %v7354_v26 = vld [vmem:[%s9921_s2 + $0x408] sm:$0xff]  }
 0x1f4   : > { %v1890_v25 = vadd.f32 %v6926_v51, %v8616_v35  ;;  %v1881_v22 = vpop.f32.mrb[93].mxu1  ;;  %6968 = vmatprep.subr.bf16.mxu0 %v7316_v27  ;;  %v7318_v35 = vld [vmem:[%s9922_s3 + $0x30] sm:$0xff]   ;;  %v10007_v51 = vrot.slane %v8128_v28, 7  ;;  %v7358_v28 = vld [vmem:[%s9921_s2 + $0x418] sm:$0xff]  }
 0x1f5   : > { %v1882_v31 = vadd.f32 %v1881_v22, %v8596_v52  ;;  %v6927_v42 = vpop.f32.mrb[94].mxu1  ;;  %6952 = vmatprep.mubr.bf16.mxu0 %v1916_v59  ;;  %7017 = vmatmul.mubr.msk.bf16.gmra.mrb[168].mxu1 %vm2277_vm7, %v2313_v24  ;;  %v7321_v24 = vld [vmem:[%s9921_s2 + $0x2c0] sm:$0xff]   ;;  %v2269_v59 = vrot.slane %v8335_v29, 1  ;;  %v7355_v29 = vld [vmem:[%s9921_s2 + $0x3c8] sm:$0xff]   ;;  %v2270_v22 = vrot.slane %v8348_v16, 1  ;;  %v7359_v16 = vld [vmem:[%s9921_s2 + $0x3d8] sm:$0xff]  }
 0x1f6   : > { %v1893_v30 = vadd.f32 %v6927_v42, %v8618_v18  ;;  %v1884_v10 = vpop.f32.mrb[95].mxu1  ;;  %6953 = vmatmul.mubr.bf16.gmra.mrb[72].mxu0 %v1917_v38  ;;  %v1910_v36 = vmax.f32 %v1890_v25, 0.0  ;;  %v7320_v18 = vld [vmem:[%s9921_s2 + $0x300] sm:$0xff]   ;;  %v7356_v25 = vld [vmem:[%s9921_s2 + $0x410] sm:$0xff]  }
 0x1f7   : > { %v1885_v19 = vadd.f32 %v1884_v10, %v8598_v33  ;;  %6969 = vmatpush3.bf16.msra.mxu0 %v7316_v27  ;;  %v1908_v21 = vmax.f32 %v1882_v31, 0.0  ;;  %v7319_v33 = vld [vmem:[%s9922_s3 + $0x38] sm:$0xff]   ;;  %v7352_v38 = vld [vmem:[%s9921_s2 + $0x400] sm:$0xff]   ;;  %v10008_v10 = vrot.slane %v8503_v45, 1  ;;  %v7369_v45 = vld [vmem:[%s9921_s2 + $0x3f0] sm:$0xff]  }
 0x1f8   : > { %v1911_v4 = vmax.f32 %v1893_v30, 0.0  ;;  %6970 = vmatprep.subr.bf16.mxu0 %v7317_v53  ;;  %v7348_v27 = vld [vmem:[%s9921_s2 + $0x338] sm:$0xff]   ;;  %v7360_v31 = vld [vmem:[%s9921_s2 + $0x420] sm:$0xff]   ;;  %v7363_v30 = vld [vmem:[%s9921_s2 + $0x428] sm:$0xff]  }
 0x1f9   : > { %v1909_v56 = vmax.f32 %v1885_v19, 0.0  ;;  %v7361_v42 = vld [vmem:[%s9921_s2 + $0x3e0] sm:$0xff]   ;;  %v7365_v19 = vld [vmem:[%s9921_s2 + $0x3e8] sm:$0xff]  }
 0x1fa   : > { %v1919_v54 = vpack.c.bf16 %v1911_v4, %v1910_v36  ;;  %v7367_v36 = vld [vmem:[%s9921_s2 + $0x430] sm:$0xff]  }
 0x1fb   : > { %v1918_v52 = vpack.c.bf16 %v1909_v56, %v1908_v21  ;;  %6971 = vmatpush3.bf16.msra.mxu0 %v7317_v53  ;;  %v7357_v53 = vld [vmem:[%s9921_s2 + $0x3d0] sm:$0xff]  }
 0x1fc   : > { %6972 = vmatprep.subr.bf16.mxu0 %v7318_v35 }
 0x1fd   : > { %6956 = vmatprep.mubr.bf16.mxu0 %v1918_v52  ;;  %v10009_v52 = vrot.slane %v8518_v17, 1 }
 0x1fe   : > { %6957 = vmatmul.mubr.bf16.gmra.mrb[76].mxu0 %v1919_v54 }
 0x1ff   : > { %6973 = vmatpush3.bf16.msra.mxu0 %v7318_v35  ;;  %6976 = vmatprep.mubr.bf16.mxu0 %v8215_v49  ;;  %v7325_v49 = vld [vmem:[%s9921_s2 + $0x2c8] sm:$0xff]   ;;  %v7371_v35 = vld [vmem:[%s9921_s2 + $0x438] sm:$0xff]  }
 0x200   : > { %6974 = vmatprep.subr.bf16.mxu0 %v7319_v33 }
 0x203   : > { %6975 = vmatpush3.bf16.msra.mxu0 %v7319_v33 }
 0x204   : > { %6352 = vmatprep.subr.bf16.mxu0 %v7320_v18  ;;  %v7373_v18 = vld [vmem:[%s9921_s2 + $0x3f8] sm:$0xff]  }
 0x206   : > { %6977 = vmatmul.mubr.bf16.vlgmr.msra.gmra.mrb[64].mxu0 %v8213_v48  ;;  %v7332_v48 = vld [vmem:[%s9921_s2 + $0x318] sm:$0xff]  }
 0x207   : > { %6980 = vmatprep.mubr.bf16.mxu0 %v8235_v11  ;;  %6353 = vmatpush3.bf16.msra.mxu0 %v7321_v24  ;;  %v7333_v11 = vld [vmem:[%s9921_s2 + $0x2d8] sm:$0xff]  }
 0x208   : > { %6354 = vmatprep.subr.bf16.mxu0 %v7324_v57 }
 0x20b   : > { %6355 = vmatpush3.bf16.msra.mxu0 %v7325_v49 }
 0x20c   : > { %6356 = vmatprep.subr.bf16.mxu0 %v7328_v43 }
 0x20e   : > { %6981 = vmatmul.mubr.bf16.gmra.mrb[68].mxu0 %v8230_v5  ;;  %v7340_v5 = vld [vmem:[%s9921_s2 + $0x328] sm:$0xff]  }
 0x20f   : > { %6984 = vmatprep.mubr.bf16.mxu0 %v8262_v7  ;;  %6357 = vmatpush3.bf16.msra.mxu0 %v7329_v6  ;;  %v8729_v7 = vld [vmem:[%s7649_s20 + $0x58] sm:$0xff] }
 0x210   : > { %6358 = vmatprep.subr.bf16.mxu0 %v7332_v48  ;;  %v2330_v62 = vrot.slane %v8729_v7, 1 }
 0x212   : > { %7020 = vmatprep.mubr.msk.bf16.mxu1 %vm2277_vm7, %v2330_v62 }
 0x213   : > { %6359 = vmatpush3.bf16.msra.mxu0 %v7333_v11  ;;  %7021 = vmatmul.mubr.msk.bf16.gmra.mrb[172].mxu1 %vm2277_vm7, %v2331_v12  ;;  %v2304_v11 = vrot.slane %v8604_v34, 7  ;;  %v2305_v12 = vrot.slane %v8626_v40, 7 }
 0x214   : > { %6360 = vmatprep.subr.bf16.mxu0 %v7336_v13 }
 0x216   : > { %6985 = vmatmul.mubr.bf16.gmra.mrb[72].mxu0 %v8257_v63  ;;  %v7344_v63 = vld [vmem:[%s9921_s2 + $0x330] sm:$0xff]  }
 0x217   : > { %6988 = vmatprep.mubr.bf16.mxu0 %v8289_v50  ;;  %6361 = vmatpush3.bf16.msra.mxu0 %v7337_v23  ;;  %v7345_v50 = vld [vmem:[%s9921_s2 + $0x2f0] sm:$0xff]  }
 0x218   : > { %6362 = vmatprep.subr.bf16.mxu0 %v7340_v5 }
 0x21b   : > { %6363 = vmatpush3.bf16.msra.mxu0 %v7341_v61 }
 0x21c   : > { %6364 = vmatprep.subr.bf16.mxu0 %v7344_v63 }
 0x21e   : > { %6989 = vmatmul.mubr.bf16.gmra.mrb[76].mxu0 %v8284_v47  ;;  %v7353_v47 = vld [vmem:[%s9921_s2 + $0x3c0] sm:$0xff]  }
 0x21f   : > { %6365 = vmatpush3.bf16.msra.mxu0 %v7345_v50  ;;  %5637 = vmatprep.mubr.msk.bf16.mxu0 %vm8330_vm6, %v10006_v41 }
 0x220   : > { %6366 = vmatprep.subr.bf16.mxu0 %v7348_v27 }
 0x223   : > { %6367 = vmatpush3.bf16.msra.mxu0 %v7349_v58 }
 0x224   : > { %6480 = vmatprep.subr.bf16.mxu0 %v7352_v38 }
 0x226   : > { %5638 = vmatmul.mubr.msk.bf16.vlgmr.msra.gmra.mrb[80].mxu0 %vm2277_vm7, %v2269_v59 }
 0x227   : > { %6481 = vmatpush3.bf16.msra.mxu0 %v7353_v47  ;;  %5640 = vmatprep.mubr.msk.bf16.mxu0 %vm8330_vm6, %v10007_v51 }
 0x228   : > { %6482 = vmatprep.subr.bf16.mxu0 %v7354_v26 }
 0x22b   : > { %6483 = vmatpush3.bf16.msra.mxu0 %v7355_v29 }
 0x22c   : > { %6484 = vmatprep.subr.bf16.mxu0 %v7356_v25 }
 0x22e   : > { %5641 = vmatmul.mubr.msk.bf16.gmra.mrb[84].mxu0 %vm2277_vm7, %v2270_v22 }
 0x22f   : > { %5643 = vmatprep.mubr.msk.bf16.mxu0 %vm8330_vm6, %v8392_v15  ;;  %6485 = vmatpush3.bf16.msra.mxu0 %v7357_v53 }
 0x230   : > { %6486 = vmatprep.subr.bf16.mxu0 %v7358_v28 }
 0x233   : > { %6487 = vmatpush3.bf16.msra.mxu0 %v7359_v16 }
 0x234   : > { %6488 = vmatprep.subr.bf16.mxu0 %v7360_v31 }
 0x236   : > { %5644 = vmatmul.mubr.msk.bf16.gmra.mrb[88].mxu0 %vm2277_vm7, %v10008_v10 }
 0x237   : > { %5646 = vmatprep.mubr.msk.bf16.mxu0 %vm8330_vm6, %v8421_v0  ;;  %6489 = vmatpush3.bf16.msra.mxu0 %v7361_v42  ;;  %v6304_v4 = vpop.f32.mrb[96].mxu1 }
 0x238   : > { %6490 = vmatprep.subr.bf16.mxu0 %v7363_v30  ;;  %v6305_v21 = vpop.f32.mrb[97].mxu1 }
 0x239   : > { %v8821_v56 = vadd.f32 %v6305_v21, %v6304_v4  ;;  %v6307_v54 = vpop.f32.mrb[98].mxu1 }
 0x23a   : > { %v6308_v33 = vpop.f32.mrb[99].mxu1 }
 0x23b   : > { %6491 = vmatpush3.bf16.msra.mxu0 %v7365_v19  ;;  %v8832_v24 = vadd.f32 %v6308_v33, %v6307_v54 }
 0x23c   : > { %6492 = vmatprep.subr.bf16.mxu0 %v7367_v36 }
 0x23e   : > { %5647 = vmatmul.mubr.msk.bf16.gmra.mrb[92].mxu0 %vm2277_vm7, %v10009_v52 }
 0x23f   : > { %5649 = vmatprep.mubr.msk.bf16.mxu0 %vm8330_vm6, %v8450_v1  ;;  %6493 = vmatpush3.bf16.msra.mxu0 %v7369_v45  ;;  %v6310_v57 = vpop.f32.mrb[100].mxu1 }
 0x240   : > { %6494 = vmatprep.subr.bf16.mxu0 %v7371_v35  ;;  %v6311_v49 = vpop.f32.mrb[101].mxu1 }
 0x241   : > { %v8834_v43 = vadd.f32 %v6311_v49, %v6310_v57  ;;  %v6313_v17 = vpop.f32.mrb[102].mxu1 }
 0x242   : > { %v6314_v6 = vpop.f32.mrb[103].mxu1 }
 0x243   : > { %6495 = vmatpush3.bf16.msra.mxu0 %v7373_v18  ;;  %v8841_v48 = vadd.f32 %v6314_v6, %v6313_v17 }
 0x246   : > { %5650 = vmatmul.mubr.msk.bf16.gmra.mrb[96].mxu0 %vm2277_vm7, %v8535_v39 }
 0x247   : > { %5652 = vmatprep.mubr.msk.bf16.mxu0 %vm8330_vm6, %v8477_v3  ;;  %v6316_v13 = vpop.f32.mrb[104].mxu1 }
 0x248   : > { %v6317_v23 = vpop.f32.mrb[105].mxu1 }
 0x249   : > { %v8844_v5 = vadd.f32 %v6317_v23, %v6316_v13  ;;  %v6319_v62 = vpop.f32.mrb[106].mxu1 }
 0x24a   : > { %v6320_v61 = vpop.f32.mrb[107].mxu1 }
 0x24b   : > { %v8850_v39 = vadd.f32 %v6320_v61, %v6319_v62 }
 0x24e   : > { %5653 = vmatmul.mubr.msk.bf16.gmra.mrb[100].mxu0 %vm2277_vm7, %v8550_v46 }
 0x24f   : > { %5655 = vmatprep.mubr.msk.bf16.mxu0 %vm8330_vm6, %v2304_v11  ;;  %v6322_v63 = vpop.f32.mrb[108].mxu1 }
 0x250   : > { %v6323_v50 = vpop.f32.mrb[109].mxu1 }
 0x251   : > { %v8853_v27 = vadd.f32 %v6323_v50, %v6322_v63  ;;  %v6325_v58 = vpop.f32.mrb[110].mxu1 }
 0x252   : > { %v6326_v41 = vpop.f32.mrb[111].mxu1 }
 0x253   : > { %v8859_v46 = vadd.f32 %v6326_v41, %v6325_v58 }
 0x256   : > { %5656 = vmatmul.mubr.msk.bf16.gmra.mrb[104].mxu0 %vm2277_vm7, %v8565_v44 }
 0x257   : > { %5658 = vmatprep.mubr.msk.bf16.mxu0 %vm8330_vm6, %v2305_v12  ;;  %v6328_v38 = vpop.f32.mrb[112].mxu1 }
 0x258   : > { %v6329_v59 = vpop.f32.mrb[113].mxu1 }
 0x259   : > { %v8861_v47 = vadd.f32 %v6329_v59, %v6328_v38  ;;  %v6331_v26 = vpop.f32.mrb[114].mxu1 }
 0x25a   : > { %v6332_v51 = vpop.f32.mrb[115].mxu1 }
 0x25b   : > { %v8866_v29 = vadd.f32 %v6332_v51, %v6331_v26 }
 0x25e   : > { %5659 = vmatmul.mubr.msk.bf16.gmra.mrb[108].mxu0 %vm2277_vm7, %v8586_v2 }
 0x25f   : > { %3246 = vmatprep.mubr.bf16.mxu0 %v8532_v32 }
 0x260   : > { %v6334_v44 = vpop.f32.mrb[116].mxu1 }
 0x261   : > { %v6335_v25 = vpop.f32.mrb[117].mxu1 }
 0x262   : > { %v8868_v22 = vadd.f32 %v6335_v25, %v6334_v44  ;;  %v6337_v53 = vpop.f32.mrb[118].mxu1 }
 0x263   : > { %v6338_v28 = vpop.f32.mrb[119].mxu1 }
 0x264   : > { %v8874_v16 = vadd.f32 %v6338_v28, %v6337_v53 }
 0x266   : > { %5669 = vmatmul.mubr.msk.bf16.vlgmr.msra.gmra.mrb[112].mxu0 %vm8330_vm6, %v8392_v15 }
 0x267   : > { %3254 = vmatprep.mubr.bf16.mxu0 %v8547_v8 }
 0x268   : > { %v6340_v2 = vpop.f32.mrb[120].mxu1 }
 0x269   : > { %v6341_v31 = vpop.f32.mrb[121].mxu1 }
 0x26a   : > { %v8876_v42 = vadd.f32 %v6341_v31, %v6340_v2  ;;  %v6343_v32 = vpop.f32.mrb[122].mxu1 }
 0x26b   : > { %v6344_v30 = vpop.f32.mrb[123].mxu1 }
 0x26c   : > { %v8882_v10 = vadd.f32 %v6344_v30, %v6343_v32  ;;  %v7376_v32 = vld [vmem:[%s9922_s3 + $0x80] sm:$0xff]  }
 0x26d   : > { %7024 = vmatprep.subr.bf16.mxu0 %v7376_v32 }
 0x26e   : > { %5671 = vmatmul.mubr.msk.bf16.gmra.mrb[116].mxu0 %vm8330_vm6, %v8421_v0 }
 0x26f   : > { %3262 = vmatprep.mubr.bf16.mxu0 %v8562_v60  ;;  %7025 = vmatpush3.bf16.msra.mxu0 %v7376_v32  ;;  %v9010_v32 = vld [vmem:[%s7649_s20] sm:$0xff] }
 0x270   : > { %v6346_v15 = vpop.f32.mrb[124].mxu1  ;;  %4393 = vmatprep.mubr.bf16.mxu1 %v9010_v32 }
 0x271   : > { %v6347_v19 = vpop.f32.mrb[125].mxu1 }
 0x272   : > { %v8884_v36 = vadd.f32 %v6347_v19, %v6346_v15  ;;  %v6349_v8 = vpop.f32.mrb[126].mxu1  ;;  %v7379_v15 = vld [vmem:[%s9921_s2 + $0x4c8] sm:$0xff]  }
 0x273   : > { %v6350_v45 = vpop.f32.mrb[127].mxu1 }
 0x274   : > { %v8890_v4 = vadd.f32 %v6350_v45, %v6349_v8  ;;  %v7380_v8 = vld [vmem:[%s9921_s2 + $0x488] sm:$0xff]  }
 0x276   : > { %5673 = vmatmul.mubr.msk.bf16.gmra.mrb[120].mxu0 %vm8330_vm6, %v8450_v1  ;;  %10010 = vst [vmem:[#allocation27_spill] sm:$0xff] %v8890_v4 }
 0x277   : > { %3270 = vmatprep.mubr.bf16.mxu0 %v8583_v9 }
 0x278   : > { %v6432_v0 = vpop.f32.mrb[128].mxu1 }
 0x279   : > { %v6433_v35 = vpop.f32.mrb[129].mxu1 }
 0x27a   : > { %v8892_v21 = vadd.f32 %v6433_v35, %v6432_v0  ;;  %v6435_v60 = vpop.f32.mrb[130].mxu1 }
 0x27b   : > { %v6436_v54 = vpop.f32.mrb[131].mxu1 }
 0x27c   : > { %v8898_v52 = vadd.f32 %v6436_v54, %v6435_v60  ;;  %v7382_v54 = vld [vmem:[%s9921_s2 + $0x4d0] sm:$0xff]  }
 0x27e   : > { %5675 = vmatmul.mubr.msk.bf16.gmra.mrb[124].mxu0 %vm8330_vm6, %v8477_v3 }
 0x27f   : > { %3278 = vmatprep.mubr.bf16.mxu0 %v8604_v34 }
 0x280   : > { %v6438_v1 = vpop.f32.mrb[132].mxu1 }
 0x281   : > { %v6439_v33 = vpop.f32.mrb[133].mxu1 }
 0x282   : > { %v8900_v9 = vadd.f32 %v6439_v33, %v6438_v1  ;;  %v6441_v18 = vpop.f32.mrb[134].mxu1  ;;  %v7383_v1 = vld [vmem:[%s9921_s2 + $0x490] sm:$0xff]   ;;  %v7381_v33 = vld [vmem:[%s9922_s3 + $0x88] sm:$0xff]  }
 0x283   : > { %v6442_v57 = vpop.f32.mrb[135].mxu1  ;;  %7026 = vmatprep.subr.bf16.mxu0 %v7381_v33 }
 0x284   : > { %v8905_v49 = vadd.f32 %v6442_v57, %v6441_v18  ;;  %v7384_v57 = vld [vmem:[%s9921_s2 + $0x4d8] sm:$0xff]   ;;  %7027 = vmatpush3.bf16.msra.mxu0 %v7381_v33  ;;  %v7456_v33 = vld [vmem:[%s9922_s3 + $0xc0] sm:$0xff]  }
 0x286   : > { %5677 = vmatmul.mubr.msk.bf16.gmra.mrb[128].mxu0 %vm8330_vm6, %v2304_v11  ;;  %v2322_v11 = vrot.slane %v8729_v7, 7 }
 0x287   : > { %3286 = vmatprep.mubr.bf16.mxu0 %v8626_v40 }
 0x288   : > { %v6444_v17 = vpop.f32.mrb[136].mxu1 }
 0x289   : > { %v6445_v3 = vpop.f32.mrb[137].mxu1 }
 0x28a   : > { %v8907_v6 = vadd.f32 %v6445_v3, %v6444_v17  ;;  %v6447_v34 = vpop.f32.mrb[138].mxu1  ;;  %v7385_v3 = vld [vmem:[%s9921_s2 + $0x498] sm:$0xff]  }
 0x28b   : > { %v6448_v13 = vpop.f32.mrb[139].mxu1 }
 0x28c   : > { %v8912_v23 = vadd.f32 %v6448_v13, %v6447_v34 }
 0x28e   : > { %5679 = vmatmul.mubr.msk.bf16.gmra.mrb[132].mxu0 %vm8330_vm6, %v2305_v12  ;;  %v2323_v12 = vrot.slane %v8733_v37, 7 }
 0x28f   : > { %3294 = vmatprep.mubr.bf16.mxu0 %v8729_v7 }
 0x290   : > { %v6450_v62 = vpop.f32.mrb[140].mxu1 }
 0x291   : > { %v6451_v61 = vpop.f32.mrb[141].mxu1 }
 0x292   : > { %v8915_v40 = vadd.f32 %v6451_v61, %v6450_v62  ;;  %v6453_v63 = vpop.f32.mrb[142].mxu1 }
 0x293   : > { %v6454_v50 = vpop.f32.mrb[143].mxu1 }
 0x294   : > { %v8920_v58 = vadd.f32 %v6454_v50, %v6453_v63  ;;  %v7387_v63 = vld [vmem:[%s9921_s2 + $0x4e0] sm:$0xff]  }
 0x295   : > { %v7388_v50 = vld [vmem:[%s9921_s2 + $0x4a0] sm:$0xff]  }
 0x296   : > { %5681 = vmatmul.mubr.msk.bf16.gmra.mrb[136].mxu0 %vm8330_vm6, %v2322_v11  ;;  %v7386_v11 = vld [vmem:[%s9922_s3 + $0x90] sm:$0xff]  }
 0x297   : > { %3302 = vmatprep.mubr.bf16.mxu0 %v8733_v37  ;;  %v7377_v37 = vld [vmem:[%s9921_s2 + $0x4c0] sm:$0xff]   ;;  %7028 = vmatprep.subr.bf16.mxu0 %v7386_v11 }
 0x298   : > { %v6456_v41 = vpop.f32.mrb[144].mxu1  ;;  %6576 = vmatprep.subr.bf16.mxu1 %v7377_v37  ;;  %7029 = vmatpush3.bf16.msra.mxu0 %v7386_v11  ;;  %v7394_v37 = vld [vmem:[%s9921_s2 + $0x4b0] sm:$0xff]  }
 0x299   : > { %v6457_v38 = vpop.f32.mrb[145].mxu1  ;;  %6577 = vmatpush3.bf16.msra.mxu1 %v7378_v55  ;;  %v7395_v55 = vld [vmem:[%s9922_s3 + $0xa8] sm:$0xff]  }
 0x29a   : > { %v8923_v59 = vadd.f32 %v6457_v38, %v6456_v41  ;;  %v6459_v7 = vpop.f32.mrb[146].mxu1  ;;  %6578 = vmatprep.subr.bf16.mxu1 %v7379_v15  ;;  %v7390_v41 = vld [vmem:[%s9921_s2 + $0x4e8] sm:$0xff]   ;;  %v9969_v15 = vshll.u32 %v9010_v32, 16 }
 0x29b   : > { %v6460_v26 = vpop.f32.mrb[147].mxu1  ;;  %v7391_v38 = vld [vmem:[%s9921_s2 + $0x4a8] sm:$0xff]  }
 0x29c   : > { %v8927_v51 = vadd.f32 %v6460_v26, %v6459_v7  ;;  %v7392_v26 = vld [vmem:[%s9922_s3 + $0xa0] sm:$0xff]  }
 0x29d   : > { %6579 = vmatpush3.bf16.msra.mxu1 %v7380_v8  ;;  %v7397_v8 = vld [vmem:[%s9921_s2 + $0x4b8] sm:$0xff]  }
 0x29e   : > { %5683 = vmatmul.mubr.msk.bf16.gmra.mrb[140].mxu0 %vm8330_vm6, %v2323_v12  ;;  %6580 = vmatprep.subr.bf16.mxu1 %v7382_v54  ;;  %v7389_v12 = vld [vmem:[%s9922_s3 + $0x98] sm:$0xff]   ;;  %v7398_v54 = vld [vmem:[%s9922_s3 + $0xb0] sm:$0xff]  }
 0x29f   : > { %7030 = vmatprep.subr.bf16.mxu0 %v7389_v12 }
 0x2a0   : > { %v6462_v44 = vpop.f32.mrb[148].mxu1  ;;  %7031 = vmatpush3.bf16.msra.mxu0 %v7389_v12 }
 0x2a1   : > { %v6463_v25 = vpop.f32.mrb[149].mxu1  ;;  %6581 = vmatpush3.bf16.msra.mxu1 %v7383_v1  ;;  %7032 = vmatprep.subr.bf16.mxu0 %v7392_v26 }
 0x2a2   : > { %v8929_v53 = vadd.f32 %v6463_v25, %v6462_v44  ;;  %v6465_v28 = vpop.f32.mrb[150].mxu1  ;;  %6582 = vmatprep.subr.bf16.mxu1 %v7384_v57  ;;  %v7399_v57 = vld [vmem:[%s9922_s3 + $0xb8] sm:$0xff]  }
 0x2a3   : > { %v6466_v2 = vpop.f32.mrb[151].mxu1 }
 0x2a4   : > { %v8931_v31 = vadd.f32 %v6466_v2, %v6465_v28  ;;  %v7393_v28 = vld [vmem:[%s9921_s2 + $0x4f0] sm:$0xff]   ;;  %7033 = vmatpush3.bf16.msra.mxu0 %v7392_v26 }
 0x2a5   : > { %6583 = vmatpush3.bf16.msra.mxu1 %v7385_v3  ;;  %7034 = vmatprep.subr.bf16.mxu0 %v7395_v55 }
 0x2a6   : > { %6584 = vmatprep.subr.bf16.mxu1 %v7387_v63 }
 0x2a8   : > { %v6468_v30 = vpop.f32.mrb[152].mxu1  ;;  %7035 = vmatpush3.bf16.msra.mxu0 %v7395_v55  ;;  %v3627_v55 = vrot.slane %v7801_v14, 7  ;;  %v10034_v14 = vld [vmem:[#allocation12_spill] sm:$0xff] }
 0x2a9   : > { %v6469_v19 = vpop.f32.mrb[153].mxu1  ;;  %6585 = vmatpush3.bf16.msra.mxu1 %v7388_v50  ;;  %7036 = vmatprep.subr.bf16.mxu0 %v7398_v54 }
 0x2aa   : > { %v8948_v45 = vadd.f32 %v6469_v19, %v6468_v30  ;;  %v6471_v0 = vpop.f32.mrb[154].mxu1  ;;  %6586 = vmatprep.subr.bf16.mxu1 %v7390_v41  ;;  %v9970_v30 = vshrl.u32 %v9010_v32, 16  ;;  %v7396_v19 = vld [vmem:[%s9921_s2 + $0x4f8] sm:$0xff]  }
 0x2ab   : > { %v6472_v35 = vpop.f32.mrb[155].mxu1 }
 0x2ac   : > { %v8950_v60 = vadd.f32 %v6472_v35, %v6471_v0  ;;  %v3613_v0 = vrot.slane %v9970_v30, 6  ;;  %v3616_v35 = vrot.slane %v9969_v15, 7  ;;  %7037 = vmatpush3.bf16.msra.mxu0 %v7398_v54  ;;  %v7403_v15 = vld [vmem:[%s9921_s2 + $0x580] sm:$0xff]   ;;  %v9102_v30 = vld [vmem:[%s7649_s20 + $0x28] sm:$0xff] }
 0x2ad   : > { %6587 = vmatpush3.bf16.msra.mxu1 %v7391_v38  ;;  %7038 = vmatprep.subr.bf16.mxu0 %v7399_v57 }
 0x2ae   : > { %6588 = vmatprep.subr.bf16.mxu1 %v7393_v28  ;;  %v3617_v1 = vor.u32 %v3616_v35, %v3613_v0  ;;  %v7483_v28 = vld [vmem:[%s7649_s20 + $0x10] sm:$0xff]  ;;  %v9063_v0 = vld [vmem:[%s7649_s20 + $0x18] sm:$0xff] }
 0x2af   : > { %v10023_v35 = vld [vmem:[#allocation7_spill] sm:$0xff] }
 0x2b0   : > { %v6474_v18 = vpop.f32.mrb[156].mxu1  ;;  %7039 = vmatpush3.bf16.msra.mxu0 %v7399_v57  ;;  %v3629_v54 = vrot.slane %v10023_v35, 6 }
 0x2b1   : > { %v6475_v17 = vpop.f32.mrb[157].mxu1  ;;  %6589 = vmatpush3.bf16.msra.mxu1 %v7394_v37  ;;  %v3626_v37 = vrot.slane %v7812_v20, 6  ;;  %v3636_v20 = vrot.slane %v10034_v14, 7 }
 0x2b2   : > { %v8967_v34 = vadd.f32 %v6475_v17, %v6474_v18  ;;  %v6477_v13 = vpop.f32.mrb[158].mxu1  ;;  %6590 = vmatprep.subr.bf16.mxu1 %v7396_v19  ;;  %v3655_v18 = vsel %vm9028_vm10, 0, %v3617_v1  ;;  %v9038_v17 = vld [vmem:[%s7649_s20 + $0x8] sm:$0xff] }
 0x2b3   : > { %v6478_v62 = vpop.f32.mrb[159].mxu1  ;;  %v9968_v3 = vshrl.u32 %v9038_v17, 16  ;;  %v3628_v19 = vor.u32 %v3627_v55, %v3626_v37  ;;  %v10024_v1 = vld [vmem:[#allocation8_spill] sm:$0xff]  ;;  %v9082_v37 = vld [vmem:[%s7649_s20 + $0x20] sm:$0xff] }
 0x2b4   : > { %10011 = vst [vmem:[#allocation28_spill] sm:$0xff] %v8967_v34  ;;  %v8972_v61 = vadd.f32 %v6478_v62, %v6477_v13  ;;  %v9967_v13 = vshll.u32 %v9038_v17, 16  ;;  %v10030_v55 = vld [vmem:[#allocation9_spill] sm:$0xff] }
 0x2b5   : > { %6591 = vmatpush3.bf16.msra.mxu1 %v7397_v8  ;;  %v3621_v11 = vrot.slane %v9968_v3, 6  ;;  %v3657_v8 = vsel %vm9028_vm10, 0, %v3628_v19  ;;  %v3632_v19 = vrot.slane %v10030_v55, 6 }
 0x2b6   : > { %10012 = vst [vmem:[#allocation29_spill] sm:$0xff] %v8972_v61  ;;  %v3624_v62 = vrot.slane %v9967_v13, 7 }
 0x2b8   : > { %v8989_v7 = vpop.f32.mrb[160].mxu1  ;;  %4394 = vmatmul.mubr.bf16.vlgmr.msra.gmra.mrb[176].mxu1 %v3655_v18  ;;  %v3625_v12 = vor.u32 %v3624_v62, %v3621_v11  ;;  %v3630_v18 = vrot.slane %v10024_v1, 7 }
 0x2b9   : > { %10013 = vst [vmem:[#allocation30_spill] sm:$0xff] %v8989_v7  ;;  %v8994_v44 = vpop.f32.mrb[161].mxu1  ;;  %4401 = vmatprep.mubr.bf16.mxu1 %v9038_v17 }
 0x2ba   : > { %10014 = vst [vmem:[#allocation31_spill] sm:$0xff] %v8994_v44  ;;  %v8996_v25 = vpop.f32.mrb[162].mxu1  ;;  %v3656_v26 = vsel %vm9028_vm10, 0, %v3625_v12  ;;  %v3631_v62 = vor.u32 %v3630_v18, %v3629_v54  ;;  %v7400_v54 = vld [vmem:[%s9921_s2 + $0x540] sm:$0xff]  }
 0x2bb   : > { %10015 = vst [vmem:[#allocation32_spill] sm:$0xff] %v8996_v25  ;;  %v9001_v2 = vpop.f32.mrb[163].mxu1  ;;  %6640 = vmatprep.subr.bf16.mxu0 %v7400_v54  ;;  %v10033_v54 = vld [vmem:[#allocation11_spill] sm:$0xff] }
 0x2bc   : > { %10016 = vst [vmem:[#allocation33_spill] sm:$0xff] %v9001_v2 }
 0x2c0   : > { %v9047_v63 = vpop.f32.mrb[164].mxu1  ;;  %4402 = vmatmul.mubr.bf16.gmra.mrb[180].mxu1 %v3656_v26 }
 0x2c1   : > { %10019 = vst [vmem:[#allocation34_spill] sm:$0xff] %v9047_v63  ;;  %v9049_v50 = vpop.f32.mrb[165].mxu1  ;;  %4409 = vmatprep.mubr.bf16.mxu1 %v7483_v28  ;;  %v9078_v28 = vsel %vm9028_vm10, 0, %v3631_v62  ;;  %v7402_v62 = vld [vmem:[%s9921_s2 + $0x5c0] sm:$0xff]   ;;  %v7422_v63 = vld [vmem:[%s9921_s2 + $0x5e8] sm:$0xff]  }
 0x2c2   : > { %10020 = vst [vmem:[#allocation35_spill] sm:$0xff] %v9049_v50  ;;  %v9051_v41 = vpop.f32.mrb[166].mxu1  ;;  %10029 = vst [vmem:[#allocation40_spill] sm:$0xff] %v9078_v28  ;;  %6704 = vmatprep.subr.bf16.mxu1 %v7402_v62  ;;  %v10044_v50 = vshll.u32 %v9010_v32, 16 }
 0x2c3   : > { %10021 = vst [vmem:[#allocation36_spill] sm:$0xff] %v9051_v41  ;;  %v9053_v38 = vpop.f32.mrb[167].mxu1  ;;  %6705 = vmatpush3.bf16.msra.mxu1 %v7403_v15 }
 0x2c4   : > { %10022 = vst [vmem:[#allocation37_spill] sm:$0xff] %v9053_v38  ;;  %v9178_v25 = vrot.slane %v10044_v50, 2  ;;  %v7427_v50 = vld [vmem:[%s9921_s2 + $0x5b0] sm:$0xff]  }
 0x2c8   : > { %4410 = vmatmul.mubr.bf16.gmra.mrb[184].mxu1 %v3657_v8  ;;  %v9068_v57 = vpop.f32.mrb[168].mxu1  ;;  %v10031_v8 = vld [vmem:[#allocation10_spill] sm:$0xff] }
 0x2c9   : > { %4417 = vmatprep.mubr.bf16.mxu1 %v9063_v0  ;;  %10025 = vst [vmem:[#allocation7_spill] sm:$0xff] %v9068_v57  ;;  %v9070_v11 = vpop.f32.mrb[169].mxu1  ;;  %v3633_v13 = vrot.slane %v10031_v8, 7 }
 0x2ca   : > { %10026 = vst [vmem:[#allocation8_spill] sm:$0xff] %v9070_v11  ;;  %v9072_v12 = vpop.f32.mrb[170].mxu1  ;;  %v7419_v11 = vld [vmem:[%s9921_s2 + $0x5a0] sm:$0xff]  }
 0x2cb   : > { %10027 = vst [vmem:[#allocation38_spill] sm:$0xff] %v9072_v12  ;;  %v9074_v26 = vpop.f32.mrb[171].mxu1  ;;  %v3634_v18 = vor.u32 %v3633_v13, %v3632_v19  ;;  %v7406_v13 = vld [vmem:[%s9921_s2 + $0x5c8] sm:$0xff]   ;;  %v7410_v12 = vld [vmem:[%s9921_s2 + $0x5d0] sm:$0xff]  }
 0x2cc   : > { %10028 = vst [vmem:[#allocation39_spill] sm:$0xff] %v9074_v26  ;;  %v7407_v19 = vld [vmem:[%s9921_s2 + $0x588] sm:$0xff]   ;;  %6706 = vmatprep.subr.bf16.mxu1 %v7406_v13  ;;  %v7411_v13 = vld [vmem:[%s9921_s2 + $0x590] sm:$0xff]  }
 0x2cd   : > { %v9095_v3 = vsel %vm9028_vm10, 0, %v3634_v18  ;;  %v3635_v18 = vrot.slane %v10033_v54, 6  ;;  %6707 = vmatpush3.bf16.msra.mxu1 %v7407_v19  ;;  %v7414_v19 = vld [vmem:[%s9921_s2 + $0x5d8] sm:$0xff]  }
 0x2ce   : > { %10032 = vst [vmem:[#allocation9_spill] sm:$0xff] %v9095_v3  ;;  %6708 = vmatprep.subr.bf16.mxu1 %v7410_v12 }
 0x2cf   : > { %v3637_v62 = vor.u32 %v3636_v20, %v3635_v18  ;;  %v9133_v20 = vld [vmem:[%s7649_s20 + $0x30] sm:$0xff]  ;;  %v7415_v18 = vld [vmem:[%s9921_s2 + $0x598] sm:$0xff]  }
 0x2d0   : > { %4418 = vmatmul.mubr.bf16.gmra.mrb[188].mxu1 %v9078_v28 }
 0x2d1   : > { %4425 = vmatprep.mubr.bf16.mxu1 %v9082_v37  ;;  %v9126_v26 = vsel %vm9028_vm10, 0, %v3637_v62  ;;  %6709 = vmatpush3.bf16.msra.mxu1 %v7411_v13  ;;  %v10040_v62 = vld [vmem:[#allocation15_spill] sm:$0xff] }
 0x2d2   : > { %10039 = vst [vmem:[#allocation42_spill] sm:$0xff] %v9126_v26  ;;  %6710 = vmatprep.subr.bf16.mxu1 %v7414_v19  ;;  %v7418_v13 = vld [vmem:[%s9921_s2 + $0x5e0] sm:$0xff]  }
 0x2d5   : > { %6711 = vmatpush3.bf16.msra.mxu1 %v7415_v18 }
 0x2d6   : > { %6712 = vmatprep.subr.bf16.mxu1 %v7418_v13 }
 0x2d8   : > { %4426 = vmatmul.mubr.bf16.gmra.mrb[192].mxu1 %v9095_v3 }
 0x2d9   : > { %4433 = vmatprep.mubr.bf16.mxu1 %v9102_v30  ;;  %6713 = vmatpush3.bf16.msra.mxu1 %v7419_v11  ;;  %v10043_v11 = vshrl.u32 %v9010_v32, 16  ;;  %v7426_v32 = vld [vmem:[%s9921_s2 + $0x5f0] sm:$0xff]  }
 0x2da   : > { %6714 = vmatprep.subr.bf16.mxu1 %v7422_v63 }
 0x2db   : > { %v9174_v38 = vrot.slane %v10043_v11, 1 }
 0x2e0   : > { %4434 = vmatmul.mubr.bf16.gmra.mrb[196].mxu1 %v9126_v26  ;;  %v9150_v26 = vld [vmem:[%s9923_s4 + $0x2] ss:$0 sm:$0xff] }
 0x2e1   : > { %4441 = vmatprep.mubr.bf16.mxu1 %v9133_v20  ;;  %v2958_v18 = vadd.f32 %v8821_v56, %v9150_v26  ;;  %v10045_v56 = vld [vmem:[#allocation17_spill] sm:$0xff]  ;;  %v2961_v2 = vadd.f32 %v8832_v24, %v9150_v26  ;;  %v2966_v63 = vadd.f32 %v8834_v43, %v9150_v26 }
 0x2e6   : > { %v9113_v3 = vpop.f32.mrb[172].mxu1 }
 0x2e7   : > { %10035 = vst [vmem:[#allocation10_spill] sm:$0xff] %v9113_v3  ;;  %v9115_v15 = vpop.f32.mrb[173].mxu1  ;;  %v10041_v3 = vld [vmem:[#allocation16_spill] sm:$0xff] }
 0x2e8   : > { %10036 = vst [vmem:[#allocation11_spill] sm:$0xff] %v9115_v15  ;;  %v9117_v28 = vpop.f32.mrb[174].mxu1 }
 0x2e9   : > { %10037 = vst [vmem:[#allocation12_spill] sm:$0xff] %v9117_v28  ;;  %v9122_v57 = vpop.f32.mrb[175].mxu1  ;;  %v3638_v28 = vrot.slane %v10040_v62, 6 }
 0x2ea   : > { %10038 = vst [vmem:[#allocation41_spill] sm:$0xff] %v9122_v57  ;;  %v3639_v57 = vrot.slane %v10041_v3, 7 }
 0x2ec   : > { %v3640_v12 = vor.u32 %v3639_v57, %v3638_v28  ;;  %v9161_v28 = vld [vmem:[%s7649_s20 + $0x38] sm:$0xff] }
 0x2ee   : > { %v9154_v15 = vsel %vm9028_vm10, 0, %v3640_v12 }
 0x2ef   : > { %10042 = vst [vmem:[#allocation15_spill] sm:$0xff] %v9154_v15  ;;  %4442 = vmatmul.mubr.bf16.gmra.mrb[200].mxu1 %v9154_v15  ;;  %v7423_v15 = vld [vmem:[%s9921_s2 + $0x5a8] sm:$0xff]  }
 0x2f0   : > { %4449 = vmatprep.mubr.bf16.mxu1 %v9161_v28  ;;  %6715 = vmatpush3.bf16.msra.mxu1 %v7423_v15 }
 0x2f1   : > { %6716 = vmatprep.subr.bf16.mxu1 %v7426_v32 }
 0x2f4   : > { %6717 = vmatpush3.bf16.msra.mxu1 %v7427_v50 }
 0x2f9   : > { %v6368_v19 = vpop.f32.mrb[80].mxu0 }
 0x2fa   : > { %v6369_v57 = vpop.f32.mrb[81].mxu0 }
 0x2fb   : > { %v6370_v41 = vadd.f32 %v6369_v57, %v6368_v19  ;;  %v6371_v12 = vpop.f32.mrb[82].mxu0  ;;  %v3641_v19 = vrot.slane %v10045_v56, 6  ;;  %v10046_v57 = vld [vmem:[#allocation18_spill] sm:$0xff] }
 0x2fc   : > { %v6372_v13 = vpop.f32.mrb[83].mxu0  ;;  %v3642_v7 = vrot.slane %v10046_v57, 7 }
 0x2fd   : > { %v3055_v44 = vadd.f32 %v6370_v41, %v2958_v18  ;;  %v6373_v61 = vadd.f32 %v6372_v13, %v6371_v12  ;;  %v2969_v13 = vadd.f32 %v8841_v48, %v9150_v26  ;;  %v10050_v48 = vshll.u32 %v9038_v17, 16  ;;  %v7447_v12 = vld [vmem:[%s9921_s2 + $0x670] sm:$0xff]  }
 0x2fe   : > { %v3643_v34 = vor.u32 %v3642_v7, %v3641_v19  ;;  %v7430_v7 = vld [vmem:[%s9921_s2 + $0x5f8] sm:$0xff]  }
 0x2ff   : > { %v3058_v4 = vadd.f32 %v6373_v61, %v2961_v2  ;;  %v9185_v11 = vadd.f32 %v8892_v21, %v3055_v44  ;;  %v3665_v21 = vor.u32 %v9178_v25, %v9174_v38  ;;  %6718 = vmatprep.subr.bf16.mxu1 %v7430_v7  ;;  %v7436_v25 = vld [vmem:[%s9921_s2 + $0x650] sm:$0xff]  }
 0x300   : > { %v9195_v24 = vsel %vm9028_vm10, 0, %v3643_v34  ;;  %v7431_v34 = vld [vmem:[%s9921_s2 + $0x5b8] sm:$0xff]  }
 0x301   : > { %v9203_v61 = vadd.f32 %v8898_v52, %v3058_v4  ;;  %v6374_v44 = vpop.f32.mrb[84].mxu0  ;;  %4450 = vmatmul.mubr.bf16.gmra.mrb[204].mxu1 %v9195_v24  ;;  %v3672_v4 = vrot.slane %v10023_v35, 1  ;;  %v3673_v52 = vrot.slane %v10024_v1, 2  ;;  %v10049_v1 = vshrl.u32 %v9038_v17, 16 }
 0x302   : > { %v6375_v2 = vpop.f32.mrb[85].mxu0  ;;  %6719 = vmatpush3.bf16.msra.mxu1 %v7431_v34  ;;  %v3676_v17 = vrot.slane %v10031_v8, 2 }
 0x303   : > { %v6376_v41 = vadd.f32 %v6375_v2, %v6374_v44  ;;  %v6377_v15 = vpop.f32.mrb[86].mxu0  ;;  %v3674_v50 = vor.u32 %v3673_v52, %v3672_v4  ;;  %v9230_v44 = vrot.slane %v10049_v1, 1  ;;  %v9234_v2 = vrot.slane %v10050_v48, 2 }
 0x304   : > { %v6378_v18 = vpop.f32.mrb[87].mxu0  ;;  %v2982_v1 = vadd.f32 %v8853_v27, %v9150_v26 }
 0x305   : > { %v3063_v19 = vadd.f32 %v6376_v41, %v2966_v63  ;;  %v6379_v32 = vadd.f32 %v6378_v18, %v6377_v15  ;;  %v9225_v35 = vsel %vm9214_vm12, %v3674_v50, 0  ;;  %v3668_v41 = vor.u32 %v9234_v2, %v9230_v44  ;;  %v7439_v2 = vld [vmem:[%s9921_s2 + $0x618] sm:$0xff]  }
 0x306   : > { %4587 = vmatprep.mubr.bf16.mxu1 %v9225_v35  ;;  %v2974_v15 = vadd.f32 %v8844_v5, %v9150_v26  ;;  %v3675_v18 = vrot.slane %v10030_v55, 1 }
 0x307   : > { %v3066_v43 = vadd.f32 %v6379_v32, %v2969_v13  ;;  %v9221_v7 = vadd.f32 %v8900_v9, %v3063_v19  ;;  %v3699_v38 = vsel %vm9214_vm12, %v3668_v41, 0  ;;  %v7440_v41 = vld [vmem:[%s9921_s2 + $0x660] sm:$0xff]  }
 0x309   : > { %v9237_v34 = vadd.f32 %v8905_v49, %v3066_v43  ;;  %v6380_v63 = vpop.f32.mrb[88].mxu0  ;;  %4588 = vmatmul.mubr.bf16.vlgmr.msra.gmra.mrb[208].mxu1 %v9063_v0  ;;  %v2977_v49 = vadd.f32 %v8850_v39, %v9150_v26  ;;  %v3677_v0 = vor.u32 %v3676_v17, %v3675_v18 }
 0x30a   : > { %v6381_v9 = vpop.f32.mrb[89].mxu0 }
 0x30b   : > { %v6382_v4 = vadd.f32 %v6381_v9, %v6380_v63  ;;  %v6383_v52 = vpop.f32.mrb[90].mxu0  ;;  %v9253_v5 = vsel %vm9214_vm12, %v3677_v0, 0  ;;  %v3679_v9 = vrot.slane %v10034_v14, 2 }
 0x30c   : > { %v6384_v13 = vpop.f32.mrb[91].mxu0  ;;  %4595 = vmatprep.mubr.bf16.mxu1 %v9253_v5 }
 0x30d   : > { %v3071_v19 = vadd.f32 %v6382_v4, %v2974_v15  ;;  %v6385_v32 = vadd.f32 %v6384_v13, %v6383_v52  ;;  %v2985_v4 = vadd.f32 %v8859_v46, %v9150_v26  ;;  %v2990_v13 = vadd.f32 %v8861_v47, %v9150_v26 }
 0x30f   : > { %v3074_v50 = vadd.f32 %v6385_v32, %v2977_v49  ;;  %v9249_v43 = vadd.f32 %v8907_v6, %v3071_v19  ;;  %v3678_v6 = vrot.slane %v10033_v54, 1  ;;  %v3682_v32 = vrot.slane %v10041_v3, 2 }
 0x311   : > { %v9257_v55 = vadd.f32 %v8912_v23, %v3074_v50  ;;  %v6386_v8 = vpop.f32.mrb[92].mxu0  ;;  %4596 = vmatmul.mubr.bf16.gmra.mrb[212].mxu1 %v9082_v37  ;;  %v3680_v18 = vor.u32 %v3679_v9, %v3678_v6  ;;  %v2993_v50 = vadd.f32 %v8866_v29, %v9150_v26  ;;  %v3685_v9 = vrot.slane %v10046_v57, 2 }
 0x312   : > { %v6387_v39 = vpop.f32.mrb[93].mxu0 }
 0x313   : > { %v6388_v48 = vadd.f32 %v6387_v39, %v6386_v8  ;;  %v6389_v63 = vpop.f32.mrb[94].mxu0  ;;  %v9271_v27 = vsel %vm9214_vm12, %v3680_v18, 0 }
 0x314   : > { %v6390_v15 = vpop.f32.mrb[95].mxu0  ;;  %4603 = vmatprep.mubr.bf16.mxu1 %v9271_v27 }
 0x315   : > { %v3079_v52 = vadd.f32 %v6388_v48, %v2982_v1  ;;  %v6391_v23 = vadd.f32 %v6390_v15, %v6389_v63  ;;  %v2998_v48 = vadd.f32 %v8868_v22, %v9150_v26 }
 0x317   : > { %v3082_v17 = vadd.f32 %v6391_v23, %v2985_v4  ;;  %v9267_v37 = vadd.f32 %v8915_v40, %v3079_v52  ;;  %v3681_v40 = vrot.slane %v10040_v62, 1  ;;  %v3001_v4 = vadd.f32 %v8874_v16, %v9150_v26 }
 0x319   : > { %v9275_v54 = vadd.f32 %v8920_v58, %v3082_v17  ;;  %v6392_v14 = vpop.f32.mrb[96].mxu0  ;;  %4604 = vmatmul.mubr.bf16.gmra.mrb[216].mxu1 %v9102_v30  ;;  %v3683_v39 = vor.u32 %v3682_v32, %v3681_v40  ;;  %v10052_v40 = vld [vmem:[#allocation21_spill] sm:$0xff] }
 0x31a   : > { %v6393_v46 = vpop.f32.mrb[97].mxu0  ;;  %v3722_v32 = vrot.slane %v10052_v40, 2 }
 0x31b   : > { %v6394_v49 = vadd.f32 %v6393_v46, %v6392_v14  ;;  %v6395_v19 = vpop.f32.mrb[98].mxu0  ;;  %v9289_v47 = vsel %vm9214_vm12, %v3683_v39, 0 }
 0x31c   : > { %v6396_v0 = vpop.f32.mrb[99].mxu0  ;;  %4611 = vmatprep.mubr.bf16.mxu1 %v9289_v47 }
 0x31d   : > { %v3087_v8 = vadd.f32 %v6394_v49, %v2990_v13  ;;  %v6397_v58 = vadd.f32 %v6396_v0, %v6395_v19  ;;  %v10051_v49 = vld [vmem:[#allocation19_spill] sm:$0xff] }
 0x31e   : > { %v3721_v19 = vrot.slane %v10051_v49, 1 }
 0x31f   : > { %v3090_v1 = vadd.f32 %v6397_v58, %v2993_v50  ;;  %v9285_v30 = vadd.f32 %v8923_v59, %v3087_v8  ;;  %v3684_v59 = vrot.slane %v10045_v56, 1  ;;  %v7442_v56 = vld [vmem:[%s9921_s2 + $0x680] sm:$0xff]   ;;  %v7444_v58 = vld [vmem:[%s9921_s2 + $0x688] sm:$0xff]  }
 0x320   : > { %7056 = vmatprep.subr.bf16.mxu1 %v7442_v56  ;;  %v3723_v39 = vor.u32 %v3722_v32, %v3721_v19  ;;  %v10057_v32 = vld [vmem:[#allocation29_spill] sm:$0xff] }
 0x321   : > { %v9293_v62 = vadd.f32 %v8927_v51, %v3090_v1  ;;  %v6398_v3 = vpop.f32.mrb[100].mxu0  ;;  %4612 = vmatmul.mubr.bf16.gmra.mrb[220].mxu1 %v9133_v20  ;;  %v3686_v23 = vor.u32 %v3685_v9, %v3684_v59 }
 0x322   : > { %v6399_v29 = vpop.f32.mrb[101].mxu0  ;;  %7057 = vmatpush3.bf16.msra.mxu1 %v7442_v56 }
 0x323   : > { %v6400_v63 = vadd.f32 %v6399_v29, %v6398_v3  ;;  %v6401_v6 = vpop.f32.mrb[102].mxu0  ;;  %v9307_v22 = vsel %vm9214_vm12, %v3686_v23, 0  ;;  %7058 = vmatprep.subr.bf16.mxu1 %v7444_v58  ;;  %v9331_v3 = vsel %vm9214_vm12, %v3723_v39, 0 }
 0x324   : > { %v6402_v15 = vpop.f32.mrb[103].mxu0  ;;  %4619 = vmatprep.mubr.bf16.mxu1 %v9307_v22 }
 0x325   : > { %v3095_v52 = vadd.f32 %v6400_v63, %v2998_v48  ;;  %v6403_v51 = vadd.f32 %v6402_v15, %v6401_v6  ;;  %v9341_v63 = vld [vmem:[%s7649_s20 + $0x40] sm:$0xff]  ;;  %v3014_v6 = vadd.f32 %v8884_v36, %v9150_v26  ;;  %v10053_v15 = vld [vmem:[#allocation20_spill] sm:$0xff] }
 0x326   : > { %7059 = vmatpush3.bf16.msra.mxu1 %v7444_v58 }
 0x327   : > { %v3098_v18 = vadd.f32 %v6403_v51, %v3001_v4  ;;  %v9303_v17 = vadd.f32 %v8929_v53, %v3095_v52  ;;  %v3006_v53 = vadd.f32 %v8876_v42, %v9150_v26  ;;  %v3724_v4 = vrot.slane %v10053_v15, 1  ;;  %v10054_v52 = vld [vmem:[#allocation23_spill] sm:$0xff] }
 0x328   : > { %v3725_v51 = vrot.slane %v10054_v52, 2 }
 0x329   : > { %v9314_v57 = vadd.f32 %v8931_v31, %v3098_v18  ;;  %v6404_v16 = vpop.f32.mrb[104].mxu0  ;;  %4620 = vmatmul.mubr.bf16.gmra.mrb[224].mxu1 %v9161_v28  ;;  %v3009_v31 = vadd.f32 %v8882_v10, %v9150_v26  ;;  %v7446_v10 = vld [vmem:[%s9921_s2 + $0x690] sm:$0xff]  }
 0x32a   : > { %v6405_v14 = vpop.f32.mrb[105].mxu0  ;;  %4627 = vmatprep.mubr.bf16.mxu1 %v9331_v3  ;;  %7060 = vmatprep.subr.bf16.mxu1 %v7446_v10 }
 0x32b   : > { %v6406_v46 = vadd.f32 %v6405_v14, %v6404_v16  ;;  %v6407_v13 = vpop.f32.mrb[106].mxu0  ;;  %7061 = vmatpush3.bf16.msra.mxu1 %v7446_v10  ;;  %v7448_v14 = vld [vmem:[%s9921_s2 + $0x698] sm:$0xff]  }
 0x32c   : > { %v6408_v0 = vpop.f32.mrb[107].mxu0  ;;  %7062 = vmatprep.subr.bf16.mxu1 %v7448_v14 }
 0x32d   : > { %v3103_v50 = vadd.f32 %v6406_v46, %v3006_v53  ;;  %v6409_v8 = vadd.f32 %v6408_v0, %v6407_v13  ;;  %v3726_v53 = vor.u32 %v3725_v51, %v3724_v4  ;;  %v10056_v46 = vld [vmem:[#allocation28_spill] sm:$0xff] }
 0x32e   : > { %v7452_v4 = vld [vmem:[%s9921_s2 + $0x6a8] sm:$0xff]  }
 0x32f   : > { %v3106_v1 = vadd.f32 %v6409_v8, %v3009_v31  ;;  %v9327_v42 = vadd.f32 %v8948_v45, %v3103_v50  ;;  %v9358_v19 = vsel %vm9214_vm12, %v3726_v53, 0  ;;  %7063 = vmatpush3.bf16.msra.mxu1 %v7448_v14  ;;  %v9368_v50 = vld [vmem:[%s7649_s20 + $0x48] sm:$0xff] }
 0x331   : > { %v9338_v29 = vadd.f32 %v8950_v60, %v3106_v1  ;;  %v6410_v48 = vpop.f32.mrb[108].mxu0  ;;  %4628 = vmatmul.mubr.bf16.gmra.mrb[228].mxu1 %v9341_v63  ;;  %v10055_v60 = vld [vmem:[#allocation27_spill] sm:$0xff]  ;;  %v10058_v1 = vld [vmem:[#allocation22_spill] sm:$0xff] }
 0x332   : > { %v6411_v45 = vpop.f32.mrb[109].mxu0  ;;  %v3017_v18 = vadd.f32 %v10055_v60, %v9150_v26  ;;  %v7450_v26 = vld [vmem:[%s9921_s2 + $0x6a0] sm:$0xff]   ;;  %4635 = vmatprep.mubr.bf16.mxu1 %v9358_v19  ;;  %v3727_v10 = vrot.slane %v10058_v1, 1 }
 0x333   : > { %v6412_v59 = vadd.f32 %v6411_v45, %v6410_v48  ;;  %v6413_v9 = vpop.f32.mrb[110].mxu0  ;;  %7064 = vmatprep.subr.bf16.mxu1 %v7450_v26  ;;  %v10059_v48 = vld [vmem:[#allocation24_spill] sm:$0xff] }
 0x334   : > { %v6414_v23 = vpop.f32.mrb[111].mxu0  ;;  %v3728_v45 = vrot.slane %v10059_v48, 2  ;;  %7065 = vmatpush3.bf16.msra.mxu1 %v7450_v26 }
 0x335   : > { %v3111_v56 = vadd.f32 %v6412_v59, %v3014_v6  ;;  %v6415_v16 = vadd.f32 %v6414_v23, %v6413_v9  ;;  %v10060_v23 = vld [vmem:[#allocation31_spill] sm:$0xff]  ;;  %7066 = vmatprep.subr.bf16.mxu1 %v7452_v4 }
 0x336   : > { %v3729_v51 = vor.u32 %v3728_v45, %v3727_v10  ;;  %v7455_v45 = vld [vmem:[%s9921_s2 + $0x6b8] sm:$0xff]  }
 0x337   : > { %v3114_v36 = vadd.f32 %v6415_v16, %v3017_v18  ;;  %v9354_v13 = vadd.f32 %v10056_v46, %v3111_v56  ;;  %v7454_v16 = vld [vmem:[%s9921_s2 + $0x6b0] sm:$0xff]  }
 0x338   : > { %v3735_v56 = vsel %vm9214_vm12, %v3729_v51, 0  ;;  %7067 = vmatpush3.bf16.msra.mxu1 %v7452_v4  ;;  %v10063_v4 = vld [vmem:[#allocation32_spill] sm:$0xff] }
 0x339   : > { %v9365_v0 = vadd.f32 %v10057_v32, %v3114_v36  ;;  %v6496_v31 = vpop.f32.mrb[112].mxu0  ;;  %4636 = vmatmul.mubr.bf16.gmra.mrb[232].mxu1 %v9368_v50  ;;  %v9386_v36 = vld [vmem:[%s7649_s20 + $0x50] sm:$0xff]  ;;  %7068 = vmatprep.subr.bf16.mxu1 %v7454_v16 }
 0x33a   : > { %v6497_v8 = vpop.f32.mrb[113].mxu0  ;;  %4643 = vmatprep.mubr.bf16.mxu1 %v3735_v56 }
 0x33b   : > { %v6498_v58 = vadd.f32 %v6497_v8, %v6496_v31  ;;  %v6499_v39 = vpop.f32.mrb[114].mxu0 }
 0x33c   : > { %v6500_v6 = vpop.f32.mrb[115].mxu0  ;;  %7069 = vmatpush3.bf16.msra.mxu1 %v7454_v16 }
 0x33d   : > { %v6501_v59 = vadd.f32 %v6500_v6, %v6499_v39  ;;  %v3249_v9 = vadd.f32 %v6498_v58, %v9185_v11  ;;  %v10061_v11 = vld [vmem:[#allocation33_spill] sm:$0xff]  ;;  %v10062_v6 = vld [vmem:[#allocation30_spill] sm:$0xff]  ;;  %7070 = vmatprep.subr.bf16.mxu1 %v7455_v45 }
 0x33f   : > { %v3346_v60 = vadd.f32 %v10060_v23, %v3249_v9  ;;  %v3252_v18 = vadd.f32 %v6501_v59, %v9203_v61 }
 0x340   : > { %7071 = vmatpush3.bf16.msra.mxu1 %v7455_v45 }
 0x341   : > { %v3349_v14 = vadd.f32 %v10061_v11, %v3252_v18  ;;  %v6502_v53 = vpop.f32.mrb[116].mxu0  ;;  %4644 = vmatmul.mubr.bf16.gmra.mrb[236].mxu1 %v9386_v36  ;;  %v3408_v61 = vmax.f32 %v3346_v60, 0.0 }
 0x342   : > { %v6503_v46 = vpop.f32.mrb[117].mxu0  ;;  %7072 = vmatprep.mubr.bf16.mxu1 %v9289_v47 }
 0x343   : > { %v3409_v26 = vmax.f32 %v3349_v14, 0.0  ;;  %v6504_v32 = vadd.f32 %v6503_v46, %v6502_v53  ;;  %v6505_v31 = vpop.f32.mrb[118].mxu0  ;;  %v7401_v53 = vld [vmem:[%s9921_s2 + $0x500] sm:$0xff]  }
 0x344   : > { %v6506_v8 = vpop.f32.mrb[119].mxu0 }
 0x345   : > { %v3424_v58 = vpack.c.bf16 %v3409_v26, %v3408_v61  ;;  %v3257_v39 = vadd.f32 %v6504_v32, %v9221_v7  ;;  %v6507_v10 = vadd.f32 %v6506_v8, %v6505_v31  ;;  %v7404_v26 = vld [vmem:[%s9921_s2 + $0x548] sm:$0xff]   ;;  %v10064_v32 = vld [vmem:[#allocation35_spill] sm:$0xff] }
 0x347   : > { %v3354_v59 = vadd.f32 %v10062_v6, %v3257_v39  ;;  %v3260_v9 = vadd.f32 %v6507_v10, %v9237_v34  ;;  %7040 = vmatprep.mubr.bf16.mxu0 %v3424_v58  ;;  %v7405_v58 = vld [vmem:[%s9921_s2 + $0x508] sm:$0xff]   ;;  %v10065_v39 = vld [vmem:[#allocation37_spill] sm:$0xff] }
 0x349   : > { %v3357_v51 = vadd.f32 %v10063_v4, %v3260_v9  ;;  %v6508_v23 = vpop.f32.mrb[120].mxu0  ;;  %v3410_v18 = vmax.f32 %v3354_v59, 0.0  ;;  %7073 = vmatmul.mubr.bf16.vlgmr.msra.gmra.mrb[240].mxu1 %v9307_v22 }
 0x34a   : > { %v6509_v60 = vpop.f32.mrb[121].mxu0  ;;  %7076 = vmatprep.mubr.bf16.mxu1 %v9331_v3 }
 0x34b   : > { %v3411_v16 = vmax.f32 %v3357_v51, 0.0  ;;  %v6510_v11 = vadd.f32 %v6509_v60, %v6508_v23  ;;  %v6511_v7 = vpop.f32.mrb[122].mxu0  ;;  %v7409_v51 = vld [vmem:[%s9921_s2 + $0x510] sm:$0xff]  }
 0x34c   : > { %v6512_v14 = vpop.f32.mrb[123].mxu0 }
 0x34d   : > { %v3425_v34 = vpack.c.bf16 %v3411_v16, %v3410_v18  ;;  %v6513_v46 = vadd.f32 %v6512_v14, %v6511_v7  ;;  %v3265_v61 = vadd.f32 %v6510_v11, %v9249_v43  ;;  %v7408_v43 = vld [vmem:[%s9921_s2 + $0x550] sm:$0xff]   ;;  %v7412_v16 = vld [vmem:[%s9921_s2 + $0x558] sm:$0xff]  }
 0x34e   : > { %v10066_v11 = vld [vmem:[#allocation34_spill] sm:$0xff] }
 0x34f   : > { %v3362_v31 = vadd.f32 %v10064_v32, %v3265_v61  ;;  %7041 = vmatmul.mubr.bf16.vlgmr.msra.gmra.mrb[64].mxu0 %v3425_v34  ;;  %v3268_v8 = vadd.f32 %v6513_v46, %v9257_v55  ;;  %v7413_v14 = vld [vmem:[%s9921_s2 + $0x518] sm:$0xff]  }
 0x350   : > { %6641 = vmatpush3.bf16.msra.mxu0 %v7401_v53 }
 0x351   : > { %v3365_v3 = vadd.f32 %v10065_v39, %v3268_v8  ;;  %v6514_v10 = vpop.f32.mrb[124].mxu0  ;;  %6642 = vmatprep.subr.bf16.mxu0 %v7404_v26  ;;  %v3412_v6 = vmax.f32 %v3362_v31, 0.0  ;;  %7077 = vmatmul.mubr.bf16.gmra.mrb[244].mxu1 %v9358_v19  ;;  %v7417_v8 = vld [vmem:[%s9921_s2 + $0x520] sm:$0xff]  }
 0x352   : > { %v6515_v45 = vpop.f32.mrb[125].mxu0  ;;  %7080 = vmatprep.mubr.bf16.mxu1 %v3735_v56  ;;  %v10067_v56 = vld [vmem:[#allocation36_spill] sm:$0xff] }
 0x353   : > { %v3413_v59 = vmax.f32 %v3365_v3, 0.0  ;;  %v6516_v9 = vadd.f32 %v6515_v45, %v6514_v10  ;;  %v6517_v4 = vpop.f32.mrb[126].mxu0  ;;  %v7420_v10 = vld [vmem:[%s9921_s2 + $0x568] sm:$0xff]  }
 0x354   : > { %v6518_v55 = vpop.f32.mrb[127].mxu0  ;;  %6643 = vmatpush3.bf16.msra.mxu0 %v7405_v58 }
 0x355   : > { %v3426_v23 = vpack.c.bf16 %v3413_v59, %v3412_v6  ;;  %v3273_v60 = vadd.f32 %v6516_v9, %v9267_v37  ;;  %v6519_v18 = vadd.f32 %v6518_v55, %v6517_v4  ;;  %6644 = vmatprep.subr.bf16.mxu0 %v7408_v43  ;;  %v7416_v37 = vld [vmem:[%s9921_s2 + $0x560] sm:$0xff]   ;;  %v10068_v43 = vld [vmem:[#allocation8_spill] sm:$0xff] }
 0x356   : > { %v7421_v59 = vld [vmem:[%s9921_s2 + $0x528] sm:$0xff]   ;;  %v10069_v9 = vld [vmem:[#allocation39_spill] sm:$0xff] }
 0x357   : > { %v3370_v7 = vadd.f32 %v10066_v11, %v3273_v60  ;;  %v3276_v19 = vadd.f32 %v6519_v18, %v9275_v54  ;;  %7044 = vmatprep.mubr.bf16.mxu0 %v3426_v23 }
 0x358   : > { %6645 = vmatpush3.bf16.msra.mxu0 %v7409_v51 }
 0x359   : > { %v3373_v53 = vadd.f32 %v10067_v56, %v3276_v19  ;;  %v6520_v34 = vpop.f32.mrb[128].mxu0  ;;  %6646 = vmatprep.subr.bf16.mxu0 %v7412_v16  ;;  %v3414_v61 = vmax.f32 %v3370_v7, 0.0  ;;  %v7428_v56 = vld [vmem:[%s9921_s2 + $0x578] sm:$0xff]  }
 0x35a   : > { %v6521_v46 = vpop.f32.mrb[129].mxu0 }
 0x35b   : > { %v3415_v26 = vmax.f32 %v3373_v53, 0.0  ;;  %v6522_v32 = vadd.f32 %v6521_v46, %v6520_v34  ;;  %v6523_v31 = vpop.f32.mrb[130].mxu0  ;;  %v10070_v53 = vld [vmem:[#allocation25_spill] sm:$0xff] }
 0x35c   : > { %v6524_v54 = vpop.f32.mrb[131].mxu0  ;;  %6647 = vmatpush3.bf16.msra.mxu0 %v7413_v14  ;;  %v3761_v34 = vrot.slane %v10070_v53, 1 }
 0x35d   : > { %v6525_v58 = vadd.f32 %v6524_v54, %v6523_v31  ;;  %v3281_v39 = vadd.f32 %v6522_v32, %v9285_v30  ;;  %v3427_v3 = vpack.c.bf16 %v3415_v26, %v3414_v61  ;;  %6648 = vmatprep.subr.bf16.mxu0 %v7416_v37  ;;  %v7424_v30 = vld [vmem:[%s9921_s2 + $0x570] sm:$0xff]   ;;  %v10071_v37 = vld [vmem:[#allocation26_spill] sm:$0xff]  ;;  %v10072_v61 = vld [vmem:[#allocation7_spill] sm:$0xff] }
 0x35e   : > { %v3762_v46 = vrot.slane %v10071_v37, 2  ;;  %v10073_v54 = vld [vmem:[#allocation38_spill] sm:$0xff] }
 0x35f   : > { %v3378_v45 = vadd.f32 %v10068_v43, %v3281_v39  ;;  %7045 = vmatmul.mubr.bf16.gmra.mrb[68].mxu0 %v3427_v3  ;;  %v3284_v6 = vadd.f32 %v6525_v58, %v9293_v62  ;;  %v7425_v62 = vld [vmem:[%s9921_s2 + $0x530] sm:$0xff]   ;;  %v7432_v39 = vld [vmem:[%s9921_s2 + $0x640] sm:$0xff]  }
 0x360   : > { %6649 = vmatpush3.bf16.msra.mxu0 %v7417_v8  ;;  %v3763_v31 = vor.u32 %v3762_v46, %v3761_v34 }
 0x361   : > { %v3381_v4 = vadd.f32 %v10069_v9, %v3284_v6  ;;  %v6526_v55 = vpop.f32.mrb[132].mxu0  ;;  %6650 = vmatprep.subr.bf16.mxu0 %v7420_v10  ;;  %v3416_v23 = vmax.f32 %v3378_v45, 0.0 }
 0x362   : > { %v6527_v51 = vpop.f32.mrb[133].mxu0 }
 0x363   : > { %v3417_v60 = vmax.f32 %v3381_v4, 0.0  ;;  %v6528_v18 = vadd.f32 %v6527_v51, %v6526_v55  ;;  %v6529_v16 = vpop.f32.mrb[134].mxu0 }
 0x364   : > { %v6530_v11 = vpop.f32.mrb[135].mxu0  ;;  %6651 = vmatpush3.bf16.msra.mxu0 %v7421_v59 }
 0x365   : > { %v3428_v7 = vpack.c.bf16 %v3417_v60, %v3416_v23  ;;  %v3289_v19 = vadd.f32 %v6528_v18, %v9303_v17  ;;  %v6531_v14 = vadd.f32 %v6530_v11, %v6529_v16  ;;  %6652 = vmatprep.subr.bf16.mxu0 %v7424_v30  ;;  %v7429_v17 = vld [vmem:[%s9921_s2 + $0x538] sm:$0xff]   ;;  %v10074_v30 = vld [vmem:[#allocation11_spill] sm:$0xff]  ;;  %v10075_v11 = vld [vmem:[#allocation41_spill] sm:$0xff] }
 0x366   : > { %v9472_v60 = vld [vmem:[%s7649_s20 + $0x60] sm:$0xff] }
 0x367   : > { %v3386_v26 = vadd.f32 %v10072_v61, %v3289_v19  ;;  %v3292_v32 = vadd.f32 %v6531_v14, %v9314_v57  ;;  %7048 = vmatprep.mubr.bf16.mxu0 %v3428_v7  ;;  %v3773_v57 = vsel %vm9214_vm12, %v3763_v31, 0  ;;  %v3740_v18 = vshrl.u32 %v9472_v60, 16 }
 0x368   : > { %6653 = vmatpush3.bf16.msra.mxu0 %v7425_v62  ;;  %7081 = vmatmul.mubr.bf16.gmra.mrb[248].mxu1 %v3773_v57  ;;  %v3743_v16 = vshll.u32 %v9472_v60, 16 }
 0x369   : > { %v3389_v8 = vadd.f32 %v10073_v54, %v3292_v32  ;;  %v6532_v58 = vpop.f32.mrb[136].mxu0  ;;  %6654 = vmatprep.subr.bf16.mxu0 %v7428_v56  ;;  %v3418_v10 = vmax.f32 %v3386_v26, 0.0  ;;  %v9477_v14 = vrot.slane %v3740_v18, 6  ;;  %v9482_v26 = vld [vmem:[%s7649_s20 + $0x68] sm:$0xff] }
 0x36a   : > { %v6533_v3 = vpop.f32.mrb[137].mxu0  ;;  %v3751_v31 = vshll.u32 %v9482_v26, 16 }
 0x36b   : > { %v3419_v43 = vmax.f32 %v3389_v8, 0.0  ;;  %v6534_v45 = vadd.f32 %v6533_v3, %v6532_v58  ;;  %v6535_v6 = vpop.f32.mrb[138].mxu0  ;;  %v3765_v3 = vrot.slane %v3743_v16, 2 }
 0x36c   : > { %v6536_v59 = vpop.f32.mrb[139].mxu0  ;;  %6655 = vmatpush3.bf16.msra.mxu0 %v7429_v17  ;;  %v3748_v17 = vshrl.u32 %v9482_v26, 16 }
 0x36d   : > { %v6537_v9 = vadd.f32 %v6536_v59, %v6535_v6  ;;  %v3297_v4 = vadd.f32 %v6534_v45, %v9327_v42  ;;  %v3429_v55 = vpack.c.bf16 %v3419_v43, %v3418_v10  ;;  %6768 = vmatprep.subr.bf16.mxu0 %v7432_v39  ;;  %v9479_v42 = vrot.slane %v3743_v16, 7  ;;  %v10076_v43 = vld [vmem:[#allocation10_spill] sm:$0xff] }
 0x36e   : > { %v3764_v39 = vrot.slane %v3740_v18, 1  ;;  %v3767_v57 = vrot.slane %v3748_v17, 1  ;;  %v3768_v10 = vrot.slane %v3751_v31, 2 }
 0x36f   : > { %v3394_v51 = vadd.f32 %v10074_v30, %v3297_v4  ;;  %7049 = vmatmul.mubr.bf16.gmra.mrb[72].mxu0 %v3429_v55  ;;  %v3300_v23 = vadd.f32 %v6537_v9, %v9338_v29  ;;  %v3746_v32 = vor.u32 %v9479_v42, %v9477_v14  ;;  %v9491_v4 = vrot.slane %v3748_v17, 6  ;;  %v10077_v30 = vld [vmem:[#allocation12_spill] sm:$0xff] }
 0x370   : > { %v3766_v59 = vor.u32 %v3765_v3, %v3764_v39  ;;  %v3769_v9 = vor.u32 %v3768_v10, %v3767_v57  ;;  %v9493_v55 = vrot.slane %v3751_v31, 7  ;;  %v7437_v31 = vld [vmem:[%s9921_s2 + $0x610] sm:$0xff]   ;;  %v7441_v39 = vld [vmem:[%s9921_s2 + $0x620] sm:$0xff]   ;;  %v7443_v3 = vld [vmem:[%s9921_s2 + $0x668] sm:$0xff]  }
 0x371   : > { %v3397_v62 = vadd.f32 %v10075_v11, %v3300_v23  ;;  %v6538_v7 = vpop.f32.mrb[140].mxu0  ;;  %v3420_v56 = vmax.f32 %v3394_v51, 0.0  ;;  %v10083_v57 = vld [vmem:[#allocation15_spill] sm:$0xff]  ;;  %v7445_v10 = vld [vmem:[%s9921_s2 + $0x628] sm:$0xff]  }
 0x372   : > { %v6539_v19 = vpop.f32.mrb[141].mxu0  ;;  %v3775_v23 = vsel %vm9214_vm12, %v3769_v9, 0  ;;  %v3754_v18 = vor.u32 %v9493_v55, %v9491_v4  ;;  %v7451_v9 = vld [vmem:[%s9921_s2 + $0x678] sm:$0xff]  }
 0x373   : > { %v3421_v34 = vmax.f32 %v3397_v62, 0.0  ;;  %v6540_v46 = vadd.f32 %v6539_v19, %v6538_v7  ;;  %v6541_v61 = vpop.f32.mrb[142].mxu0  ;;  %v10078_v62 = vld [vmem:[#allocation40_spill] sm:$0xff]  ;;  %v3698_v7 = vsel %vm9214_vm12, %v3665_v21, 0  ;;  %v7433_v19 = vld [vmem:[%s9921_s2 + $0x600] sm:$0xff]   ;;  %v10080_v21 = vld [vmem:[#allocation14_spill] sm:$0xff] }
 0x374   : > { %v6542_v29 = vpop.f32.mrb[143].mxu0 }
 0x375   : > { %v3430_v54 = vpack.c.bf16 %v3421_v34, %v3420_v56  ;;  %v3305_v8 = vadd.f32 %v6540_v46, %v9354_v13  ;;  %v6543_v58 = vadd.f32 %v6542_v29, %v6541_v61  ;;  %v3774_v13 = vsel %vm9214_vm12, %v3766_v59, 0  ;;  %v7434_v56 = vld [vmem:[%s9921_s2 + $0x648] sm:$0xff]   ;;  %v10079_v34 = vld [vmem:[#allocation9_spill] sm:$0xff] }
 0x376   : > { %7084 = vmatprep.mubr.bf16.mxu1 %v3774_v13  ;;  %v7435_v46 = vld [vmem:[%s9921_s2 + $0x608] sm:$0xff]   ;;  %v3669_v61 = vrot.slane %v10080_v21, 1  ;;  %v10081_v29 = vld [vmem:[#allocation13_spill] sm:$0xff]  ;;  %v3707_v59 = vrot.slane %v10052_v40, 7 }
 0x377   : > { %v3402_v45 = vadd.f32 %v10076_v43, %v3305_v8  ;;  %v3308_v6 = vadd.f32 %v6543_v58, %v9365_v0  ;;  %7052 = vmatprep.mubr.bf16.mxu0 %v3430_v54  ;;  %7085 = vmatmul.mubr.bf16.gmra.mrb[252].mxu1 %v3775_v23  ;;  %v3670_v17 = vrot.slane %v10081_v29, 2  ;;  %v7438_v54 = vld [vmem:[%s9921_s2 + $0x658] sm:$0xff]   ;;  %v7449_v43 = vld [vmem:[%s9921_s2 + $0x630] sm:$0xff]  }
 0x378   : > { %v10082_v8 = vld [vmem:[#allocation42_spill] sm:$0xff] }
 0x379   : > { %v3405_v51 = vadd.f32 %v10077_v30, %v3308_v6  ;;  %v3422_v16 = vmax.f32 %v3402_v45, 0.0  ;;  %v3671_v44 = vor.u32 %v3670_v17, %v3669_v61  ;;  %v3706_v6 = vrot.slane %v10051_v49, 6  ;;  %v7453_v49 = vld [vmem:[%s9921_s2 + $0x638] sm:$0xff]  }
 0x37a   : > { %v3712_v61 = vrot.slane %v10058_v1, 6 }
 0x37b   : > { %v3423_v0 = vmax.f32 %v3405_v51, 0.0  ;;  %v3700_v58 = vsel %vm9214_vm12, %v3671_v44, 0 }
 0x37d   : > { %v3431_v11 = vpack.c.bf16 %v3423_v0, %v3422_v16  ;;  %v3708_v16 = vor.u32 %v3707_v59, %v3706_v6 }
 0x37f   : > { %7053 = vmatmul.mubr.bf16.gmra.mrb[76].mxu0 %v3431_v11  ;;  %v3718_v11 = vsel %vm9028_vm10, 0, %v3708_v16 }
 0x380   : > { %4490 = vmatprep.mubr.bf16.mxu0 %v10078_v62  ;;  %v3709_v62 = vrot.slane %v10053_v15, 6  ;;  %v3713_v15 = vrot.slane %v10059_v48, 7 }
 0x387   : > { %4491 = vmatmul.mubr.bf16.vlgmr.msra.gmra.mrb[144].mxu0 %v3698_v7 }
 0x388   : > { %6769 = vmatpush3.bf16.msra.mxu0 %v7433_v19  ;;  %4498 = vmatprep.mubr.bf16.mxu0 %v10079_v34 }
 0x389   : > { %6770 = vmatprep.subr.bf16.mxu0 %v7434_v56 }
 0x38b   : > { %v6592_v45 = vpop.f32.mrb[176].mxu1 }
 0x38c   : > { %6771 = vmatpush3.bf16.msra.mxu0 %v7435_v46  ;;  %v6593_v30 = vpop.f32.mrb[177].mxu1 }
 0x38d   : > { %6772 = vmatprep.subr.bf16.mxu0 %v7436_v25  ;;  %v9564_v51 = vadd.f32 %v6593_v30, %v6592_v45  ;;  %v6595_v13 = vpop.f32.mrb[178].mxu1 }
 0x38e   : > { %v6596_v23 = vpop.f32.mrb[179].mxu1 }
 0x38f   : > { %4499 = vmatmul.mubr.bf16.gmra.mrb[148].mxu0 %v3699_v38  ;;  %v9571_v40 = vadd.f32 %v6596_v23, %v6595_v13 }
 0x390   : > { %4506 = vmatprep.mubr.bf16.mxu0 %v10082_v8  ;;  %6773 = vmatpush3.bf16.msra.mxu0 %v7437_v31 }
 0x391   : > { %6774 = vmatprep.subr.bf16.mxu0 %v7438_v54  ;;  %v3714_v54 = vor.u32 %v3713_v15, %v3712_v61  ;;  %v3736_v61 = vrot.slane %v10070_v53, 6 }
 0x393   : > { %v6598_v0 = vpop.f32.mrb[180].mxu1  ;;  %v3720_v44 = vsel %vm9028_vm10, 0, %v3714_v54  ;;  %v7493_v54 = vld [vmem:[%s7649_s20 + $0x58] sm:$0xff] }
 0x394   : > { %6775 = vmatpush3.bf16.msra.mxu0 %v7439_v2  ;;  %v6599_v7 = vpop.f32.mrb[181].mxu1 }
 0x395   : > { %6776 = vmatprep.subr.bf16.mxu0 %v7440_v41  ;;  %v9577_v19 = vadd.f32 %v6599_v7, %v6598_v0  ;;  %v6601_v56 = vpop.f32.mrb[182].mxu1 }
 0x396   : > { %v6602_v34 = vpop.f32.mrb[183].mxu1 }
 0x397   : > { %4507 = vmatmul.mubr.bf16.gmra.mrb[152].mxu0 %v3700_v58  ;;  %v9580_v46 = vadd.f32 %v6602_v34, %v6601_v56 }
 0x398   : > { %4514 = vmatprep.mubr.bf16.mxu0 %v10083_v57  ;;  %6777 = vmatpush3.bf16.msra.mxu0 %v7441_v39 }
 0x399   : > { %6778 = vmatprep.subr.bf16.mxu0 %v7443_v3 }
 0x39b   : > { %v6604_v38 = vpop.f32.mrb[184].mxu1 }
 0x39c   : > { %6779 = vmatpush3.bf16.msra.mxu0 %v7445_v10 }
 0x39d   : > { %6780 = vmatprep.subr.bf16.mxu0 %v7447_v12 }
 0x39f   : > { %4515 = vmatmul.mubr.bf16.gmra.mrb[156].mxu0 %v9225_v35  ;;  %v3710_v35 = vrot.slane %v10054_v52, 7  ;;  %v6605_v52 = vpop.f32.mrb[185].mxu1 }
 0x3a0   : > { %4522 = vmatprep.mubr.bf16.mxu0 %v9195_v24  ;;  %6781 = vmatpush3.bf16.msra.mxu0 %v7449_v43  ;;  %v9586_v29 = vadd.f32 %v6605_v52, %v6604_v38  ;;  %v6607_v17 = vpop.f32.mrb[186].mxu1 }
 0x3a1   : > { %6782 = vmatprep.subr.bf16.mxu0 %v7451_v9  ;;  %v3711_v25 = vor.u32 %v3710_v35, %v3709_v62 }
 0x3a3   : > { %v3719_v21 = vsel %vm9028_vm10, 0, %v3711_v25 }
 0x3a4   : > { %6783 = vmatpush3.bf16.msra.mxu0 %v7453_v49 }
 0x3a5   : > { %7088 = vmatprep.subr.bf16.mxu0 %v7456_v33 }
 0x3a7   : > { %4523 = vmatmul.mubr.bf16.gmra.mrb[160].mxu0 %v9253_v5  ;;  %v6608_v5 = vpop.f32.mrb[187].mxu1 }
 0x3a8   : > { %4530 = vmatprep.mubr.bf16.mxu0 %v3718_v11  ;;  %v9589_v31 = vadd.f32 %v6608_v5, %v6607_v17  ;;  %v6610_v8 = vpop.f32.mrb[188].mxu1 }
 0x3a9   : > { %v6611_v2 = vpop.f32.mrb[189].mxu1 }
 0x3aa   : > { %v9593_v41 = vadd.f32 %v6611_v2, %v6610_v8  ;;  %v6613_v1 = vpop.f32.mrb[190].mxu1 }
 0x3ab   : > { %v6614_v48 = vpop.f32.mrb[191].mxu1 }
 0x3ac   : > { %v9596_v58 = vadd.f32 %v6614_v48, %v6613_v1 }
 0x3af   : > { %4531 = vmatmul.mubr.bf16.gmra.mrb[164].mxu0 %v9271_v27  ;;  %v6616_v27 = vpop.f32.mrb[192].mxu1 }
 0x3b0   : > { %4538 = vmatprep.mubr.bf16.mxu0 %v3719_v21  ;;  %v6617_v39 = vpop.f32.mrb[193].mxu1 }
 0x3b1   : > { %v9598_v3 = vadd.f32 %v6617_v39, %v6616_v27  ;;  %v6619_v10 = vpop.f32.mrb[194].mxu1 }
 0x3b2   : > { %v6620_v12 = vpop.f32.mrb[195].mxu1 }
 0x3b3   : > { %v9602_v43 = vadd.f32 %v6620_v12, %v6619_v10  ;;  %v6622_v45 = vpop.f32.mrb[196].mxu1 }
 0x3b4   : > { %v6623_v6 = vpop.f32.mrb[197].mxu1 }
 0x3b5   : > { %v9604_v59 = vadd.f32 %v6623_v6, %v6622_v45 }
 0x3b7   : > { %4539 = vmatmul.mubr.bf16.gmra.mrb[168].mxu0 %v9289_v47  ;;  %v6625_v47 = vpop.f32.mrb[198].mxu1 }
 0x3b8   : > { %4546 = vmatprep.mubr.bf16.mxu0 %v3720_v44  ;;  %v6626_v9 = vpop.f32.mrb[199].mxu1 }
 0x3b9   : > { %v9608_v30 = vadd.f32 %v6626_v9, %v6625_v47 }
 0x3bf   : > { %4547 = vmatmul.mubr.bf16.gmra.mrb[172].mxu0 %v9307_v22 }
 0x3c0   : > { %4684 = vmatprep.mubr.bf16.mxu0 %v9133_v20 }
 0x3c2   : > { %v6628_v13 = vpop.f32.mrb[200].mxu1 }
 0x3c3   : > { %v6629_v23 = vpop.f32.mrb[201].mxu1 }
 0x3c4   : > { %v9610_v22 = vadd.f32 %v6629_v23, %v6628_v13  ;;  %v6631_v49 = vpop.f32.mrb[202].mxu1 }
 0x3c5   : > { %v6632_v20 = vpop.f32.mrb[203].mxu1 }
 0x3c6   : > { %v9614_v16 = vadd.f32 %v6632_v20, %v6631_v49 }
 0x3c7   : > { %4685 = vmatmul.mubr.bf16.vlgmr.msra.gmra.mrb[176].mxu0 %v10083_v57 }
 0x3c8   : > { %4692 = vmatprep.mubr.bf16.mxu0 %v9161_v28  ;;  %7089 = vmatpush3.bf16.msra.mxu0 %v7456_v33  ;;  %v9730_v33 = vld [vmem:[%s9923_s4 + $0x3] ss:$0 sm:$0xff] }
 0x3cf   : > { %4693 = vmatmul.mubr.bf16.gmra.mrb[180].mxu0 %v9195_v24 }
 0x3d0   : > { %4700 = vmatprep.mubr.bf16.mxu0 %v9341_v63 }
 0x3d4   : > { %v6634_v0 = vpop.f32.mrb[204].mxu1 }
 0x3d5   : > { %v6635_v62 = vpop.f32.mrb[205].mxu1 }
 0x3d6   : > { %v9616_v57 = vadd.f32 %v6635_v62, %v6634_v0  ;;  %v6637_v35 = vpop.f32.mrb[206].mxu1 }
 0x3d7   : > { %4701 = vmatmul.mubr.bf16.gmra.mrb[184].mxu0 %v3718_v11  ;;  %v6638_v28 = vpop.f32.mrb[207].mxu1  ;;  %v3737_v11 = vrot.slane %v10071_v37, 7 }
 0x3d8   : > { %4708 = vmatprep.mubr.bf16.mxu0 %v9368_v50  ;;  %v9619_v7 = vadd.f32 %v6638_v28, %v6637_v35 }
 0x3d9   : > { %v3738_v8 = vor.u32 %v3737_v11, %v3736_v61 }
 0x3dc   : > { %v6720_v56 = vpop.f32.mrb[208].mxu1 }
 0x3dd   : > { %v6721_v34 = vpop.f32.mrb[209].mxu1 }
 0x3de   : > { %v9621_v24 = vadd.f32 %v6721_v34, %v6720_v56  ;;  %v6723_v25 = vpop.f32.mrb[210].mxu1 }
 0x3df   : > { %4709 = vmatmul.mubr.bf16.gmra.mrb[188].mxu0 %v3719_v21  ;;  %v6724_v63 = vpop.f32.mrb[211].mxu1 }
 0x3e0   : > { %4716 = vmatprep.mubr.bf16.mxu0 %v9386_v36  ;;  %v9624_v38 = vadd.f32 %v6724_v63, %v6723_v25  ;;  %v3758_v36 = vsel %vm9028_vm10, 0, %v3738_v8  ;;  %v7457_v25 = vld [vmem:[%s9922_s3 + $0xc8] sm:$0xff]  }
 0x3e1   : > { %7090 = vmatprep.subr.bf16.mxu0 %v7457_v25 }
 0x3e2   : > { %7091 = vmatpush3.bf16.msra.mxu0 %v7457_v25 }
 0x3e4   : > { %v6726_v50 = vpop.f32.mrb[212].mxu1 }
 0x3e5   : > { %v6727_v15 = vpop.f32.mrb[213].mxu1 }
 0x3e6   : > { %v9628_v52 = vadd.f32 %v6727_v15, %v6726_v50  ;;  %v6729_v17 = vpop.f32.mrb[214].mxu1  ;;  %v7458_v15 = vld [vmem:[%s9922_s3 + $0xd0] sm:$0xff]  }
 0x3e7   : > { %4717 = vmatmul.mubr.bf16.gmra.mrb[192].mxu0 %v3720_v44  ;;  %v6730_v5 = vpop.f32.mrb[215].mxu1  ;;  %v3759_v44 = vsel %vm9028_vm10, 0, %v3746_v32  ;;  %7092 = vmatprep.subr.bf16.mxu0 %v7458_v15 }
 0x3e8   : > { %4724 = vmatprep.mubr.bf16.mxu0 %v7493_v54  ;;  %v9631_v21 = vadd.f32 %v6730_v5, %v6729_v17  ;;  %7093 = vmatpush3.bf16.msra.mxu0 %v7458_v15  ;;  %v7459_v54 = vld [vmem:[%s9922_s3 + $0xd8] sm:$0xff]  }
 0x3e9   : > { %7094 = vmatprep.subr.bf16.mxu0 %v7459_v54 }
 0x3ec   : > { %v6732_v2 = vpop.f32.mrb[216].mxu1  ;;  %7095 = vmatpush3.bf16.msra.mxu0 %v7459_v54 }
 0x3ed   : > { %v6733_v1 = vpop.f32.mrb[217].mxu1 }
 0x3ee   : > { %v9635_v53 = vadd.f32 %v6733_v1, %v6732_v2  ;;  %v6735_v37 = vpop.f32.mrb[218].mxu1 }
 0x3ef   : > { %4725 = vmatmul.mubr.bf16.gmra.mrb[196].mxu0 %v3758_v36  ;;  %v6736_v48 = vpop.f32.mrb[219].mxu1  ;;  %v7460_v36 = vld [vmem:[%s9922_s3 + $0xe0] sm:$0xff]  }
 0x3f0   : > { %4732 = vmatprep.mubr.bf16.mxu0 %v9472_v60  ;;  %v9638_v27 = vadd.f32 %v6736_v48, %v6735_v37  ;;  %v3760_v60 = vsel %vm9028_vm10, 0, %v3754_v18  ;;  %7096 = vmatprep.subr.bf16.mxu0 %v7460_v36  ;;  %v7461_v48 = vld [vmem:[%s9922_s3 + $0xe8] sm:$0xff]  }
 0x3f1   : > { %7097 = vmatpush3.bf16.msra.mxu0 %v7460_v36 }
 0x3f2   : > { %7098 = vmatprep.subr.bf16.mxu0 %v7461_v48 }
 0x3f4   : > { %v6738_v39 = vpop.f32.mrb[220].mxu1 }
 0x3f5   : > { %v6739_v10 = vpop.f32.mrb[221].mxu1  ;;  %7099 = vmatpush3.bf16.msra.mxu0 %v7461_v48 }
 0x3f6   : > { %v9645_v12 = vadd.f32 %v6739_v10, %v6738_v39  ;;  %v6741_v45 = vpop.f32.mrb[222].mxu1  ;;  %v7463_v39 = vld [vmem:[%s9922_s3 + $0xf8] sm:$0xff]  }
 0x3f7   : > { %4733 = vmatmul.mubr.bf16.gmra.mrb[200].mxu0 %v3759_v44  ;;  %v6742_v6 = vpop.f32.mrb[223].mxu1  ;;  %v7462_v44 = vld [vmem:[%s9922_s3 + $0xf0] sm:$0xff]  }
 0x3f8   : > { %4740 = vmatprep.mubr.bf16.mxu0 %v9482_v26  ;;  %v9648_v47 = vadd.f32 %v6742_v6, %v6741_v45  ;;  %7100 = vmatprep.subr.bf16.mxu0 %v7462_v44 }
 0x3f9   : > { %7101 = vmatpush3.bf16.msra.mxu0 %v7462_v44 }
 0x3fa   : > { %7102 = vmatprep.subr.bf16.mxu0 %v7463_v39 }
 0x3fc   : > { %v6744_v14 = vpop.f32.mrb[224].mxu1 }
 0x3fd   : > { %v6745_v42 = vpop.f32.mrb[225].mxu1  ;;  %7103 = vmatpush3.bf16.msra.mxu0 %v7463_v39 }
 0x3fe   : > { %v9655_v32 = vadd.f32 %v6745_v42, %v6744_v14  ;;  %v6747_v9 = vpop.f32.mrb[226].mxu1 }
 0x3ff   : > { %4741 = vmatmul.mubr.bf16.gmra.mrb[204].mxu0 %v3760_v60  ;;  %v6748_v13 = vpop.f32.mrb[227].mxu1 }
 0x400   : > { %v9657_v23 = vadd.f32 %v6748_v13, %v6747_v9 }
 0x404   : > { %v6750_v49 = vpop.f32.mrb[228].mxu1 }
 0x405   : > { %v6751_v20 = vpop.f32.mrb[229].mxu1 }
 0x406   : > { %v9659_v26 = vadd.f32 %v6751_v20, %v6750_v49  ;;  %v6753_v0 = vpop.f32.mrb[230].mxu1 }
 0x407   : > { %v6754_v62 = vpop.f32.mrb[231].mxu1 }
 0x408   : > { %v9661_v35 = vadd.f32 %v6754_v62, %v6753_v0 }
 0x40c   : > { %v6756_v4 = vpop.f32.mrb[232].mxu1 }
 0x40d   : > { %v6757_v55 = vpop.f32.mrb[233].mxu1 }
 0x40e   : > { %v9666_v18 = vadd.f32 %v6757_v55, %v6756_v4  ;;  %v6759_v28 = vpop.f32.mrb[234].mxu1 }
 0x40f   : > { %v6760_v56 = vpop.f32.mrb[235].mxu1 }
 0x410   : > { %v9668_v34 = vadd.f32 %v6760_v56, %v6759_v28  ;;  %v4396_v28 = vadd.f32 %v9564_v51, %v9730_v33  ;;  %v4404_v51 = vadd.f32 %v9577_v19, %v9730_v33  ;;  %v4412_v19 = vadd.f32 %v9586_v29, %v9730_v33 }
 0x411   : > { %v4420_v29 = vadd.f32 %v9593_v41, %v9730_v33  ;;  %v4428_v41 = vadd.f32 %v9598_v3, %v9730_v33  ;;  %v4436_v3 = vadd.f32 %v9604_v59, %v9730_v33  ;;  %v4444_v59 = vadd.f32 %v9610_v22, %v9730_v33 }
 0x412   : > { %v4452_v22 = vadd.f32 %v9616_v57, %v9730_v33 }
 0x414   : > { %v6762_v63 = vpop.f32.mrb[236].mxu1 }
 0x415   : > { %v6763_v61 = vpop.f32.mrb[237].mxu1 }
 0x416   : > { %v9673_v11 = vadd.f32 %v6763_v61, %v6762_v63  ;;  %v6765_v50 = vpop.f32.mrb[238].mxu1  ;;  %v4399_v61 = vadd.f32 %v9571_v40, %v9730_v33  ;;  %v4407_v40 = vadd.f32 %v9580_v46, %v9730_v33  ;;  %v4415_v46 = vadd.f32 %v9589_v31, %v9730_v33 }
 0x417   : > { %v6766_v17 = vpop.f32.mrb[239].mxu1  ;;  %v4423_v31 = vadd.f32 %v9596_v58, %v9730_v33  ;;  %v4431_v58 = vadd.f32 %v9602_v43, %v9730_v33  ;;  %v4439_v43 = vadd.f32 %v9608_v30, %v9730_v33  ;;  %v4447_v30 = vadd.f32 %v9614_v16, %v9730_v33 }
 0x418   : > { %v9678_v5 = vadd.f32 %v6766_v17, %v6765_v50  ;;  %v4455_v16 = vadd.f32 %v9619_v7, %v9730_v33 }
 0x41c   : > { %v9683_v8 = vpop.f32.mrb[240].mxu1 }
 0x41d   : > { %v9688_v2 = vpop.f32.mrb[241].mxu1 }
 0x41e   : > { %v9690_v1 = vpop.f32.mrb[242].mxu1 }
 0x41f   : > { %v9692_v37 = vpop.f32.mrb[243].mxu1 }
 0x424   : > { %v9703_v10 = vpop.f32.mrb[244].mxu1 }
 0x425   : > { %v9705_v45 = vpop.f32.mrb[245].mxu1 }
 0x426   : > { %v9707_v6 = vpop.f32.mrb[246].mxu1 }
 0x427   : > { %v9709_v60 = vpop.f32.mrb[247].mxu1 }
 0x43b   : > { %v9711_v14 = vpop.f32.mrb[248].mxu1 }
 0x43c   : > { %v9713_v42 = vpop.f32.mrb[249].mxu1 }
 0x43d   : > { %v9715_v9 = vpop.f32.mrb[250].mxu1 }
 0x43e   : > { %v9717_v13 = vpop.f32.mrb[251].mxu1 }
 0x44a   : > { %v9719_v49 = vpop.f32.mrb[252].mxu1 }
 0x44b   : > { %v9721_v20 = vpop.f32.mrb[253].mxu1 }
 0x44c   : > { %v9723_v0 = vpop.f32.mrb[254].mxu1 }
 0x44d   : > { %v9725_v62 = vpop.f32.mrb[255].mxu1 }
 0x45a   : > { %v6656_v4 = vpop.f32.mrb[144].mxu0 }
 0x45b   : > { %v6657_v55 = vpop.f32.mrb[145].mxu0 }
 0x45c   : > { %v6658_v56 = vadd.f32 %v6657_v55, %v6656_v4  ;;  %v6659_v25 = vpop.f32.mrb[146].mxu0 }
 0x45d   : > { %v6660_v63 = vpop.f32.mrb[147].mxu0 }
 0x45e   : > { %v4493_v50 = vadd.f32 %v6658_v56, %v4396_v28  ;;  %v6661_v15 = vadd.f32 %v6660_v63, %v6659_v25 }
 0x460   : > { %v4496_v17 = vadd.f32 %v6661_v15, %v4399_v61  ;;  %v9737_v54 = vadd.f32 %v9621_v24, %v4493_v50 }
 0x462   : > { %v9740_v36 = vadd.f32 %v9624_v38, %v4496_v17  ;;  %v6662_v48 = vpop.f32.mrb[148].mxu0 }
 0x463   : > { %v6663_v44 = vpop.f32.mrb[149].mxu0 }
 0x464   : > { %v6664_v39 = vadd.f32 %v6663_v44, %v6662_v48  ;;  %v6665_v4 = vpop.f32.mrb[150].mxu0 }
 0x465   : > { %v6666_v55 = vpop.f32.mrb[151].mxu0 }
 0x466   : > { %v4501_v28 = vadd.f32 %v6664_v39, %v4404_v51  ;;  %v6667_v56 = vadd.f32 %v6666_v55, %v6665_v4 }
 0x468   : > { %v4504_v25 = vadd.f32 %v6667_v56, %v4407_v40  ;;  %v9747_v24 = vadd.f32 %v9628_v52, %v4501_v28 }
 0x46a   : > { %v9750_v38 = vadd.f32 %v9631_v21, %v4504_v25  ;;  %v6668_v63 = vpop.f32.mrb[152].mxu0 }
 0x46b   : > { %v6669_v61 = vpop.f32.mrb[153].mxu0 }
 0x46c   : > { %v6670_v50 = vadd.f32 %v6669_v61, %v6668_v63  ;;  %v6671_v15 = vpop.f32.mrb[154].mxu0 }
 0x46d   : > { %v6672_v17 = vpop.f32.mrb[155].mxu0 }
 0x46e   : > { %v4509_v48 = vadd.f32 %v6670_v50, %v4412_v19  ;;  %v6673_v44 = vadd.f32 %v6672_v17, %v6671_v15 }
 0x470   : > { %v4512_v51 = vadd.f32 %v6673_v44, %v4415_v46  ;;  %v9757_v52 = vadd.f32 %v9635_v53, %v4509_v48 }
 0x472   : > { %v9760_v21 = vadd.f32 %v9638_v27, %v4512_v51  ;;  %v6674_v39 = vpop.f32.mrb[156].mxu0 }
 0x473   : > { %v6675_v4 = vpop.f32.mrb[157].mxu0 }
 0x474   : > { %v6676_v55 = vadd.f32 %v6675_v4, %v6674_v39  ;;  %v6677_v40 = vpop.f32.mrb[158].mxu0 }
 0x475   : > { %v6678_v28 = vpop.f32.mrb[159].mxu0 }
 0x476   : > { %v4517_v56 = vadd.f32 %v6676_v55, %v4420_v29  ;;  %v6679_v25 = vadd.f32 %v6678_v28, %v6677_v40 }
 0x478   : > { %v4520_v63 = vadd.f32 %v6679_v25, %v4423_v31  ;;  %v9767_v53 = vadd.f32 %v9645_v12, %v4517_v56 }
 0x47a   : > { %v9770_v27 = vadd.f32 %v9648_v47, %v4520_v63  ;;  %v6680_v61 = vpop.f32.mrb[160].mxu0 }
 0x47b   : > { %v6681_v19 = vpop.f32.mrb[161].mxu0 }
 0x47c   : > { %v6682_v50 = vadd.f32 %v6681_v19, %v6680_v61  ;;  %v6683_v15 = vpop.f32.mrb[162].mxu0 }
 0x47d   : > { %v6684_v17 = vpop.f32.mrb[163].mxu0 }
 0x47e   : > { %v4525_v46 = vadd.f32 %v6682_v50, %v4428_v41  ;;  %v6685_v48 = vadd.f32 %v6684_v17, %v6683_v15 }
 0x480   : > { %v4528_v44 = vadd.f32 %v6685_v48, %v4431_v58  ;;  %v9777_v12 = vadd.f32 %v9655_v32, %v4525_v46 }
 0x482   : > { %v9780_v47 = vadd.f32 %v9657_v23, %v4528_v44  ;;  %v6686_v51 = vpop.f32.mrb[164].mxu0 }
 0x483   : > { %v6687_v39 = vpop.f32.mrb[165].mxu0 }
 0x484   : > { %v6688_v4 = vadd.f32 %v6687_v39, %v6686_v51  ;;  %v6689_v29 = vpop.f32.mrb[166].mxu0 }
 0x485   : > { %v6690_v55 = vpop.f32.mrb[167].mxu0 }
 0x486   : > { %v4533_v40 = vadd.f32 %v6688_v4, %v4436_v3  ;;  %v6691_v28 = vadd.f32 %v6690_v55, %v6689_v29 }
 0x488   : > { %v4536_v31 = vadd.f32 %v6691_v28, %v4439_v43  ;;  %v9787_v32 = vadd.f32 %v9659_v26, %v4533_v40 }
 0x48a   : > { %v9790_v23 = vadd.f32 %v9661_v35, %v4536_v31  ;;  %v6692_v56 = vpop.f32.mrb[168].mxu0 }
 0x48b   : > { %v6693_v25 = vpop.f32.mrb[169].mxu0 }
 0x48c   : > { %v6694_v63 = vadd.f32 %v6693_v25, %v6692_v56  ;;  %v6695_v61 = vpop.f32.mrb[170].mxu0 }
 0x48d   : > { %v6696_v19 = vpop.f32.mrb[171].mxu0 }
 0x48e   : > { %v4541_v41 = vadd.f32 %v6694_v63, %v4444_v59  ;;  %v6697_v50 = vadd.f32 %v6696_v19, %v6695_v61 }
 0x490   : > { %v4544_v15 = vadd.f32 %v6697_v50, %v4447_v30  ;;  %v9797_v26 = vadd.f32 %v9666_v18, %v4541_v41 }
 0x492   : > { %v9800_v35 = vadd.f32 %v9668_v34, %v4544_v15  ;;  %v6698_v17 = vpop.f32.mrb[172].mxu0 }
 0x493   : > { %v6699_v58 = vpop.f32.mrb[173].mxu0 }
 0x494   : > { %v6700_v46 = vadd.f32 %v6699_v58, %v6698_v17  ;;  %v6701_v48 = vpop.f32.mrb[174].mxu0 }
 0x495   : > { %v6702_v44 = vpop.f32.mrb[175].mxu0 }
 0x496   : > { %v4549_v51 = vadd.f32 %v6700_v46, %v4452_v22  ;;  %v6703_v39 = vadd.f32 %v6702_v44, %v6701_v48 }
 0x498   : > { %v4552_v3 = vadd.f32 %v6703_v39, %v4455_v16  ;;  %v9807_v18 = vadd.f32 %v9673_v11, %v4549_v51 }
 0x49a   : > { %v9810_v34 = vadd.f32 %v9678_v5, %v4552_v3  ;;  %v6784_v4 = vpop.f32.mrb[176].mxu0 }
 0x49b   : > { %v6785_v29 = vpop.f32.mrb[177].mxu0 }
 0x49c   : > { %v6786_v55 = vadd.f32 %v6785_v29, %v6784_v4  ;;  %v6787_v43 = vpop.f32.mrb[178].mxu0 }
 0x49d   : > { %v6788_v57 = vpop.f32.mrb[179].mxu0 }
 0x49e   : > { %v6789_v40 = vadd.f32 %v6788_v57, %v6787_v43  ;;  %v4687_v28 = vadd.f32 %v6786_v55, %v9737_v54 }
 0x4a0   : > { %v4784_v31 = vadd.f32 %v9688_v2, %v4687_v28  ;;  %v4690_v7 = vadd.f32 %v6789_v40, %v9740_v36 }
 0x4a2   : > { %v4787_v33 = vadd.f32 %v9692_v37, %v4690_v7  ;;  %v6790_v56 = vpop.f32.mrb[180].mxu0  ;;  %v4846_v25 = vmax.f32 %v4784_v31, 0.0 }
 0x4a3   : > { %v6791_v11 = vpop.f32.mrb[181].mxu0 }
 0x4a4   : > { %v4847_v59 = vmax.f32 %v4787_v33, 0.0  ;;  %v6792_v5 = vadd.f32 %v6791_v11, %v6790_v56  ;;  %v6793_v63 = vpop.f32.mrb[182].mxu0 }
 0x4a5   : > { %v6794_v61 = vpop.f32.mrb[183].mxu0 }
 0x4a6   : > { %v4862_v19 = vpack.c.bf16 %v4847_v59, %v4846_v25  ;;  %v4695_v30 = vadd.f32 %v6792_v5, %v9747_v24  ;;  %v6795_v41 = vadd.f32 %v6794_v61, %v6793_v63 }
 0x4a8   : > { %v4792_v50 = vadd.f32 %v9683_v8, %v4695_v30  ;;  %v4698_v54 = vadd.f32 %v6795_v41, %v9750_v38  ;;  %7104 = vmatprep.mubr.bf16.mxu0 %v4862_v19 }
 0x4aa   : > { %v4795_v2 = vadd.f32 %v9690_v1, %v4698_v54  ;;  %v6796_v36 = vpop.f32.mrb[184].mxu0  ;;  %v4848_v15 = vmax.f32 %v4792_v50, 0.0 }
 0x4ab   : > { %v6797_v37 = vpop.f32.mrb[185].mxu0 }
 0x4ac   : > { %v4849_v17 = vmax.f32 %v4795_v2, 0.0  ;;  %v6798_v58 = vadd.f32 %v6797_v37, %v6796_v36  ;;  %v6799_v22 = vpop.f32.mrb[186].mxu0 }
 0x4ad   : > { %v6800_v46 = vpop.f32.mrb[187].mxu0 }
 0x4ae   : > { %v4863_v48 = vpack.c.bf16 %v4849_v17, %v4848_v15  ;;  %v6801_v44 = vadd.f32 %v6800_v46, %v6799_v22  ;;  %v4703_v16 = vadd.f32 %v6798_v58, %v9757_v52 }
 0x4b0   : > { %v4800_v24 = vadd.f32 %v9705_v45, %v4703_v16  ;;  %7105 = vmatmul.mubr.bf16.vlgmr.msra.gmra.mrb[64].mxu0 %v4863_v48  ;;  %v4706_v8 = vadd.f32 %v6801_v44, %v9760_v21 }
 0x4b2   : > { %v4803_v38 = vadd.f32 %v9709_v60, %v4706_v8  ;;  %v6802_v51 = vpop.f32.mrb[188].mxu0  ;;  %v4850_v39 = vmax.f32 %v4800_v24, 0.0 }
 0x4b3   : > { %v6803_v1 = vpop.f32.mrb[189].mxu0 }
 0x4b4   : > { %v4851_v3 = vmax.f32 %v4803_v38, 0.0  ;;  %v6804_v4 = vadd.f32 %v6803_v1, %v6802_v51  ;;  %v6805_v29 = vpop.f32.mrb[190].mxu0 }
 0x4b5   : > { %v6806_v55 = vpop.f32.mrb[191].mxu0 }
 0x4b6   : > { %v4864_v43 = vpack.c.bf16 %v4851_v3, %v4850_v39  ;;  %v4711_v57 = vadd.f32 %v6804_v4, %v9767_v53  ;;  %v6807_v40 = vadd.f32 %v6806_v55, %v6805_v29 }
 0x4b8   : > { %v4808_v52 = vadd.f32 %v9703_v10, %v4711_v57  ;;  %v4714_v45 = vadd.f32 %v6807_v40, %v9770_v27  ;;  %7108 = vmatprep.mubr.bf16.mxu0 %v4864_v43  ;;  %v9849_v57 = vld [vmem:[%s10084_s16] ss:$0 sm:$0xff] }
 0x4ba   : > { %v4811_v21 = vadd.f32 %v9707_v6, %v4714_v45  ;;  %v6808_v28 = vpop.f32.mrb[192].mxu0  ;;  %v4852_v31 = vmax.f32 %v4808_v52, 0.0 }
 0x4bb   : > { %v6809_v60 = vpop.f32.mrb[193].mxu0 }
 0x4bc   : > { %v4853_v7 = vmax.f32 %v4811_v21, 0.0  ;;  %v6810_v33 = vadd.f32 %v6809_v60, %v6808_v28  ;;  %v6811_v56 = vpop.f32.mrb[194].mxu0 }
 0x4bd   : > { %v6812_v11 = vpop.f32.mrb[195].mxu0 }
 0x4be   : > { %v6813_v25 = vadd.f32 %v6812_v11, %v6811_v56  ;;  %v4719_v59 = vadd.f32 %v6810_v33, %v9777_v12  ;;  %v4865_v5 = vpack.c.bf16 %v4853_v7, %v4852_v31 }
 0x4c0   : > { %v4816_v53 = vadd.f32 %v9713_v42, %v4719_v59  ;;  %7109 = vmatmul.mubr.bf16.gmra.mrb[68].mxu0 %v4865_v5  ;;  %v4722_v10 = vadd.f32 %v6813_v25, %v9780_v47 }
 0x4c2   : > { %v4819_v27 = vadd.f32 %v9717_v13, %v4722_v10  ;;  %v6814_v63 = vpop.f32.mrb[196].mxu0  ;;  %v4854_v61 = vmax.f32 %v4816_v53, 0.0 }
 0x4c3   : > { %v6815_v6 = vpop.f32.mrb[197].mxu0 }
 0x4c4   : > { %v4855_v19 = vmax.f32 %v4819_v27, 0.0  ;;  %v6816_v30 = vadd.f32 %v6815_v6, %v6814_v63  ;;  %v6817_v41 = vpop.f32.mrb[198].mxu0 }
 0x4c5   : > { %v6818_v50 = vpop.f32.mrb[199].mxu0 }
 0x4c6   : > { %v4866_v54 = vpack.c.bf16 %v4855_v19, %v4854_v61  ;;  %v4727_v2 = vadd.f32 %v6816_v30, %v9787_v32  ;;  %v6819_v36 = vadd.f32 %v6818_v50, %v6817_v41 }
 0x4c8   : > { %v4824_v12 = vadd.f32 %v9711_v14, %v4727_v2  ;;  %v4730_v42 = vadd.f32 %v6819_v36, %v9790_v23  ;;  %7112 = vmatprep.mubr.bf16.mxu0 %v4866_v54 }
 0x4ca   : > { %v4827_v47 = vadd.f32 %v9715_v9, %v4730_v42  ;;  %v6820_v37 = vpop.f32.mrb[200].mxu0  ;;  %v4856_v15 = vmax.f32 %v4824_v12, 0.0 }
 0x4cb   : > { %v6821_v13 = vpop.f32.mrb[201].mxu0 }
 0x4cc   : > { %v4857_v17 = vmax.f32 %v4827_v47, 0.0  ;;  %v6822_v58 = vadd.f32 %v6821_v13, %v6820_v37  ;;  %v6823_v22 = vpop.f32.mrb[202].mxu0 }
 0x4cd   : > { %v6824_v46 = vpop.f32.mrb[203].mxu0 }
 0x4ce   : > { %v6825_v48 = vadd.f32 %v6824_v46, %v6823_v22  ;;  %v4735_v44 = vadd.f32 %v6822_v58, %v9797_v26  ;;  %v4867_v16 = vpack.c.bf16 %v4857_v17, %v4856_v15 }
 0x4d0   : > { %v4832_v32 = vadd.f32 %v9721_v20, %v4735_v44  ;;  %7113 = vmatmul.mubr.bf16.gmra.mrb[72].mxu0 %v4867_v16  ;;  %v4738_v14 = vadd.f32 %v6825_v48, %v9800_v35 }
 0x4d2   : > { %v4835_v23 = vadd.f32 %v9725_v62, %v4738_v14  ;;  %v6826_v24 = vpop.f32.mrb[204].mxu0  ;;  %v4858_v8 = vmax.f32 %v4832_v32, 0.0 }
 0x4d3   : > { %v6827_v9 = vpop.f32.mrb[205].mxu0 }
 0x4d4   : > { %v4859_v38 = vmax.f32 %v4835_v23, 0.0  ;;  %v6828_v51 = vadd.f32 %v6827_v9, %v6826_v24  ;;  %v6829_v1 = vpop.f32.mrb[206].mxu0 }
 0x4d5   : > { %v6830_v39 = vpop.f32.mrb[207].mxu0 }
 0x4d6   : > { %v4868_v3 = vpack.c.bf16 %v4859_v38, %v4858_v8  ;;  %v4743_v4 = vadd.f32 %v6828_v51, %v9807_v18  ;;  %v6831_v26 = vadd.f32 %v6830_v39, %v6829_v1 }
 0x4d8   : > { %v4840_v29 = vadd.f32 %v9719_v49, %v4743_v4  ;;  %v4746_v20 = vadd.f32 %v6831_v26, %v9810_v34  ;;  %7116 = vmatprep.mubr.bf16.mxu0 %v4868_v3  ;;  %v9854_v49 = vld [vmem:[%s9925_s6] ss:$0 sm:$0xff] }
 0x4da   : > { %v4843_v35 = vadd.f32 %v9723_v0, %v4746_v20  ;;  %v4860_v62 = vmax.f32 %v4840_v29, 0.0 }
 0x4dc   : > { %v4861_v55 = vmax.f32 %v4843_v35, 0.0 }
 0x4de   : > { %v4869_v43 = vpack.c.bf16 %v4861_v55, %v4860_v62 }
 0x4e0   : > { %7117 = vmatmul.mubr.bf16.gmra.mrb[76].mxu0 %v4869_v43 }
 0x583   : > { %v7106_v18 = vpop.f32.mrb[64].mxu0 }
 0x584   : > { %v5057_v0 = vadd.f32 %v7106_v18, %v9849_v57  ;;  %v4969_v34 = vpop.f32.mrb[65].mxu0 }
 0x585   : > { %v5055_v40 = vadd.f32 %v9849_v57, %v4969_v34  ;;  %v7107_v52 = vpop.f32.mrb[66].mxu0 }
 0x586   : > { %v5080_v45 = vadd.f32 %v9854_v49, %v5057_v0  ;;  %v5058_v21 = vadd.f32 %v7107_v52, %v9849_v57  ;;  %v4972_v28 = vpop.f32.mrb[67].mxu0 }
 0x587   : > { %v5078_v60 = vadd.f32 %v9854_v49, %v5055_v40  ;;  %v5056_v31 = vadd.f32 %v9849_v57, %v4972_v28 }
 0x588   : > { %v5096_v7 = vmax.f32 %v5080_v45, 0.0  ;;  %v5081_v33 = vadd.f32 %v9854_v49, %v5058_v21 }
 0x589   : > { %v5094_v56 = vmax.f32 %v5078_v60, 0.0  ;;  %v5079_v11 = vadd.f32 %v9854_v49, %v5056_v31 }
 0x58a   : > { %5112 = vst [vmem:[%s7626_s22 + $0x10] sm:$0xff] %v5096_v7  ;;  %v5097_v25 = vmax.f32 %v5081_v33, 0.0 }
 0x58b   : > { %5110 = vst [vmem:[%s7626_s22] sm:$0xff] %v5094_v56  ;;  %v5095_v59 = vmax.f32 %v5079_v11, 0.0 }
 0x58c   : > { %5113 = vst [vmem:[%s7626_s22 + $0x18] sm:$0xff] %v5097_v25 }
 0x58d   : > { %5111 = vst [vmem:[%s7626_s22 + $0x8] sm:$0xff] %v5095_v59 }
 0x593   : > { %v7110_v5 = vpop.f32.mrb[68].mxu0 }
 0x594   : > { %v5061_v53 = vadd.f32 %v7110_v5, %v9849_v57  ;;  %v4985_v10 = vpop.f32.mrb[69].mxu0 }
 0x595   : > { %v5059_v27 = vadd.f32 %v9849_v57, %v4985_v10  ;;  %v7111_v63 = vpop.f32.mrb[70].mxu0 }
 0x596   : > { %v5084_v6 = vadd.f32 %v9854_v49, %v5061_v53  ;;  %v5062_v61 = vadd.f32 %v7111_v63, %v9849_v57  ;;  %v4988_v19 = vpop.f32.mrb[71].mxu0 }
 0x597   : > { %v5082_v30 = vadd.f32 %v9854_v49, %v5059_v27  ;;  %v5060_v41 = vadd.f32 %v9849_v57, %v4988_v19 }
 0x598   : > { %v5100_v50 = vmax.f32 %v5084_v6, 0.0  ;;  %v5085_v54 = vadd.f32 %v9854_v49, %v5062_v61 }
 0x599   : > { %v5098_v2 = vmax.f32 %v5082_v30, 0.0  ;;  %v5083_v36 = vadd.f32 %v9854_v49, %v5060_v41 }
 0x59a   : > { %5116 = vst [vmem:[%s7626_s22 + $0x30] sm:$0xff] %v5100_v50  ;;  %v5101_v12 = vmax.f32 %v5085_v54, 0.0 }
 0x59b   : > { %5114 = vst [vmem:[%s7626_s22 + $0x20] sm:$0xff] %v5098_v2  ;;  %v5099_v42 = vmax.f32 %v5083_v36, 0.0 }
 0x59c   : > { %5117 = vst [vmem:[%s7626_s22 + $0x38] sm:$0xff] %v5101_v12 }
 0x59d   : > { %5115 = vst [vmem:[%s7626_s22 + $0x28] sm:$0xff] %v5099_v42 }
 0x5a3   : > { %v7114_v47 = vpop.f32.mrb[72].mxu0 }
 0x5a4   : > { %v5065_v37 = vadd.f32 %v7114_v47, %v9849_v57  ;;  %v5001_v13 = vpop.f32.mrb[73].mxu0 }
 0x5a5   : > { %v5063_v15 = vadd.f32 %v9849_v57, %v5001_v13  ;;  %v7115_v17 = vpop.f32.mrb[74].mxu0 }
 0x5a6   : > { %v5088_v58 = vadd.f32 %v9854_v49, %v5065_v37  ;;  %v5066_v22 = vadd.f32 %v7115_v17, %v9849_v57  ;;  %v5004_v46 = vpop.f32.mrb[75].mxu0 }
 0x5a7   : > { %v5086_v48 = vadd.f32 %v9854_v49, %v5063_v15  ;;  %v5064_v44 = vadd.f32 %v9849_v57, %v5004_v46 }
 0x5a8   : > { %v5104_v16 = vmax.f32 %v5088_v58, 0.0  ;;  %v5089_v32 = vadd.f32 %v9854_v49, %v5066_v22 }
 0x5a9   : > { %v5102_v14 = vmax.f32 %v5086_v48, 0.0  ;;  %v5087_v23 = vadd.f32 %v9854_v49, %v5064_v44 }
 0x5aa   : > { %5120 = vst [vmem:[%s7626_s22 + $0x50] sm:$0xff] %v5104_v16  ;;  %v5105_v24 = vmax.f32 %v5089_v32, 0.0 }
 0x5ab   : > { %5118 = vst [vmem:[%s7626_s22 + $0x40] sm:$0xff] %v5102_v14  ;;  %v5103_v9 = vmax.f32 %v5087_v23, 0.0 }
 0x5ac   : > { %5121 = vst [vmem:[%s7626_s22 + $0x58] sm:$0xff] %v5105_v24 }
 0x5ad   : > { %5119 = vst [vmem:[%s7626_s22 + $0x48] sm:$0xff] %v5103_v9 }
 0x5b3   : > { %v7118_v8 = vpop.f32.mrb[76].mxu0 }
 0x5b4   : > { %v5069_v38 = vadd.f32 %v7118_v8, %v9849_v57  ;;  %v5017_v51 = vpop.f32.mrb[77].mxu0 }
 0x5b5   : > { %v5067_v1 = vadd.f32 %v9849_v57, %v5017_v51  ;;  %v7119_v39 = vpop.f32.mrb[78].mxu0 }
 0x5b6   : > { %v5092_v3 = vadd.f32 %v9854_v49, %v5069_v38  ;;  %v5070_v4 = vadd.f32 %v7119_v39, %v9849_v57  ;;  %v5020_v26 = vpop.f32.mrb[79].mxu0 }
 0x5b7   : > { %v5090_v29 = vadd.f32 %v9854_v49, %v5067_v1  ;;  %v5068_v20 = vadd.f32 %v9849_v57, %v5020_v26 }
 0x5b8   : > { %v5108_v35 = vmax.f32 %v5092_v3, 0.0  ;;  %v5093_v62 = vadd.f32 %v9854_v49, %v5070_v4 }
 0x5b9   : > { %v5106_v55 = vmax.f32 %v5090_v29, 0.0  ;;  %v5091_v43 = vadd.f32 %v9854_v49, %v5068_v20 }
 0x5ba   : > { %5124 = vst [vmem:[%s7626_s22 + $0x70] sm:$0xff] %v5108_v35  ;;  %v5109_v18 = vmax.f32 %v5093_v62, 0.0 }
 0x5bb   : > { %5122 = vst [vmem:[%s7626_s22 + $0x60] sm:$0xff] %v5106_v55  ;;  %v5107_v0 = vmax.f32 %v5091_v43, 0.0 }
 0x5bc   : > { %5125 = vst [vmem:[%s7626_s22 + $0x78] sm:$0xff] %v5109_v18 }
 0x5bd   : > { %5123 = vst [vmem:[%s7626_s22 + $0x68] sm:$0xff] %v5107_v0 }
 0x5be PF: > { %s17_s28 = sadd.s32 1, %s7534_s28   ;;  %s10085_s24 = smov %s7526_s26 }
 0x5bf   : > { %p14_p13 = scmp.ge.s32.totalorder %s17_s28, 6   ;;  %s10086_s25 = smov %s7530_s27 }
 0x5c0   : > { %s10087_s26 = smov %s10090_s29  ;;  %s10088_s27 = smov %s10094_s30 }
 0x5c1   :  { %16 = sbr.rel (!%p14_p13) target bundleno = 3 (0x3), region = 183 }
 0x5c8   :  { %5154 = vsyncmov [#allocation3] }
 0x5cb   :  { %s5155_s10 = vpop.sfrf %5154 }
 0x5cc   :  { %p5962_p0 = scmp.ne.s32.totalorder %s5155_s10, 0 }
 0x5ce   :  { %5159 = shalt.err (%p5962_p0)  }
 0x5cf   :  { %5161 = vsyncmov [#allocation3 + $0x1] }
 0x5d2   :  { %s5162_s22 = vpop.sfrf %5161 }
 0x5d3   :  { %p5963_p1 = scmp.ne.s32.totalorder %s5162_s22, 0 }
 0x5d5   :  { %5166 = shalt.err (%p5963_p1)  }

</bundles_post_ra>
